<compile_context>
chip_gen: v5e
topology: v5e:2x2
jax: 0.10.0
libtpu: 0.0.40
codegen_flags: <defaults>
</compile_context>

<pallas_src>
import math

import jax
import jax.numpy as jnp
import numpy as np
from jax.experimental import pallas as pl
from jax.experimental.pallas import tpu as pltpu

# --------------------------------------------------------------------------
# Config (stand-ins for the configparser values read in the PyTorch module).
# --------------------------------------------------------------------------
ENCODER_HIDDEN = 32          # config['model']['encoder_hidden']
NUM_HEADS = 2                # duration_transformer_head
VARIANCE_FILTER = 64         # variance_filter_size
CONV_KERNEL = (3, 3)         # (conv_kernel_1, conv_kernel_2)
NUM_LAYERS = 2               # TransformerEncoder(num_layers=2)
LN_EPS = 1e-5
# TODO(synk): dropout layers are inference-mode identities and are omitted.
# TODO(synk): like the PyTorch module (mask is not passed to the transformer),
#             attention/LayerNorm see all frames; mask is only applied at the end.

PARAM_ORDER = ("qkv_w", "qkv_b", "op_w", "op_b", "ln1_w", "ln1_b",
               "ln2_w", "ln2_b", "c1_w", "c1_b", "c2_w", "c2_b",
               "lin_w", "lin_b")


# --------------------------------------------------------------------------
# Kernel helpers (traced inside the Pallas body).
# --------------------------------------------------------------------------
def _layer_norm(h, w, b):
    mu = jnp.mean(h, axis=-1, keepdims=True)
    hc = h - mu
    var = jnp.mean(hc * hc, axis=-1, keepdims=True)
    return hc * jax.lax.rsqrt(var + LN_EPS) * w + b


# --------------------------------------------------------------------------
# The Pallas kernel: a whole batch block per grid step.
# --------------------------------------------------------------------------
def _conformer_kernel(x_ref, mask_ref,
                      qkv_w_ref, qkv_b_ref, op_w_ref, op_b_ref,
                      ln1_w_ref, ln1_b_ref, ln2_w_ref, ln2_b_ref,
                      c1_w_ref, c1_b_ref, c2_w_ref, c2_b_ref,
                      lin_w_ref, lin_b_ref,
                      out_ref):
    x = x_ref[...]                                   # (Bb, T, D)
    bb, t, d = x.shape
    bt = bb * t
    dh = d // NUM_HEADS
    scale = 1.0 / math.sqrt(dh)
    k1, k2 = CONV_KERNEL
    left1, left2 = (k1 - 1) // 2, (k2 - 1) // 2

    h = x.reshape(bt, d)                             # token-major, row r = b*T + t

    # ---- hoisted conv tap validity masks (built once, reused across layers) ----
    # JAX does not CSE iota/broadcast, so these are deliberately outside the loops.
    row = jax.lax.broadcasted_iota(jnp.int32, (bt, 1), 0)
    if t & (t - 1) == 0:
        pos = jnp.bitwise_and(row, t - 1)            # row % t (t is a power of 2)
    else:
        pos = jax.lax.rem(row, t)
    offsets = set()
    for ksz, left in ((k1, left1), (k2, left2)):
        offsets.update(kk - left for kk in range(ksz))
    valid = {}
    for off in sorted(offsets):
        if off != 0:
            ok = jnp.logical_and(pos + off >= 0, pos + off <= t - 1)
            valid[off] = ok.astype(jnp.float32)      # (BT, 1)

    def shifted(flat, off):
        # out[r] = flat[r + off] within each length-t sequence, zero at the edges.
        # Static sublane slice + zero pad; the per-sequence mask also removes the
        # row that would otherwise leak in from the neighbouring sequence.
        if off == 0:
            return flat
        n, c = flat.shape
        if off > 0:
            sh = jnp.concatenate(
                [flat[off:, :], jnp.zeros((off, c), flat.dtype)], axis=0)
        else:
            sh = jnp.concatenate(
                [jnp.zeros((-off, c), flat.dtype), flat[:off, :]], axis=0)
        return sh * valid[off]

    for l in range(NUM_LAYERS):
        # ---- self-attention block (post-norm TransformerEncoderLayer) ----
        # fused QKV: one (BT, D) @ (D, 3D) matmul
        qkv = (jnp.dot(h, qkv_w_ref[l], preferred_element_type=jnp.float32)
               + qkv_b_ref[l])
        q = qkv[:, 0 * d:1 * d].reshape(bb, t, d)
        k = qkv[:, 1 * d:2 * d].reshape(bb, t, d)
        v = qkv[:, 2 * d:3 * d].reshape(bb, t, d)

        heads = []
        for hd in range(NUM_HEADS):
            sl = slice(hd * dh, (hd + 1) * dh)
            s = jnp.einsum('bqd,bkd->bqk', q[..., sl] * scale, k[..., sl],
                           preferred_element_type=jnp.float32)
            s = s - jnp.max(s, axis=-1, keepdims=True)
            p = jnp.exp(s)
            p = p * pl.reciprocal(jnp.sum(p, axis=-1, keepdims=True), approx=True)
            heads.append(jnp.einsum('bqk,bkd->bqd', p, v[..., sl],
                                    preferred_element_type=jnp.float32))
        attn = jnp.concatenate(heads, axis=-1).reshape(bt, d)
        attn = (jnp.dot(attn, op_w_ref[l], preferred_element_type=jnp.float32)
                + op_b_ref[l])
        h = _layer_norm(h + attn, ln1_w_ref[l], ln1_b_ref[l])

        # ---- conformer FF block: im2col Conv1d -> ReLU -> im2col Conv1d ----
        cols = jnp.concatenate([shifted(h, kk - left1) for kk in range(k1)],
                               axis=-1)                        # (BT, K1*D)
        ff = (jnp.dot(cols, c1_w_ref[l], preferred_element_type=jnp.float32)
              + c1_b_ref[l])
        ff = jnp.maximum(ff, 0.0)
        cols = jnp.concatenate([shifted(ff, kk - left2) for kk in range(k2)],
                               axis=-1)                        # (BT, K2*F)
        ff = (jnp.dot(cols, c2_w_ref[l], preferred_element_type=jnp.float32)
              + c2_b_ref[l])
        h = _layer_norm(h + ff, ln2_w_ref[l], ln2_b_ref[l])

    # ---- final Linear(D, 1) as a lane reduction + masked_fill (lane-dense out) ----
    y = jnp.sum(h.reshape(bb, t, d) * lin_w_ref[...], axis=-1) + lin_b_ref[...]
    out_ref[...] = jnp.where(mask_ref[...] > 0.5, 0.0, y)       # (Bb, T)


# --------------------------------------------------------------------------
# Wrapper.
# --------------------------------------------------------------------------
def _pick_batch_block(b, t, target_rows=256):
    """Largest divisor of b whose Bb*T comes close to >= target_rows rows."""
    bb = min(b, max(1, -(-target_rows // t)))
    while b % bb:
        bb -= 1
    return bb


def _cost_estimate(b, t, d, f, k1, k2):
    per_layer = (
        2 * b * t * d * (3 * d)                       # fused QKV
        + 2 * b * NUM_HEADS * t * t * (d // NUM_HEADS) * 2   # scores + P@V
        + 2 * b * t * d * d                           # out projection
        + 2 * b * t * (k1 * d) * f                    # conv1 (im2col matmul)
        + 2 * b * t * (k2 * f) * d                    # conv2 (im2col matmul)
    )
    flops = NUM_LAYERS * per_layer + 2 * b * t * d    # final linear
    transcendentals = NUM_LAYERS * b * NUM_HEADS * t * t   # softmax exp
    return flops, transcendentals


def conformer_variance_predictor(x, mask, params):
    """x: (B, T, D) float32, mask: (B, T) bool -> (B, T) float32."""
    b, t, d = x.shape
    mask_f = mask.astype(jnp.float32)                 # lane-dense (B, T)
    weights = [params[name] for name in PARAM_ORDER]

    bb = _pick_batch_block(b, t)
    grid = (b // bb,)

    def full_spec(arr):
        nd = arr.ndim
        return pl.BlockSpec(arr.shape, lambda i, _nd=nd: (0,) * _nd)

    flops, transcendentals = _cost_estimate(b, t, d, VARIANCE_FILTER, *CONV_KERNEL)
    bytes_accessed = (x.nbytes + mask_f.nbytes + b * t * 4
                      + sum(int(w.nbytes) for w in weights))

    out = pl.pallas_call(
        _conformer_kernel,
        out_shape=jax.ShapeDtypeStruct((b, t), jnp.float32),
        grid_spec=pltpu.PrefetchScalarGridSpec(
            num_scalar_prefetch=0,
            grid=grid,
            in_specs=[pl.BlockSpec((bb, t, d), lambda i: (i, 0, 0)),
                      pl.BlockSpec((bb, t), lambda i: (i, 0))]
                     + [full_spec(w) for w in weights],
            out_specs=pl.BlockSpec((bb, t), lambda i: (i, 0)),
        ),
        compiler_params=pltpu.CompilerParams(dimension_semantics=("parallel",)),
        cost_estimate=pl.CostEstimate(flops=int(flops),
                                      transcendentals=int(transcendentals),
                                      bytes_accessed=int(bytes_accessed)),
    )(x, mask_f, *weights)
    return out


# --------------------------------------------------------------------------
# Deterministic parameter initialization (synthetic, no checkpoint).
# Layouts are pre-fused / pre-flattened for the kernel:
#   qkv_w: (L, D, 3D)   qkv = x @ qkv_w[l]   (q|k|v along the last axis)
#   c1_w : (L, K1*D, F) im2col weight, tap-major rows (tap k -> rows k*D:(k+1)*D)
#   c2_w : (L, K2*F, D)
# --------------------------------------------------------------------------
def init_params(key):
    d, f = ENCODER_HIDDEN, VARIANCE_FILTER
    k1, k2 = CONV_KERNEL
    L = NUM_LAYERS
    keys = jax.random.split(key, 9)

    def nrm(k, shape, scale=0.02):
        return (scale * jax.random.normal(k, shape)).astype(jnp.float32)

    return dict(
        qkv_w=nrm(keys[0], (L, d, 3 * d)),
        qkv_b=nrm(keys[1], (L, 1, 3 * d)),
        op_w=nrm(keys[2], (L, d, d)),          # pre-transposed out_proj weight
        op_b=nrm(keys[3], (L, 1, d)),
        ln1_w=jnp.ones((L, 1, d), jnp.float32),
        ln1_b=jnp.zeros((L, 1, d), jnp.float32),
        ln2_w=jnp.ones((L, 1, d), jnp.float32),
        ln2_b=jnp.zeros((L, 1, d), jnp.float32),
        c1_w=nrm(keys[4], (L, k1 * d, f)),
        c1_b=nrm(keys[5], (L, 1, f)),
        c2_w=nrm(keys[6], (L, k2 * f, d)),
        c2_b=nrm(keys[7], (L, 1, d)),
        lin_w=nrm(keys[8], (1, d)),
        lin_b=jnp.zeros((1, 1), jnp.float32),
    )


# --------------------------------------------------------------------------
# Pure-JAX reference (same math, plain XLA) for correctness check.
# --------------------------------------------------------------------------
def reference_forward(x, mask, params):
    b, t, d = x.shape
    dh = d // NUM_HEADS
    scale = 1.0 / math.sqrt(dh)

    def ln(h, w, b_):
        mu = jnp.mean(h, axis=-1, keepdims=True)
        var = jnp.mean((h - mu) ** 2, axis=-1, keepdims=True)
        return (h - mu) / jnp.sqrt(var + LN_EPS) * w + b_

    def conv_same(h, w_flat, bias, ksize, cin, cout):
        w = w_flat.reshape(ksize, cin, cout)
        left = (ksize - 1) // 2
        hp = jnp.pad(h, ((0, 0), (left, ksize - 1 - left), (0, 0)))
        out = bias
        for k in range(ksize):
            out = out + jnp.einsum('btc,cf->btf', hp[:, k:k + t], w[k])
        return out

    h = x
    for l in range(NUM_LAYERS):
        qkv = jnp.einsum('btd,de->bte', h, params['qkv_w'][l]) + params['qkv_b'][l]
        q, k, v = qkv[..., :d], qkv[..., d:2 * d], qkv[..., 2 * d:]
        heads = []
        for hd in range(NUM_HEADS):
            sl = slice(hd * dh, (hd + 1) * dh)
            s = jnp.einsum('btd,bsd->bts', q[..., sl] * scale, k[..., sl])
            p = jax.nn.softmax(s, axis=-1)
            heads.append(jnp.einsum('bts,bsd->btd', p, v[..., sl]))
        attn = jnp.einsum('btd,de->bte', jnp.concatenate(heads, -1),
                          params['op_w'][l]) + params['op_b'][l]
        h = ln(h + attn, params['ln1_w'][l], params['ln1_b'][l])
        ff = conv_same(h, params['c1_w'][l], params['c1_b'][l], CONV_KERNEL[0],
                       d, VARIANCE_FILTER)
        ff = jax.nn.relu(ff)
        ff = conv_same(ff, params['c2_w'][l], params['c2_b'][l], CONV_KERNEL[1],
                       VARIANCE_FILTER, d)
        h = ln(h + ff, params['ln2_w'][l], params['ln2_b'][l])

    out = (jnp.einsum('btd,od->bto', h, params['lin_w']) + params['lin_b'])[..., 0]
    return jnp.where(mask, 0.0, out)


if __name__ == "__main__":
    key = jax.random.PRNGKey(0)
    kx, kp = jax.random.split(key)
    B, T, D = 2, 16, ENCODER_HIDDEN

    x = jax.random.normal(kx, (B, T, D), jnp.float32)
    # mask: first batch fully unmasked, second batch masks the last 4 frames.
    mask = jnp.arange(T)[None, :] >= jnp.array([[T], [T - 4]])
    params = init_params(kp)

    out = conformer_variance_predictor(x, mask, params)
    out = jax.block_until_ready(out)

    ref = reference_forward(x, mask, params)
    np.testing.assert_allclose(np.asarray(out), np.asarray(ref),
                               rtol=5e-2, atol=5e-3)
    print("KERNEL_OK")
</pallas_src>

<mosaic_0001>
module attributes {stable_mosaic.version = 11 : i64} {
  func.func @_conformer_kernel(%arg0: i32, %arg1: memref<2x16x32xf32, #tpu.memory_space<vmem>>, %arg2: memref<2x16xf32, #tpu.memory_space<vmem>>, %arg3: memref<2x32x96xf32, #tpu.memory_space<vmem>>, %arg4: memref<2x1x96xf32, #tpu.memory_space<vmem>>, %arg5: memref<2x32x32xf32, #tpu.memory_space<vmem>>, %arg6: memref<2x1x32xf32, #tpu.memory_space<vmem>>, %arg7: memref<2x1x32xf32, #tpu.memory_space<vmem>>, %arg8: memref<2x1x32xf32, #tpu.memory_space<vmem>>, %arg9: memref<2x1x32xf32, #tpu.memory_space<vmem>>, %arg10: memref<2x1x32xf32, #tpu.memory_space<vmem>>, %arg11: memref<2x96x64xf32, #tpu.memory_space<vmem>>, %arg12: memref<2x1x64xf32, #tpu.memory_space<vmem>>, %arg13: memref<2x192x32xf32, #tpu.memory_space<vmem>>, %arg14: memref<2x1x32xf32, #tpu.memory_space<vmem>>, %arg15: memref<1x32xf32, #tpu.memory_space<vmem>>, %arg16: memref<1x1xf32, #tpu.memory_space<vmem>>, %arg17: memref<2x16xf32, #tpu.memory_space<vmem>>) attributes {dimension_semantics = [#tpu.dimension_semantics<parallel>], iteration_bounds = array<i64: 1>, scalar_prefetch = 0 : i64, scratch_operands = 0 : i64, tpu.core_type = #tpu.core_type<tc>, window_params = [{transform_indices = @transform_0, window_bounds = array<i64: 2, 16, 32>}, {transform_indices = @transform_1, window_bounds = array<i64: 2, 16>}, {pipeline_mode = #tpu.pipeline_mode<synchronous>, transform_indices = @transform_2, window_bounds = array<i64: 2, 32, 96>}, {pipeline_mode = #tpu.pipeline_mode<synchronous>, transform_indices = @transform_3, window_bounds = array<i64: 2, 1, 96>}, {pipeline_mode = #tpu.pipeline_mode<synchronous>, transform_indices = @transform_4, window_bounds = array<i64: 2, 32, 32>}, {pipeline_mode = #tpu.pipeline_mode<synchronous>, transform_indices = @transform_5, window_bounds = array<i64: 2, 1, 32>}, {pipeline_mode = #tpu.pipeline_mode<synchronous>, transform_indices = @transform_6, window_bounds = array<i64: 2, 1, 32>}, {pipeline_mode = #tpu.pipeline_mode<synchronous>, transform_indices = @transform_7, window_bounds = array<i64: 2, 1, 32>}, {pipeline_mode = #tpu.pipeline_mode<synchronous>, transform_indices = @transform_8, window_bounds = array<i64: 2, 1, 32>}, {pipeline_mode = #tpu.pipeline_mode<synchronous>, transform_indices = @transform_9, window_bounds = array<i64: 2, 1, 32>}, {pipeline_mode = #tpu.pipeline_mode<synchronous>, transform_indices = @transform_10, window_bounds = array<i64: 2, 96, 64>}, {pipeline_mode = #tpu.pipeline_mode<synchronous>, transform_indices = @transform_11, window_bounds = array<i64: 2, 1, 64>}, {pipeline_mode = #tpu.pipeline_mode<synchronous>, transform_indices = @transform_12, window_bounds = array<i64: 2, 192, 32>}, {pipeline_mode = #tpu.pipeline_mode<synchronous>, transform_indices = @transform_13, window_bounds = array<i64: 2, 1, 32>}, {pipeline_mode = #tpu.pipeline_mode<synchronous>, transform_indices = @transform_14, window_bounds = array<i64: 1, 32>}, {pipeline_mode = #tpu.pipeline_mode<synchronous>, transform_indices = @transform_15, window_bounds = array<i64: 1, 1>}, {transform_indices = @transform_16, window_bounds = array<i64: 2, 16>}]} {
    %c0 = arith.constant 0 : index
    %c0_0 = arith.constant 0 : index
    %c0_1 = arith.constant 0 : index
    %0 = vector.load %arg1[%c0, %c0_0, %c0_1] : memref<2x16x32xf32, #tpu.memory_space<vmem>>, vector<2x16x32xf32>
    %1 = vector.shape_cast %0 : vector<2x16x32xf32> to vector<32x32xf32>
    %2 = tpu.iota {dimensions = array<i32: 0>} : vector<32x1xi32>
    %c15_i32 = arith.constant 15 : i32
    %3 = vector.broadcast %c15_i32 : i32 to vector<32x1xi32>
    %4 = arith.andi %2, %3 : vector<32x1xi32>
    %c-1_i32 = arith.constant -1 : i32
    %5 = vector.broadcast %c-1_i32 : i32 to vector<32x1xi32>
    %6 = arith.addi %4, %5 : vector<32x1xi32>
    %c0_i32 = arith.constant 0 : i32
    %7 = vector.broadcast %c0_i32 : i32 to vector<32x1xi32>
    %8 = arith.cmpi sge, %6, %7 : vector<32x1xi32>
    %c-1_i32_2 = arith.constant -1 : i32
    %9 = vector.broadcast %c-1_i32_2 : i32 to vector<32x1xi32>
    %10 = arith.addi %4, %9 : vector<32x1xi32>
    %c15_i32_3 = arith.constant 15 : i32
    %11 = vector.broadcast %c15_i32_3 : i32 to vector<32x1xi32>
    %12 = arith.cmpi sle, %10, %11 : vector<32x1xi32>
    %13 = arith.andi %8, %12 : vector<32x1xi1>
    %14 = arith.extui %13 : vector<32x1xi1> to vector<32x1xi32>
    %15 = arith.sitofp %14 : vector<32x1xi32> to vector<32x1xf32>
    %c1_i32 = arith.constant 1 : i32
    %16 = vector.broadcast %c1_i32 : i32 to vector<32x1xi32>
    %17 = arith.addi %4, %16 : vector<32x1xi32>
    %c0_i32_4 = arith.constant 0 : i32
    %18 = vector.broadcast %c0_i32_4 : i32 to vector<32x1xi32>
    %19 = arith.cmpi sge, %17, %18 : vector<32x1xi32>
    %c1_i32_5 = arith.constant 1 : i32
    %20 = vector.broadcast %c1_i32_5 : i32 to vector<32x1xi32>
    %21 = arith.addi %4, %20 : vector<32x1xi32>
    %c15_i32_6 = arith.constant 15 : i32
    %22 = vector.broadcast %c15_i32_6 : i32 to vector<32x1xi32>
    %23 = arith.cmpi sle, %21, %22 : vector<32x1xi32>
    %24 = arith.andi %19, %23 : vector<32x1xi1>
    %25 = arith.extui %24 : vector<32x1xi1> to vector<32x1xi32>
    %26 = arith.sitofp %25 : vector<32x1xi32> to vector<32x1xf32>
    %c0_7 = arith.constant 0 : index
    %c0_8 = arith.constant 0 : index
    %c0_9 = arith.constant 0 : index
    %27 = vector.load %arg3[%c0_7, %c0_8, %c0_9] : memref<2x32x96xf32, #tpu.memory_space<vmem>>, vector<1x32x96xf32>
    %28 = vector.shape_cast %27 : vector<1x32x96xf32> to vector<32x96xf32>
    %cst = arith.constant dense<0.000000e+00> : vector<32x96xf32>
    %29 = tpu.matmul %1, %28, %cst {dimension_numbers = #tpu.dot_dimension_numbers<[1], [0], [0], [1], [0, 0, 1, 1], [], []>} : vector<32x32xf32>, vector<32x96xf32>, vector<32x96xf32> -> vector<32x96xf32>
    %c0_10 = arith.constant 0 : index
    %c0_11 = arith.constant 0 : index
    %c0_12 = arith.constant 0 : index
    %30 = vector.load %arg4[%c0_10, %c0_11, %c0_12] : memref<2x1x96xf32, #tpu.memory_space<vmem>>, vector<1x1x96xf32>
    %31 = vector.shape_cast %30 : vector<1x1x96xf32> to vector<1x96xf32>
    %32 = vector.broadcast %31 : vector<1x96xf32> to vector<32x96xf32>
    %33 = arith.addf %29, %32 : vector<32x96xf32>
    %34 = vector.extract_strided_slice %33 {offsets = [0, 0], sizes = [32, 32], strides = [1, 1]} : vector<32x96xf32> to vector<32x32xf32>
    %35 = vector.shape_cast %34 : vector<32x32xf32> to vector<2x16x32xf32>
    %36 = vector.extract_strided_slice %33 {offsets = [0, 32], sizes = [32, 32], strides = [1, 1]} : vector<32x96xf32> to vector<32x32xf32>
    %37 = vector.shape_cast %36 : vector<32x32xf32> to vector<2x16x32xf32>
    %38 = vector.extract_strided_slice %33 {offsets = [0, 64], sizes = [32, 32], strides = [1, 1]} : vector<32x96xf32> to vector<32x32xf32>
    %39 = vector.shape_cast %38 : vector<32x32xf32> to vector<2x16x32xf32>
    %40 = vector.extract_strided_slice %35 {offsets = [0, 0, 0], sizes = [2, 16, 16], strides = [1, 1, 1]} : vector<2x16x32xf32> to vector<2x16x16xf32>
    %cst_13 = arith.constant 2.500000e-01 : f32
    %41 = vector.broadcast %cst_13 : f32 to vector<2x16x16xf32>
    %42 = arith.mulf %40, %41 : vector<2x16x16xf32>
    %43 = vector.extract_strided_slice %37 {offsets = [0, 0, 0], sizes = [2, 16, 16], strides = [1, 1, 1]} : vector<2x16x32xf32> to vector<2x16x16xf32>
    "tpu.trace_start"() <{level = 10 : i32, message = "bqd,bkd->bqk"}> : () -> ()
    %cst_14 = arith.constant dense<0.000000e+00> : vector<2x16x16xf32>
    %44 = tpu.matmul %42, %43, %cst_14 {dimension_numbers = #tpu.dot_dimension_numbers<[2], [2], [1], [1], [0, 0, 0, 1, 1, 1], [0], [0]>} : vector<2x16x16xf32>, vector<2x16x16xf32>, vector<2x16x16xf32> -> vector<2x16x16xf32>
    "tpu.trace_stop"() : () -> ()
    %cst_15 = arith.constant dense<0xFF800000> : vector<2x16xf32>
    %45 = vector.multi_reduction <maximumf>, %44, %cst_15 [2] : vector<2x16x16xf32> to vector<2x16xf32>
    %46 = vector.shape_cast %45 : vector<2x16xf32> to vector<2x16x1xf32>
    %47 = vector.broadcast %46 : vector<2x16x1xf32> to vector<2x16x16xf32>
    %48 = arith.subf %44, %47 : vector<2x16x16xf32>
    %49 = math.exp %48 : vector<2x16x16xf32>
    %cst_16 = arith.constant dense<0.000000e+00> : vector<2x16xf32>
    %50 = vector.multi_reduction <add>, %49, %cst_16 [2] : vector<2x16x16xf32> to vector<2x16xf32>
    %51 = vector.shape_cast %50 : vector<2x16xf32> to vector<2x16x1xf32>
    %52 = tpu.reciprocal %51 {approx = true} : vector<2x16x1xf32> -> vector<2x16x1xf32>
    %53 = vector.broadcast %52 : vector<2x16x1xf32> to vector<2x16x16xf32>
    %54 = arith.mulf %49, %53 : vector<2x16x16xf32>
    %55 = vector.extract_strided_slice %39 {offsets = [0, 0, 0], sizes = [2, 16, 16], strides = [1, 1, 1]} : vector<2x16x32xf32> to vector<2x16x16xf32>
    "tpu.trace_start"() <{level = 10 : i32, message = "bqk,bkd->bqd"}> : () -> ()
    %cst_17 = arith.constant dense<0.000000e+00> : vector<2x16x16xf32>
    %56 = tpu.matmul %54, %55, %cst_17 {dimension_numbers = #tpu.dot_dimension_numbers<[2], [1], [1], [2], [0, 0, 0, 1, 1, 2], [0], [0]>} : vector<2x16x16xf32>, vector<2x16x16xf32>, vector<2x16x16xf32> -> vector<2x16x16xf32>
    "tpu.trace_stop"() : () -> ()
    %57 = vector.extract_strided_slice %35 {offsets = [0, 0, 16], sizes = [2, 16, 16], strides = [1, 1, 1]} : vector<2x16x32xf32> to vector<2x16x16xf32>
    %cst_18 = arith.constant 2.500000e-01 : f32
    %58 = vector.broadcast %cst_18 : f32 to vector<2x16x16xf32>
    %59 = arith.mulf %57, %58 : vector<2x16x16xf32>
    %60 = vector.extract_strided_slice %37 {offsets = [0, 0, 16], sizes = [2, 16, 16], strides = [1, 1, 1]} : vector<2x16x32xf32> to vector<2x16x16xf32>
    "tpu.trace_start"() <{level = 10 : i32, message = "bqd,bkd->bqk"}> : () -> ()
    %cst_19 = arith.constant dense<0.000000e+00> : vector<2x16x16xf32>
    %61 = tpu.matmul %59, %60, %cst_19 {dimension_numbers = #tpu.dot_dimension_numbers<[2], [2], [1], [1], [0, 0, 0, 1, 1, 1], [0], [0]>} : vector<2x16x16xf32>, vector<2x16x16xf32>, vector<2x16x16xf32> -> vector<2x16x16xf32>
    "tpu.trace_stop"() : () -> ()
    %cst_20 = arith.constant dense<0xFF800000> : vector<2x16xf32>
    %62 = vector.multi_reduction <maximumf>, %61, %cst_20 [2] : vector<2x16x16xf32> to vector<2x16xf32>
    %63 = vector.shape_cast %62 : vector<2x16xf32> to vector<2x16x1xf32>
    %64 = vector.broadcast %63 : vector<2x16x1xf32> to vector<2x16x16xf32>
    %65 = arith.subf %61, %64 : vector<2x16x16xf32>
    %66 = math.exp %65 : vector<2x16x16xf32>
    %cst_21 = arith.constant dense<0.000000e+00> : vector<2x16xf32>
    %67 = vector.multi_reduction <add>, %66, %cst_21 [2] : vector<2x16x16xf32> to vector<2x16xf32>
    %68 = vector.shape_cast %67 : vector<2x16xf32> to vector<2x16x1xf32>
    %69 = tpu.reciprocal %68 {approx = true} : vector<2x16x1xf32> -> vector<2x16x1xf32>
    %70 = vector.broadcast %69 : vector<2x16x1xf32> to vector<2x16x16xf32>
    %71 = arith.mulf %66, %70 : vector<2x16x16xf32>
    %72 = vector.extract_strided_slice %39 {offsets = [0, 0, 16], sizes = [2, 16, 16], strides = [1, 1, 1]} : vector<2x16x32xf32> to vector<2x16x16xf32>
    "tpu.trace_start"() <{level = 10 : i32, message = "bqk,bkd->bqd"}> : () -> ()
    %cst_22 = arith.constant dense<0.000000e+00> : vector<2x16x16xf32>
    %73 = tpu.matmul %71, %72, %cst_22 {dimension_numbers = #tpu.dot_dimension_numbers<[2], [1], [1], [2], [0, 0, 0, 1, 1, 2], [0], [0]>} : vector<2x16x16xf32>, vector<2x16x16xf32>, vector<2x16x16xf32> -> vector<2x16x16xf32>
    "tpu.trace_stop"() : () -> ()
    %74 = tpu.concatenate %56, %73 in 2 : vector<2x16x16xf32>, vector<2x16x16xf32> -> vector<2x16x32xf32>
    %75 = vector.shape_cast %74 : vector<2x16x32xf32> to vector<32x32xf32>
    %c0_23 = arith.constant 0 : index
    %c0_24 = arith.constant 0 : index
    %c0_25 = arith.constant 0 : index
    %76 = vector.load %arg5[%c0_23, %c0_24, %c0_25] : memref<2x32x32xf32, #tpu.memory_space<vmem>>, vector<1x32x32xf32>
    %77 = vector.shape_cast %76 : vector<1x32x32xf32> to vector<32x32xf32>
    %cst_26 = arith.constant dense<0.000000e+00> : vector<32x32xf32>
    %78 = tpu.matmul %75, %77, %cst_26 {dimension_numbers = #tpu.dot_dimension_numbers<[1], [0], [0], [1], [0, 0, 1, 1], [], []>} : vector<32x32xf32>, vector<32x32xf32>, vector<32x32xf32> -> vector<32x32xf32>
    %c0_27 = arith.constant 0 : index
    %c0_28 = arith.constant 0 : index
    %c0_29 = arith.constant 0 : index
    %79 = vector.load %arg6[%c0_27, %c0_28, %c0_29] : memref<2x1x32xf32, #tpu.memory_space<vmem>>, vector<1x1x32xf32>
    %80 = vector.shape_cast %79 : vector<1x1x32xf32> to vector<1x32xf32>
    %81 = vector.broadcast %80 : vector<1x32xf32> to vector<32x32xf32>
    %82 = arith.addf %78, %81 : vector<32x32xf32>
    %83 = arith.addf %1, %82 : vector<32x32xf32>
    %c0_30 = arith.constant 0 : index
    %c0_31 = arith.constant 0 : index
    %c0_32 = arith.constant 0 : index
    %84 = vector.load %arg7[%c0_30, %c0_31, %c0_32] : memref<2x1x32xf32, #tpu.memory_space<vmem>>, vector<1x1x32xf32>
    %85 = vector.shape_cast %84 : vector<1x1x32xf32> to vector<1x32xf32>
    %c0_33 = arith.constant 0 : index
    %c0_34 = arith.constant 0 : index
    %c0_35 = arith.constant 0 : index
    %86 = vector.load %arg8[%c0_33, %c0_34, %c0_35] : memref<2x1x32xf32, #tpu.memory_space<vmem>>, vector<1x1x32xf32>
    %87 = vector.shape_cast %86 : vector<1x1x32xf32> to vector<1x32xf32>
    %cst_36 = arith.constant dense<0.000000e+00> : vector<32xf32>
    %88 = vector.multi_reduction <add>, %83, %cst_36 [1] : vector<32x32xf32> to vector<32xf32>
    %89 = vector.shape_cast %88 : vector<32xf32> to vector<32x1xf32>
    %cst_37 = arith.constant 3.200000e+01 : f32
    %90 = vector.broadcast %cst_37 : f32 to vector<32x1xf32>
    %91 = arith.divf %89, %90 : vector<32x1xf32>
    %92 = vector.broadcast %91 : vector<32x1xf32> to vector<32x32xf32>
    %93 = arith.subf %83, %92 : vector<32x32xf32>
    %94 = arith.mulf %93, %93 : vector<32x32xf32>
    %cst_38 = arith.constant dense<0.000000e+00> : vector<32xf32>
    %95 = vector.multi_reduction <add>, %94, %cst_38 [1] : vector<32x32xf32> to vector<32xf32>
    %96 = vector.shape_cast %95 : vector<32xf32> to vector<32x1xf32>
    %cst_39 = arith.constant 3.200000e+01 : f32
    %97 = vector.broadcast %cst_39 : f32 to vector<32x1xf32>
    %98 = arith.divf %96, %97 : vector<32x1xf32>
    %cst_40 = arith.constant 9.99999974E-6 : f32
    %99 = vector.broadcast %cst_40 : f32 to vector<32x1xf32>
    %100 = arith.addf %98, %99 : vector<32x1xf32>
    %101 = math.rsqrt %100 : vector<32x1xf32>
    %102 = vector.broadcast %101 : vector<32x1xf32> to vector<32x32xf32>
    %103 = arith.mulf %93, %102 : vector<32x32xf32>
    %104 = vector.broadcast %85 : vector<1x32xf32> to vector<32x32xf32>
    %105 = arith.mulf %103, %104 : vector<32x32xf32>
    %106 = vector.broadcast %87 : vector<1x32xf32> to vector<32x32xf32>
    %107 = arith.addf %105, %106 : vector<32x32xf32>
    %cst_41 = arith.constant 0.000000e+00 : f32
    %108 = vector.broadcast %cst_41 : f32 to vector<1x32xf32>
    %109 = vector.extract_strided_slice %107 {offsets = [0, 0], sizes = [31, 32], strides = [1, 1]} : vector<32x32xf32> to vector<31x32xf32>
    %110 = tpu.concatenate %108, %109 in 0 : vector<1x32xf32>, vector<31x32xf32> -> vector<32x32xf32>
    %111 = vector.broadcast %15 : vector<32x1xf32> to vector<32x32xf32>
    %112 = arith.mulf %110, %111 : vector<32x32xf32>
    %113 = vector.extract_strided_slice %107 {offsets = [1, 0], sizes = [31, 32], strides = [1, 1]} : vector<32x32xf32> to vector<31x32xf32>
    %cst_42 = arith.constant 0.000000e+00 : f32
    %114 = vector.broadcast %cst_42 : f32 to vector<1x32xf32>
    %115 = tpu.concatenate %113, %114 in 0 : vector<31x32xf32>, vector<1x32xf32> -> vector<32x32xf32>
    %116 = vector.broadcast %26 : vector<32x1xf32> to vector<32x32xf32>
    %117 = arith.mulf %115, %116 : vector<32x32xf32>
    %118 = tpu.concatenate %112, %107, %117 in 1 : vector<32x32xf32>, vector<32x32xf32>, vector<32x32xf32> -> vector<32x96xf32>
    %c0_43 = arith.constant 0 : index
    %c0_44 = arith.constant 0 : index
    %c0_45 = arith.constant 0 : index
    %119 = vector.load %arg11[%c0_43, %c0_44, %c0_45] : memref<2x96x64xf32, #tpu.memory_space<vmem>>, vector<1x96x64xf32>
    %120 = vector.shape_cast %119 : vector<1x96x64xf32> to vector<96x64xf32>
    %cst_46 = arith.constant dense<0.000000e+00> : vector<32x64xf32>
    %121 = tpu.matmul %118, %120, %cst_46 {dimension_numbers = #tpu.dot_dimension_numbers<[1], [0], [0], [1], [0, 0, 1, 1], [], []>} : vector<32x96xf32>, vector<96x64xf32>, vector<32x64xf32> -> vector<32x64xf32>
    %c0_47 = arith.constant 0 : index
    %c0_48 = arith.constant 0 : index
    %c0_49 = arith.constant 0 : index
    %122 = vector.load %arg12[%c0_47, %c0_48, %c0_49] : memref<2x1x64xf32, #tpu.memory_space<vmem>>, vector<1x1x64xf32>
    %123 = vector.shape_cast %122 : vector<1x1x64xf32> to vector<1x64xf32>
    %124 = vector.broadcast %123 : vector<1x64xf32> to vector<32x64xf32>
    %125 = arith.addf %121, %124 : vector<32x64xf32>
    %cst_50 = arith.constant 0.000000e+00 : f32
    %126 = vector.broadcast %cst_50 : f32 to vector<32x64xf32>
    %127 = arith.maximumf %125, %126 : vector<32x64xf32>
    %cst_51 = arith.constant 0.000000e+00 : f32
    %128 = vector.broadcast %cst_51 : f32 to vector<1x64xf32>
    %129 = vector.extract_strided_slice %127 {offsets = [0, 0], sizes = [31, 64], strides = [1, 1]} : vector<32x64xf32> to vector<31x64xf32>
    %130 = tpu.concatenate %128, %129 in 0 : vector<1x64xf32>, vector<31x64xf32> -> vector<32x64xf32>
    %131 = vector.broadcast %15 : vector<32x1xf32> to vector<32x64xf32>
    %132 = arith.mulf %130, %131 : vector<32x64xf32>
    %133 = vector.extract_strided_slice %127 {offsets = [1, 0], sizes = [31, 64], strides = [1, 1]} : vector<32x64xf32> to vector<31x64xf32>
    %cst_52 = arith.constant 0.000000e+00 : f32
    %134 = vector.broadcast %cst_52 : f32 to vector<1x64xf32>
    %135 = tpu.concatenate %133, %134 in 0 : vector<31x64xf32>, vector<1x64xf32> -> vector<32x64xf32>
    %136 = vector.broadcast %26 : vector<32x1xf32> to vector<32x64xf32>
    %137 = arith.mulf %135, %136 : vector<32x64xf32>
    %138 = tpu.concatenate %132, %127, %137 in 1 : vector<32x64xf32>, vector<32x64xf32>, vector<32x64xf32> -> vector<32x192xf32>
    %c0_53 = arith.constant 0 : index
    %c0_54 = arith.constant 0 : index
    %c0_55 = arith.constant 0 : index
    %139 = vector.load %arg13[%c0_53, %c0_54, %c0_55] : memref<2x192x32xf32, #tpu.memory_space<vmem>>, vector<1x192x32xf32>
    %140 = vector.shape_cast %139 : vector<1x192x32xf32> to vector<192x32xf32>
    %cst_56 = arith.constant dense<0.000000e+00> : vector<32x32xf32>
    %141 = tpu.matmul %138, %140, %cst_56 {dimension_numbers = #tpu.dot_dimension_numbers<[1], [0], [0], [1], [0, 0, 1, 1], [], []>} : vector<32x192xf32>, vector<192x32xf32>, vector<32x32xf32> -> vector<32x32xf32>
    %c0_57 = arith.constant 0 : index
    %c0_58 = arith.constant 0 : index
    %c0_59 = arith.constant 0 : index
    %142 = vector.load %arg14[%c0_57, %c0_58, %c0_59] : memref<2x1x32xf32, #tpu.memory_space<vmem>>, vector<1x1x32xf32>
    %143 = vector.shape_cast %142 : vector<1x1x32xf32> to vector<1x32xf32>
    %144 = vector.broadcast %143 : vector<1x32xf32> to vector<32x32xf32>
    %145 = arith.addf %141, %144 : vector<32x32xf32>
    %146 = arith.addf %107, %145 : vector<32x32xf32>
    %c0_60 = arith.constant 0 : index
    %c0_61 = arith.constant 0 : index
    %c0_62 = arith.constant 0 : index
    %147 = vector.load %arg9[%c0_60, %c0_61, %c0_62] : memref<2x1x32xf32, #tpu.memory_space<vmem>>, vector<1x1x32xf32>
    %148 = vector.shape_cast %147 : vector<1x1x32xf32> to vector<1x32xf32>
    %c0_63 = arith.constant 0 : index
    %c0_64 = arith.constant 0 : index
    %c0_65 = arith.constant 0 : index
    %149 = vector.load %arg10[%c0_63, %c0_64, %c0_65] : memref<2x1x32xf32, #tpu.memory_space<vmem>>, vector<1x1x32xf32>
    %150 = vector.shape_cast %149 : vector<1x1x32xf32> to vector<1x32xf32>
    %cst_66 = arith.constant dense<0.000000e+00> : vector<32xf32>
    %151 = vector.multi_reduction <add>, %146, %cst_66 [1] : vector<32x32xf32> to vector<32xf32>
    %152 = vector.shape_cast %151 : vector<32xf32> to vector<32x1xf32>
    %cst_67 = arith.constant 3.200000e+01 : f32
    %153 = vector.broadcast %cst_67 : f32 to vector<32x1xf32>
    %154 = arith.divf %152, %153 : vector<32x1xf32>
    %155 = vector.broadcast %154 : vector<32x1xf32> to vector<32x32xf32>
    %156 = arith.subf %146, %155 : vector<32x32xf32>
    %157 = arith.mulf %156, %156 : vector<32x32xf32>
    %cst_68 = arith.constant dense<0.000000e+00> : vector<32xf32>
    %158 = vector.multi_reduction <add>, %157, %cst_68 [1] : vector<32x32xf32> to vector<32xf32>
    %159 = vector.shape_cast %158 : vector<32xf32> to vector<32x1xf32>
    %cst_69 = arith.constant 3.200000e+01 : f32
    %160 = vector.broadcast %cst_69 : f32 to vector<32x1xf32>
    %161 = arith.divf %159, %160 : vector<32x1xf32>
    %cst_70 = arith.constant 9.99999974E-6 : f32
    %162 = vector.broadcast %cst_70 : f32 to vector<32x1xf32>
    %163 = arith.addf %161, %162 : vector<32x1xf32>
    %164 = math.rsqrt %163 : vector<32x1xf32>
    %165 = vector.broadcast %164 : vector<32x1xf32> to vector<32x32xf32>
    %166 = arith.mulf %156, %165 : vector<32x32xf32>
    %167 = vector.broadcast %148 : vector<1x32xf32> to vector<32x32xf32>
    %168 = arith.mulf %166, %167 : vector<32x32xf32>
    %169 = vector.broadcast %150 : vector<1x32xf32> to vector<32x32xf32>
    %170 = arith.addf %168, %169 : vector<32x32xf32>
    %c1 = arith.constant 1 : index
    %c0_71 = arith.constant 0 : index
    %c0_72 = arith.constant 0 : index
    %171 = vector.load %arg3[%c1, %c0_71, %c0_72] : memref<2x32x96xf32, #tpu.memory_space<vmem>>, vector<1x32x96xf32>
    %172 = vector.shape_cast %171 : vector<1x32x96xf32> to vector<32x96xf32>
    %cst_73 = arith.constant dense<0.000000e+00> : vector<32x96xf32>
    %173 = tpu.matmul %170, %172, %cst_73 {dimension_numbers = #tpu.dot_dimension_numbers<[1], [0], [0], [1], [0, 0, 1, 1], [], []>} : vector<32x32xf32>, vector<32x96xf32>, vector<32x96xf32> -> vector<32x96xf32>
    %c1_74 = arith.constant 1 : index
    %c0_75 = arith.constant 0 : index
    %c0_76 = arith.constant 0 : index
    %174 = vector.load %arg4[%c1_74, %c0_75, %c0_76] : memref<2x1x96xf32, #tpu.memory_space<vmem>>, vector<1x1x96xf32>
    %175 = vector.shape_cast %174 : vector<1x1x96xf32> to vector<1x96xf32>
    %176 = vector.broadcast %175 : vector<1x96xf32> to vector<32x96xf32>
    %177 = arith.addf %173, %176 : vector<32x96xf32>
    %178 = vector.extract_strided_slice %177 {offsets = [0, 0], sizes = [32, 32], strides = [1, 1]} : vector<32x96xf32> to vector<32x32xf32>
    %179 = vector.shape_cast %178 : vector<32x32xf32> to vector<2x16x32xf32>
    %180 = vector.extract_strided_slice %177 {offsets = [0, 32], sizes = [32, 32], strides = [1, 1]} : vector<32x96xf32> to vector<32x32xf32>
    %181 = vector.shape_cast %180 : vector<32x32xf32> to vector<2x16x32xf32>
    %182 = vector.extract_strided_slice %177 {offsets = [0, 64], sizes = [32, 32], strides = [1, 1]} : vector<32x96xf32> to vector<32x32xf32>
    %183 = vector.shape_cast %182 : vector<32x32xf32> to vector<2x16x32xf32>
    %184 = vector.extract_strided_slice %179 {offsets = [0, 0, 0], sizes = [2, 16, 16], strides = [1, 1, 1]} : vector<2x16x32xf32> to vector<2x16x16xf32>
    %cst_77 = arith.constant 2.500000e-01 : f32
    %185 = vector.broadcast %cst_77 : f32 to vector<2x16x16xf32>
    %186 = arith.mulf %184, %185 : vector<2x16x16xf32>
    %187 = vector.extract_strided_slice %181 {offsets = [0, 0, 0], sizes = [2, 16, 16], strides = [1, 1, 1]} : vector<2x16x32xf32> to vector<2x16x16xf32>
    "tpu.trace_start"() <{level = 10 : i32, message = "bqd,bkd->bqk"}> : () -> ()
    %cst_78 = arith.constant dense<0.000000e+00> : vector<2x16x16xf32>
    %188 = tpu.matmul %186, %187, %cst_78 {dimension_numbers = #tpu.dot_dimension_numbers<[2], [2], [1], [1], [0, 0, 0, 1, 1, 1], [0], [0]>} : vector<2x16x16xf32>, vector<2x16x16xf32>, vector<2x16x16xf32> -> vector<2x16x16xf32>
    "tpu.trace_stop"() : () -> ()
    %cst_79 = arith.constant dense<0xFF800000> : vector<2x16xf32>
    %189 = vector.multi_reduction <maximumf>, %188, %cst_79 [2] : vector<2x16x16xf32> to vector<2x16xf32>
    %190 = vector.shape_cast %189 : vector<2x16xf32> to vector<2x16x1xf32>
    %191 = vector.broadcast %190 : vector<2x16x1xf32> to vector<2x16x16xf32>
    %192 = arith.subf %188, %191 : vector<2x16x16xf32>
    %193 = math.exp %192 : vector<2x16x16xf32>
    %cst_80 = arith.constant dense<0.000000e+00> : vector<2x16xf32>
    %194 = vector.multi_reduction <add>, %193, %cst_80 [2] : vector<2x16x16xf32> to vector<2x16xf32>
    %195 = vector.shape_cast %194 : vector<2x16xf32> to vector<2x16x1xf32>
    %196 = tpu.reciprocal %195 {approx = true} : vector<2x16x1xf32> -> vector<2x16x1xf32>
    %197 = vector.broadcast %196 : vector<2x16x1xf32> to vector<2x16x16xf32>
    %198 = arith.mulf %193, %197 : vector<2x16x16xf32>
    %199 = vector.extract_strided_slice %183 {offsets = [0, 0, 0], sizes = [2, 16, 16], strides = [1, 1, 1]} : vector<2x16x32xf32> to vector<2x16x16xf32>
    "tpu.trace_start"() <{level = 10 : i32, message = "bqk,bkd->bqd"}> : () -> ()
    %cst_81 = arith.constant dense<0.000000e+00> : vector<2x16x16xf32>
    %200 = tpu.matmul %198, %199, %cst_81 {dimension_numbers = #tpu.dot_dimension_numbers<[2], [1], [1], [2], [0, 0, 0, 1, 1, 2], [0], [0]>} : vector<2x16x16xf32>, vector<2x16x16xf32>, vector<2x16x16xf32> -> vector<2x16x16xf32>
    "tpu.trace_stop"() : () -> ()
    %201 = vector.extract_strided_slice %179 {offsets = [0, 0, 16], sizes = [2, 16, 16], strides = [1, 1, 1]} : vector<2x16x32xf32> to vector<2x16x16xf32>
    %cst_82 = arith.constant 2.500000e-01 : f32
    %202 = vector.broadcast %cst_82 : f32 to vector<2x16x16xf32>
    %203 = arith.mulf %201, %202 : vector<2x16x16xf32>
    %204 = vector.extract_strided_slice %181 {offsets = [0, 0, 16], sizes = [2, 16, 16], strides = [1, 1, 1]} : vector<2x16x32xf32> to vector<2x16x16xf32>
    "tpu.trace_start"() <{level = 10 : i32, message = "bqd,bkd->bqk"}> : () -> ()
    %cst_83 = arith.constant dense<0.000000e+00> : vector<2x16x16xf32>
    %205 = tpu.matmul %203, %204, %cst_83 {dimension_numbers = #tpu.dot_dimension_numbers<[2], [2], [1], [1], [0, 0, 0, 1, 1, 1], [0], [0]>} : vector<2x16x16xf32>, vector<2x16x16xf32>, vector<2x16x16xf32> -> vector<2x16x16xf32>
    "tpu.trace_stop"() : () -> ()
    %cst_84 = arith.constant dense<0xFF800000> : vector<2x16xf32>
    %206 = vector.multi_reduction <maximumf>, %205, %cst_84 [2] : vector<2x16x16xf32> to vector<2x16xf32>
    %207 = vector.shape_cast %206 : vector<2x16xf32> to vector<2x16x1xf32>
    %208 = vector.broadcast %207 : vector<2x16x1xf32> to vector<2x16x16xf32>
    %209 = arith.subf %205, %208 : vector<2x16x16xf32>
    %210 = math.exp %209 : vector<2x16x16xf32>
    %cst_85 = arith.constant dense<0.000000e+00> : vector<2x16xf32>
    %211 = vector.multi_reduction <add>, %210, %cst_85 [2] : vector<2x16x16xf32> to vector<2x16xf32>
    %212 = vector.shape_cast %211 : vector<2x16xf32> to vector<2x16x1xf32>
    %213 = tpu.reciprocal %212 {approx = true} : vector<2x16x1xf32> -> vector<2x16x1xf32>
    %214 = vector.broadcast %213 : vector<2x16x1xf32> to vector<2x16x16xf32>
    %215 = arith.mulf %210, %214 : vector<2x16x16xf32>
    %216 = vector.extract_strided_slice %183 {offsets = [0, 0, 16], sizes = [2, 16, 16], strides = [1, 1, 1]} : vector<2x16x32xf32> to vector<2x16x16xf32>
    "tpu.trace_start"() <{level = 10 : i32, message = "bqk,bkd->bqd"}> : () -> ()
    %cst_86 = arith.constant dense<0.000000e+00> : vector<2x16x16xf32>
    %217 = tpu.matmul %215, %216, %cst_86 {dimension_numbers = #tpu.dot_dimension_numbers<[2], [1], [1], [2], [0, 0, 0, 1, 1, 2], [0], [0]>} : vector<2x16x16xf32>, vector<2x16x16xf32>, vector<2x16x16xf32> -> vector<2x16x16xf32>
    "tpu.trace_stop"() : () -> ()
    %218 = tpu.concatenate %200, %217 in 2 : vector<2x16x16xf32>, vector<2x16x16xf32> -> vector<2x16x32xf32>
    %219 = vector.shape_cast %218 : vector<2x16x32xf32> to vector<32x32xf32>
    %c1_87 = arith.constant 1 : index
    %c0_88 = arith.constant 0 : index
    %c0_89 = arith.constant 0 : index
    %220 = vector.load %arg5[%c1_87, %c0_88, %c0_89] : memref<2x32x32xf32, #tpu.memory_space<vmem>>, vector<1x32x32xf32>
    %221 = vector.shape_cast %220 : vector<1x32x32xf32> to vector<32x32xf32>
    %cst_90 = arith.constant dense<0.000000e+00> : vector<32x32xf32>
    %222 = tpu.matmul %219, %221, %cst_90 {dimension_numbers = #tpu.dot_dimension_numbers<[1], [0], [0], [1], [0, 0, 1, 1], [], []>} : vector<32x32xf32>, vector<32x32xf32>, vector<32x32xf32> -> vector<32x32xf32>
    %c1_91 = arith.constant 1 : index
    %c0_92 = arith.constant 0 : index
    %c0_93 = arith.constant 0 : index
    %223 = vector.load %arg6[%c1_91, %c0_92, %c0_93] : memref<2x1x32xf32, #tpu.memory_space<vmem>>, vector<1x1x32xf32>
    %224 = vector.shape_cast %223 : vector<1x1x32xf32> to vector<1x32xf32>
    %225 = vector.broadcast %224 : vector<1x32xf32> to vector<32x32xf32>
    %226 = arith.addf %222, %225 : vector<32x32xf32>
    %227 = arith.addf %170, %226 : vector<32x32xf32>
    %c1_94 = arith.constant 1 : index
    %c0_95 = arith.constant 0 : index
    %c0_96 = arith.constant 0 : index
    %228 = vector.load %arg7[%c1_94, %c0_95, %c0_96] : memref<2x1x32xf32, #tpu.memory_space<vmem>>, vector<1x1x32xf32>
    %229 = vector.shape_cast %228 : vector<1x1x32xf32> to vector<1x32xf32>
    %c1_97 = arith.constant 1 : index
    %c0_98 = arith.constant 0 : index
    %c0_99 = arith.constant 0 : index
    %230 = vector.load %arg8[%c1_97, %c0_98, %c0_99] : memref<2x1x32xf32, #tpu.memory_space<vmem>>, vector<1x1x32xf32>
    %231 = vector.shape_cast %230 : vector<1x1x32xf32> to vector<1x32xf32>
    %cst_100 = arith.constant dense<0.000000e+00> : vector<32xf32>
    %232 = vector.multi_reduction <add>, %227, %cst_100 [1] : vector<32x32xf32> to vector<32xf32>
    %233 = vector.shape_cast %232 : vector<32xf32> to vector<32x1xf32>
    %cst_101 = arith.constant 3.200000e+01 : f32
    %234 = vector.broadcast %cst_101 : f32 to vector<32x1xf32>
    %235 = arith.divf %233, %234 : vector<32x1xf32>
    %236 = vector.broadcast %235 : vector<32x1xf32> to vector<32x32xf32>
    %237 = arith.subf %227, %236 : vector<32x32xf32>
    %238 = arith.mulf %237, %237 : vector<32x32xf32>
    %cst_102 = arith.constant dense<0.000000e+00> : vector<32xf32>
    %239 = vector.multi_reduction <add>, %238, %cst_102 [1] : vector<32x32xf32> to vector<32xf32>
    %240 = vector.shape_cast %239 : vector<32xf32> to vector<32x1xf32>
    %cst_103 = arith.constant 3.200000e+01 : f32
    %241 = vector.broadcast %cst_103 : f32 to vector<32x1xf32>
    %242 = arith.divf %240, %241 : vector<32x1xf32>
    %cst_104 = arith.constant 9.99999974E-6 : f32
    %243 = vector.broadcast %cst_104 : f32 to vector<32x1xf32>
    %244 = arith.addf %242, %243 : vector<32x1xf32>
    %245 = math.rsqrt %244 : vector<32x1xf32>
    %246 = vector.broadcast %245 : vector<32x1xf32> to vector<32x32xf32>
    %247 = arith.mulf %237, %246 : vector<32x32xf32>
    %248 = vector.broadcast %229 : vector<1x32xf32> to vector<32x32xf32>
    %249 = arith.mulf %247, %248 : vector<32x32xf32>
    %250 = vector.broadcast %231 : vector<1x32xf32> to vector<32x32xf32>
    %251 = arith.addf %249, %250 : vector<32x32xf32>
    %cst_105 = arith.constant 0.000000e+00 : f32
    %252 = vector.broadcast %cst_105 : f32 to vector<1x32xf32>
    %253 = vector.extract_strided_slice %251 {offsets = [0, 0], sizes = [31, 32], strides = [1, 1]} : vector<32x32xf32> to vector<31x32xf32>
    %254 = tpu.concatenate %252, %253 in 0 : vector<1x32xf32>, vector<31x32xf32> -> vector<32x32xf32>
    %255 = vector.broadcast %15 : vector<32x1xf32> to vector<32x32xf32>
    %256 = arith.mulf %254, %255 : vector<32x32xf32>
    %257 = vector.extract_strided_slice %251 {offsets = [1, 0], sizes = [31, 32], strides = [1, 1]} : vector<32x32xf32> to vector<31x32xf32>
    %cst_106 = arith.constant 0.000000e+00 : f32
    %258 = vector.broadcast %cst_106 : f32 to vector<1x32xf32>
    %259 = tpu.concatenate %257, %258 in 0 : vector<31x32xf32>, vector<1x32xf32> -> vector<32x32xf32>
    %260 = vector.broadcast %26 : vector<32x1xf32> to vector<32x32xf32>
    %261 = arith.mulf %259, %260 : vector<32x32xf32>
    %262 = tpu.concatenate %256, %251, %261 in 1 : vector<32x32xf32>, vector<32x32xf32>, vector<32x32xf32> -> vector<32x96xf32>
    %c1_107 = arith.constant 1 : index
    %c0_108 = arith.constant 0 : index
    %c0_109 = arith.constant 0 : index
    %263 = vector.load %arg11[%c1_107, %c0_108, %c0_109] : memref<2x96x64xf32, #tpu.memory_space<vmem>>, vector<1x96x64xf32>
    %264 = vector.shape_cast %263 : vector<1x96x64xf32> to vector<96x64xf32>
    %cst_110 = arith.constant dense<0.000000e+00> : vector<32x64xf32>
    %265 = tpu.matmul %262, %264, %cst_110 {dimension_numbers = #tpu.dot_dimension_numbers<[1], [0], [0], [1], [0, 0, 1, 1], [], []>} : vector<32x96xf32>, vector<96x64xf32>, vector<32x64xf32> -> vector<32x64xf32>
    %c1_111 = arith.constant 1 : index
    %c0_112 = arith.constant 0 : index
    %c0_113 = arith.constant 0 : index
    %266 = vector.load %arg12[%c1_111, %c0_112, %c0_113] : memref<2x1x64xf32, #tpu.memory_space<vmem>>, vector<1x1x64xf32>
    %267 = vector.shape_cast %266 : vector<1x1x64xf32> to vector<1x64xf32>
    %268 = vector.broadcast %267 : vector<1x64xf32> to vector<32x64xf32>
    %269 = arith.addf %265, %268 : vector<32x64xf32>
    %cst_114 = arith.constant 0.000000e+00 : f32
    %270 = vector.broadcast %cst_114 : f32 to vector<32x64xf32>
    %271 = arith.maximumf %269, %270 : vector<32x64xf32>
    %cst_115 = arith.constant 0.000000e+00 : f32
    %272 = vector.broadcast %cst_115 : f32 to vector<1x64xf32>
    %273 = vector.extract_strided_slice %271 {offsets = [0, 0], sizes = [31, 64], strides = [1, 1]} : vector<32x64xf32> to vector<31x64xf32>
    %274 = tpu.concatenate %272, %273 in 0 : vector<1x64xf32>, vector<31x64xf32> -> vector<32x64xf32>
    %275 = vector.broadcast %15 : vector<32x1xf32> to vector<32x64xf32>
    %276 = arith.mulf %274, %275 : vector<32x64xf32>
    %277 = vector.extract_strided_slice %271 {offsets = [1, 0], sizes = [31, 64], strides = [1, 1]} : vector<32x64xf32> to vector<31x64xf32>
    %cst_116 = arith.constant 0.000000e+00 : f32
    %278 = vector.broadcast %cst_116 : f32 to vector<1x64xf32>
    %279 = tpu.concatenate %277, %278 in 0 : vector<31x64xf32>, vector<1x64xf32> -> vector<32x64xf32>
    %280 = vector.broadcast %26 : vector<32x1xf32> to vector<32x64xf32>
    %281 = arith.mulf %279, %280 : vector<32x64xf32>
    %282 = tpu.concatenate %276, %271, %281 in 1 : vector<32x64xf32>, vector<32x64xf32>, vector<32x64xf32> -> vector<32x192xf32>
    %c1_117 = arith.constant 1 : index
    %c0_118 = arith.constant 0 : index
    %c0_119 = arith.constant 0 : index
    %283 = vector.load %arg13[%c1_117, %c0_118, %c0_119] : memref<2x192x32xf32, #tpu.memory_space<vmem>>, vector<1x192x32xf32>
    %284 = vector.shape_cast %283 : vector<1x192x32xf32> to vector<192x32xf32>
    %cst_120 = arith.constant dense<0.000000e+00> : vector<32x32xf32>
    %285 = tpu.matmul %282, %284, %cst_120 {dimension_numbers = #tpu.dot_dimension_numbers<[1], [0], [0], [1], [0, 0, 1, 1], [], []>} : vector<32x192xf32>, vector<192x32xf32>, vector<32x32xf32> -> vector<32x32xf32>
    %c1_121 = arith.constant 1 : index
    %c0_122 = arith.constant 0 : index
    %c0_123 = arith.constant 0 : index
    %286 = vector.load %arg14[%c1_121, %c0_122, %c0_123] : memref<2x1x32xf32, #tpu.memory_space<vmem>>, vector<1x1x32xf32>
    %287 = vector.shape_cast %286 : vector<1x1x32xf32> to vector<1x32xf32>
    %288 = vector.broadcast %287 : vector<1x32xf32> to vector<32x32xf32>
    %289 = arith.addf %285, %288 : vector<32x32xf32>
    %290 = arith.addf %251, %289 : vector<32x32xf32>
    %c1_124 = arith.constant 1 : index
    %c0_125 = arith.constant 0 : index
    %c0_126 = arith.constant 0 : index
    %291 = vector.load %arg9[%c1_124, %c0_125, %c0_126] : memref<2x1x32xf32, #tpu.memory_space<vmem>>, vector<1x1x32xf32>
    %292 = vector.shape_cast %291 : vector<1x1x32xf32> to vector<1x32xf32>
    %c1_127 = arith.constant 1 : index
    %c0_128 = arith.constant 0 : index
    %c0_129 = arith.constant 0 : index
    %293 = vector.load %arg10[%c1_127, %c0_128, %c0_129] : memref<2x1x32xf32, #tpu.memory_space<vmem>>, vector<1x1x32xf32>
    %294 = vector.shape_cast %293 : vector<1x1x32xf32> to vector<1x32xf32>
    %cst_130 = arith.constant dense<0.000000e+00> : vector<32xf32>
    %295 = vector.multi_reduction <add>, %290, %cst_130 [1] : vector<32x32xf32> to vector<32xf32>
    %296 = vector.shape_cast %295 : vector<32xf32> to vector<32x1xf32>
    %cst_131 = arith.constant 3.200000e+01 : f32
    %297 = vector.broadcast %cst_131 : f32 to vector<32x1xf32>
    %298 = arith.divf %296, %297 : vector<32x1xf32>
    %299 = vector.broadcast %298 : vector<32x1xf32> to vector<32x32xf32>
    %300 = arith.subf %290, %299 : vector<32x32xf32>
    %301 = arith.mulf %300, %300 : vector<32x32xf32>
    %cst_132 = arith.constant dense<0.000000e+00> : vector<32xf32>
    %302 = vector.multi_reduction <add>, %301, %cst_132 [1] : vector<32x32xf32> to vector<32xf32>
    %303 = vector.shape_cast %302 : vector<32xf32> to vector<32x1xf32>
    %cst_133 = arith.constant 3.200000e+01 : f32
    %304 = vector.broadcast %cst_133 : f32 to vector<32x1xf32>
    %305 = arith.divf %303, %304 : vector<32x1xf32>
    %cst_134 = arith.constant 9.99999974E-6 : f32
    %306 = vector.broadcast %cst_134 : f32 to vector<32x1xf32>
    %307 = arith.addf %305, %306 : vector<32x1xf32>
    %308 = math.rsqrt %307 : vector<32x1xf32>
    %309 = vector.broadcast %308 : vector<32x1xf32> to vector<32x32xf32>
    %310 = arith.mulf %300, %309 : vector<32x32xf32>
    %311 = vector.broadcast %292 : vector<1x32xf32> to vector<32x32xf32>
    %312 = arith.mulf %310, %311 : vector<32x32xf32>
    %313 = vector.broadcast %294 : vector<1x32xf32> to vector<32x32xf32>
    %314 = arith.addf %312, %313 : vector<32x32xf32>
    %315 = vector.shape_cast %314 : vector<32x32xf32> to vector<2x16x32xf32>
    %c0_135 = arith.constant 0 : index
    %c0_136 = arith.constant 0 : index
    %316 = vector.load %arg15[%c0_135, %c0_136] : memref<1x32xf32, #tpu.memory_space<vmem>>, vector<1x32xf32>
    %317 = vector.shape_cast %316 : vector<1x32xf32> to vector<1x1x32xf32>
    %318 = vector.broadcast %317 : vector<1x1x32xf32> to vector<2x16x32xf32>
    %319 = arith.mulf %315, %318 : vector<2x16x32xf32>
    %cst_137 = arith.constant dense<0.000000e+00> : vector<2x16xf32>
    %320 = vector.multi_reduction <add>, %319, %cst_137 [2] : vector<2x16x32xf32> to vector<2x16xf32>
    %c0_138 = arith.constant 0 : index
    %c0_139 = arith.constant 0 : index
    %321 = vector.load %arg16[%c0_138, %c0_139] : memref<1x1xf32, #tpu.memory_space<vmem>>, vector<1x1xf32>
    %322 = vector.broadcast %321 : vector<1x1xf32> to vector<2x16xf32>
    %323 = arith.addf %320, %322 : vector<2x16xf32>
    %c0_140 = arith.constant 0 : index
    %c0_141 = arith.constant 0 : index
    %324 = vector.load %arg2[%c0_140, %c0_141] : memref<2x16xf32, #tpu.memory_space<vmem>>, vector<2x16xf32>
    %cst_142 = arith.constant 5.000000e-01 : f32
    %325 = vector.broadcast %cst_142 : f32 to vector<2x16xf32>
    %326 = arith.cmpf ogt, %324, %325 : vector<2x16xf32>
    %cst_143 = arith.constant 0.000000e+00 : f32
    %327 = vector.broadcast %cst_143 : f32 to vector<2x16xf32>
    %328 = arith.select %326, %327, %323 : vector<2x16xi1>, vector<2x16xf32>
    %c0_144 = arith.constant 0 : index
    %c0_145 = arith.constant 0 : index
    %329 = vector.load %arg17[%c0_144, %c0_145] : memref<2x16xf32, #tpu.memory_space<vmem>>, vector<2x16xf32>
    tpu.vector_store %arg17[%c0_144, %c0_145], %328 {strides = array<i32>} : memref<2x16xf32, #tpu.memory_space<vmem>>, vector<2x16xf32>,
    return
  }
  func.func @transform_0(%arg0: i32) -> (i32, i32, i32) {
    %c0_i32 = arith.constant 0 : i32
    %c0_i32_0 = arith.constant 0 : i32
    %c0_i32_1 = arith.constant 0 : i32
    return %arg0, %c0_i32, %c0_i32_0 : i32, i32, i32
  }
  func.func @transform_1(%arg0: i32) -> (i32, i32) {
    %c0_i32 = arith.constant 0 : i32
    %c0_i32_0 = arith.constant 0 : i32
    return %arg0, %c0_i32 : i32, i32
  }
  func.func @transform_2(%arg0: i32) -> (i32, i32, i32) {
    %c0_i32 = arith.constant 0 : i32
    %c0_i32_0 = arith.constant 0 : i32
    %c0_i32_1 = arith.constant 0 : i32
    %c0_i32_2 = arith.constant 0 : i32
    return %c0_i32, %c0_i32_0, %c0_i32_1 : i32, i32, i32
  }
  func.func @transform_3(%arg0: i32) -> (i32, i32, i32) {
    %c0_i32 = arith.constant 0 : i32
    %c0_i32_0 = arith.constant 0 : i32
    %c0_i32_1 = arith.constant 0 : i32
    %c0_i32_2 = arith.constant 0 : i32
    return %c0_i32, %c0_i32_0, %c0_i32_1 : i32, i32, i32
  }
  func.func @transform_4(%arg0: i32) -> (i32, i32, i32) {
    %c0_i32 = arith.constant 0 : i32
    %c0_i32_0 = arith.constant 0 : i32
    %c0_i32_1 = arith.constant 0 : i32
    %c0_i32_2 = arith.constant 0 : i32
    return %c0_i32, %c0_i32_0, %c0_i32_1 : i32, i32, i32
  }
  func.func @transform_5(%arg0: i32) -> (i32, i32, i32) {
    %c0_i32 = arith.constant 0 : i32
    %c0_i32_0 = arith.constant 0 : i32
    %c0_i32_1 = arith.constant 0 : i32
    %c0_i32_2 = arith.constant 0 : i32
    return %c0_i32, %c0_i32_0, %c0_i32_1 : i32, i32, i32
  }
  func.func @transform_6(%arg0: i32) -> (i32, i32, i32) {
    %c0_i32 = arith.constant 0 : i32
    %c0_i32_0 = arith.constant 0 : i32
    %c0_i32_1 = arith.constant 0 : i32
    %c0_i32_2 = arith.constant 0 : i32
    return %c0_i32, %c0_i32_0, %c0_i32_1 : i32, i32, i32
  }
  func.func @transform_7(%arg0: i32) -> (i32, i32, i32) {
    %c0_i32 = arith.constant 0 : i32
    %c0_i32_0 = arith.constant 0 : i32
    %c0_i32_1 = arith.constant 0 : i32
    %c0_i32_2 = arith.constant 0 : i32
    return %c0_i32, %c0_i32_0, %c0_i32_1 : i32, i32, i32
  }
  func.func @transform_8(%arg0: i32) -> (i32, i32, i32) {
    %c0_i32 = arith.constant 0 : i32
    %c0_i32_0 = arith.constant 0 : i32
    %c0_i32_1 = arith.constant 0 : i32
    %c0_i32_2 = arith.constant 0 : i32
    return %c0_i32, %c0_i32_0, %c0_i32_1 : i32, i32, i32
  }
  func.func @transform_9(%arg0: i32) -> (i32, i32, i32) {
    %c0_i32 = arith.constant 0 : i32
    %c0_i32_0 = arith.constant 0 : i32
    %c0_i32_1 = arith.constant 0 : i32
    %c0_i32_2 = arith.constant 0 : i32
    return %c0_i32, %c0_i32_0, %c0_i32_1 : i32, i32, i32
  }
  func.func @transform_10(%arg0: i32) -> (i32, i32, i32) {
    %c0_i32 = arith.constant 0 : i32
    %c0_i32_0 = arith.constant 0 : i32
    %c0_i32_1 = arith.constant 0 : i32
    %c0_i32_2 = arith.constant 0 : i32
    return %c0_i32, %c0_i32_0, %c0_i32_1 : i32, i32, i32
  }
  func.func @transform_11(%arg0: i32) -> (i32, i32, i32) {
    %c0_i32 = arith.constant 0 : i32
    %c0_i32_0 = arith.constant 0 : i32
    %c0_i32_1 = arith.constant 0 : i32
    %c0_i32_2 = arith.constant 0 : i32
    return %c0_i32, %c0_i32_0, %c0_i32_1 : i32, i32, i32
  }
  func.func @transform_12(%arg0: i32) -> (i32, i32, i32) {
    %c0_i32 = arith.constant 0 : i32
    %c0_i32_0 = arith.constant 0 : i32
    %c0_i32_1 = arith.constant 0 : i32
    %c0_i32_2 = arith.constant 0 : i32
    return %c0_i32, %c0_i32_0, %c0_i32_1 : i32, i32, i32
  }
  func.func @transform_13(%arg0: i32) -> (i32, i32, i32) {
    %c0_i32 = arith.constant 0 : i32
    %c0_i32_0 = arith.constant 0 : i32
    %c0_i32_1 = arith.constant 0 : i32
    %c0_i32_2 = arith.constant 0 : i32
    return %c0_i32, %c0_i32_0, %c0_i32_1 : i32, i32, i32
  }
  func.func @transform_14(%arg0: i32) -> (i32, i32) {
    %c0_i32 = arith.constant 0 : i32
    %c0_i32_0 = arith.constant 0 : i32
    %c0_i32_1 = arith.constant 0 : i32
    return %c0_i32, %c0_i32_0 : i32, i32
  }
  func.func @transform_15(%arg0: i32) -> (i32, i32) {
    %c0_i32 = arith.constant 0 : i32
    %c0_i32_0 = arith.constant 0 : i32
    %c0_i32_1 = arith.constant 0 : i32
    return %c0_i32, %c0_i32_0 : i32, i32
  }
  func.func @transform_16(%arg0: i32) -> (i32, i32) {
    %c0_i32 = arith.constant 0 : i32
    %c0_i32_0 = arith.constant 0 : i32
    return %arg0, %c0_i32 : i32, i32
  }
}

</mosaic_0001>

<bundles_post_ra>
// kernel: tpu_custom_call.1
= control target key start
LH: loop header
LB: loop body
LE: loop exit
PB: predicated region body
PF: predicated region fallthrough
CT: control target
= control target key end

     0   :  { %s3554_s0 = inlined_call_operand.vmem [shape: f32[2,16,32], index: 0, kind: input, shape index: {}]   ;;  %s3555_s1 = inlined_call_operand.vmem [shape: f32[2,16], index: 1, kind: input, shape index: {}]   ;;  %s3556_s2 = inlined_call_operand.vmem [shape: f32[2,32,96], index: 2, kind: input, shape index: {}]   ;;  %s3557_s3 = inlined_call_operand.vmem [shape: f32[2,1,96], index: 3, kind: input, shape index: {}]   ;;  %s3558_s4 = inlined_call_operand.vmem [shape: f32[2,32,32], index: 4, kind: input, shape index: {}]   ;;  %s3559_s5 = inlined_call_operand.vmem [shape: f32[2,1,32], index: 5, kind: input, shape index: {}]   ;;  %s3560_s6 = inlined_call_operand.vmem [shape: f32[2,1,32], index: 6, kind: input, shape index: {}]   ;;  %s3561_s7 = inlined_call_operand.vmem [shape: f32[2,1,32], index: 7, kind: input, shape index: {}]   ;;  %s3562_s8 = inlined_call_operand.vmem [shape: f32[2,1,32], index: 8, kind: input, shape index: {}]   ;;  %s3563_s9 = inlined_call_operand.vmem [shape: f32[2,1,32], index: 9, kind: input, shape index: {}]   ;;  %s3564_s10 = inlined_call_operand.vmem [shape: f32[2,96,64], index: 10, kind: input, shape index: {}]   ;;  %s3565_s11 = inlined_call_operand.vmem [shape: f32[2,1,64], index: 11, kind: input, shape index: {}]   ;;  %s3566_s12 = inlined_call_operand.vmem [shape: f32[2,192,32], index: 12, kind: input, shape index: {}]   ;;  %s3567_s13 = inlined_call_operand.vmem [shape: f32[2,1,32], index: 13, kind: input, shape index: {}]   ;;  %s3568_s14 = inlined_call_operand.vmem [shape: f32[1,32], index: 14, kind: input, shape index: {}]   ;;  %s3569_s15 = inlined_call_operand.<no memory space> [shape: f32[1,1], index: 15, kind: input, shape index: {}]   ;;  %s3570_s16 = inlined_call_operand.hbm [shape: f32[2,16], index: 16, kind: output, shape index: {}]  }
   0x1   :  { %3574 = sst [smem:[#allocation6_spill]] %s3554_s0  ;;  %v21_v0 = vstv %s3569_s15 }
   0x2   :  { %22 = vst [vmem:[#allocation2] sm:$0x1] %v21_v0 }
   0x3   :  { %v120_v1 = vld [vmem:[%s3556_s2 + $0x18] sm:$0xff]  ;;  %v119_v2 = vld [vmem:[%s3556_s2 + $0x10] sm:$0xff]  ;;  %v118_v3 = vld [vmem:[%s3556_s2 + $0x8] sm:$0xff]  ;;  %s3575_s17 = sld [smem:[#allocation6_spill]]  ;;  %vm125_vm0 = vcmask 261120  }
   0x4   :  { %150 = vmatpush.msra.mxu0 %v120_v1  ;;  %v117_v4 = vld [vmem:[%s3556_s2] sm:$0xff] }
   0x6   :  { %151 = vmatpush.msra.mxu0 %v119_v2 }
   0x8   :  { %152 = vmatpush.msra.mxu0 %v118_v3 }
   0x9   :  { %v2665_v5 = vld [vmem:[%s3575_s17] sm:$0xff] }
   0xa   :  { %153 = vmatpush.msra.mxu0 %v117_v4 }
   0xb   :  { %2225 = vmatmul.msk.f32.vlgmr.msra.gmra.mxu0 %vm125_vm0, %v2665_v5 }
   0xc   :  { %23 = vsyncpa [#allocation4], 0  ;;  %v2672_v6 = vld [vmem:[%s3575_s17 + $0x8] sm:$0xff]  ;;  %v2679_v7 = vld [vmem:[%s3575_s17 + $0x10] sm:$0xff]  ;;  %s2551_s26 = smov 80   ;;  %s2552_s27 = smov 96  }
   0xd   :  { %v2686_v8 = vld [vmem:[%s3575_s17 + $0x18] sm:$0xff]  ;;  %v2409_v10 = vld [vmem:[%s3557_s3] ss:$0 sm:$0xff]  ;;  %s2553_s28 = smov 112   ;;  %vm177_vm1 = vcmask 130048   ;;  %s2554_s29 = smov 64  }
   0xe   :  { %s2555_s30 = smov 48   ;;  %s2556_s15 = smov 16   ;;  %vm761_vm11 = vcmask 1046528  }
   0xf   :  { %s3572_s20 = smov 32  }
  0x13   :  { %2226 = vmatmul.msk.f32.gmra.mxu0 %vm125_vm0, %v2672_v6 }
  0x1b   :  { %2227 = vmatmul.msk.f32.gmra.mxu0 %vm125_vm0, %v2679_v7 }
  0x23   :  { %2228 = vmatmul.msk.f32.gmra.mxu0 %vm125_vm0, %v2686_v8 }
  0x88   :  { %v155_v9 = vpop.f32.mrf.mxu0 }
  0x89   :  { %v156_v12 = vadd.f32 %v2409_v10, %v155_v9 }
  0x8b   :  { %v167_v19 = vmul.f32 0.25, %v156_v12 }
  0x90   :  { %v158_v11 = vpop.f32.mrf.mxu0 }
  0x91   :  { %v159_v13 = vadd.f32 %v2409_v10, %v158_v11 }
  0x93   :  { %370 = vrot.lane.b32.xlu2 %v159_v13, %s2551_s26  ;;  %175 = vrot.lane.b32.xlu0 %v159_v13, %s2552_s27  ;;  %v2695_v14 = vpack.i.bf16 %v156_v12, %v159_v13  ;;  %v168_v22 = vmul.f32 0.25, %v159_v13 }
  0x98   :  { %v161_v15 = vpop.f32.mrf.mxu0 }
  0x99   :  { %v162_v17 = vadd.f32 %v2409_v10, %v161_v15 }
  0x9b   :  { %368 = vrot.lane.b32.xlu2 %v156_v12, %s2551_s26  ;;  %173 = vrot.lane.b32.xlu0 %v156_v12, %s2552_s27  ;;  %v169_v23 = vmul.f32 0.25, %v162_v17 }
  0xa0   :  { %v164_v16 = vpop.f32.mrf.mxu0 }
  0xa1   :  { %v165_v18 = vadd.f32 %v2409_v10, %v164_v16 }
  0xa3   :  { %215 = vrot.lane.b32.xlu1 %v165_v18, %s2552_s27  ;;  %409 = vrot.lane.b32.xlu2 %v165_v18, %s2551_s26  ;;  %v2701_v20 = vpack.i.bf16 %v162_v17, %v165_v18  ;;  %v170_v21 = vmul.f32 0.25, %v165_v18 }
  0xa4   :  { %364 = vrot.lane.b32.xlu0 %v167_v19, %s2553_s28 }
  0xab   :  { %213 = vrot.lane.b32.xlu1 %v162_v17, %s2552_s27  ;;  %405 = vrot.lane.b32.xlu2 %v170_v21, %s2553_s28 }
  0xac   :  { %407 = vrot.lane.b32.xlu0 %v162_v17, %s2551_s26 }
  0xb3   :  { %366 = vrot.lane.b32.xlu1 %v168_v22, %s2553_s28 }
  0xbb   :  { %403 = vrot.lane.b32.xlu1 %v169_v23, %s2553_s28 }
  0xed   :  { %v371_v24 = vpop.permute.xlu2 %370 }
  0xf5   :  { %v369_v25 = vpop.permute.xlu2 %368 }
  0xfd   :  { %v410_v26 = vpop.permute.xlu2 %409 }
  0xfe   :  { %2245 = vmatpush.xpose.msk.msra.mxu2 %vm177_vm1, %v410_v26 }
 0x105   :  { %v176_v27 = vpop.permute.xlu0 %175  ;;  %v406_v35 = vpop.permute.xlu2 %405 }
 0x106   :  { %2229 = vmatpush.xpose.msk.msra.mxu1 %vm177_vm1, %v176_v27 }
 0x10d   :  { %v174_v28 = vpop.permute.xlu0 %173 }
 0x10e   :  { %2230 = vmatpush.xpose.msk.msra.mxu1 %vm177_vm1, %v174_v28 }
 0x111   :  { %2231 = vmatmul.msk.f32.vlgmr.msra.gmra.mxu1 %vm177_vm1, %v167_v19 }
 0x112   :  { %2241 = vmatpush.xpose.msk.msrb.mxu1 %vm177_vm1, %v371_v24 }
 0x115   :  { %v216_v29 = vpop.permute.xlu1 %215 }
 0x116   :  { %2242 = vmatpush.xpose.msk.msrb.mxu1 %vm177_vm1, %v369_v25  ;;  %v365_v30 = vpop.permute.xlu0 %364  ;;  %2233 = vmatpush.xpose.msk.msrb.mxu0 %vm177_vm1, %v216_v29 }
 0x119   :  { %2232 = vmatmul.msk.f32.gmra.mxu1 %vm177_vm1, %v168_v22 }
 0x11d   :  { %v214_v31 = vpop.permute.xlu1 %213 }
 0x11e   :  { %v408_v32 = vpop.permute.xlu0 %407  ;;  %2234 = vmatpush.xpose.msk.msrb.mxu0 %vm177_vm1, %v214_v31 }
 0x11f   :  { %2246 = vmatpush.xpose.msk.msra.mxu2 %vm177_vm1, %v408_v32 }
 0x121   :  { %2235 = vmatmul.msk.f32.vlgmr.msrb.gmra.mxu0 %vm177_vm1, %v169_v23  ;;  %2243 = vmatmul.msk.f32.vlgmr.msrb.gmra.mxu1 %vm177_vm1, %v365_v30 }
 0x125   :  { %v367_v33 = vpop.permute.xlu1 %366 }
 0x129   :  { %2236 = vmatmul.msk.f32.gmra.mxu0 %vm177_vm1, %v170_v21  ;;  %2244 = vmatmul.msk.f32.gmra.mxu1 %vm177_vm1, %v367_v33 }
 0x12d   :  { %v404_v34 = vpop.permute.xlu1 %403 }
 0x12e   :  { %2247 = vmatmul.msk.f32.vlgmr.msra.gmra.mxu2 %vm177_vm1, %v404_v34 }
 0x136   :  { %2248 = vmatmul.msk.f32.gmra.mxu2 %vm177_vm1, %v406_v35 }
 0x18e   :  { %v205_v36 = vpop.f32.mrf.mxu1 }
 0x18f   :  { %v250_v37 = vsel %vm177_vm1, %v205_v36, -inf }
 0x190   :  { %251 = vmax.xlane.f32.xlu0 %v250_v37 }
 0x196   :  { %v208_v38 = vpop.f32.mrf.mxu1 }
 0x197   :  { %v253_v39 = vsel %vm177_vm1, %v208_v38, -inf }
 0x198   :  { %254 = vmax.xlane.f32.xlu1 %v253_v39 }
 0x19e   :  { %v244_v40 = vpop.f32.mrf.mxu0  ;;  %v397_v41 = vpop.f32.mrf.mxu1 }
 0x19f   :  { %v256_v42 = vsel %vm177_vm1, %v244_v40, -inf  ;;  %v442_v43 = vsel %vm177_vm1, %v397_v41, -inf }
 0x1a0   :  { %257 = vmax.xlane.f32.xlu2 %v256_v42  ;;  %443 = vmax.xlane.f32.xlu0 %v442_v43 }
 0x1a6   :  { %v247_v44 = vpop.f32.mrf.mxu0  ;;  %v400_v45 = vpop.f32.mrf.mxu1 }
 0x1a7   :  { %v259_v46 = vsel %vm177_vm1, %v247_v44, -inf  ;;  %v445_v47 = vsel %vm177_vm1, %v400_v45, -inf }
 0x1a8   :  { %260 = vmax.xlane.f32.xlu2 %v259_v46  ;;  %446 = vmax.xlane.f32.xlu1 %v445_v47 }
 0x1b1   :  { %v2731_v48 = vpop.f32.mrf.mxu2 }
 0x1b2   :  { %v448_v49 = vsel %vm177_vm1, %v2731_v48, -inf }
 0x1b3   :  { %449 = vmax.xlane.f32.xlu0 %v448_v49 }
 0x1b9   :  { %v439_v50 = vpop.f32.mrf.mxu2 }
 0x1ba   :  { %v451_v51 = vsel %vm177_vm1, %v439_v50, -inf }
 0x1bb   :  { %452 = vmax.xlane.f32.xlu0 %v451_v51 }
 0x1c1   :  { %2369 = vrot.lane.b32.xlu1 %v2695_v14, %s2554_s29 }
 0x1cf   :  { %2374 = vrot.lane.b32.xlu0 %v2701_v20, %s2554_s29 }
 0x203   :  { %v252_v52 = vpop.xlane.xlu0 %251 }
 0x204   :  { %v262_v53 = vsub.f32 %v205_v36, %v252_v52 }
 0x206   :  { %v266_v54 = vmul.f32 1.442695, %v262_v53 }
 0x208   :  { %2427 = vpow2.f32 %v266_v54 }
 0x20b   :  { %v255_v55 = vpop.xlane.xlu1 %254 }
 0x20c   :  { %v263_v56 = vsub.f32 %v208_v38, %v255_v55 }
 0x20e   :  { %v2740_v57 = vpop.eup %2427  ;;  %v268_v58 = vmul.f32 1.442695, %v263_v56 }
 0x20f   :  { %v274_v59 = vsel %vm177_vm1, %v2740_v57, 0.0 }
 0x210   :  { %2429 = vpow2.f32 %v268_v58  ;;  %275 = vadd.xlane.f32.xlu2 %v274_v59 }
 0x213   :  { %v258_v60 = vpop.xlane.xlu2 %257  ;;  %v444_v61 = vpop.xlane.xlu0 %443 }
 0x214   :  { %v264_v62 = vsub.f32 %v244_v40, %v258_v60  ;;  %v454_v63 = vsub.f32 %v397_v41, %v444_v61 }
 0x216   :  { %v2744_v0 = vpop.eup %2429  ;;  %v270_v1 = vmul.f32 1.442695, %v264_v62  ;;  %v458_v2 = vmul.f32 1.442695, %v454_v63 }
 0x217   :  { %v277_v3 = vsel %vm177_vm1, %v2744_v0, 0.0 }
 0x218   :  { %2431 = vpow2.f32 %v270_v1  ;;  %278 = vadd.xlane.f32.xlu2 %v277_v3 }
 0x219   :  { %2433 = vpow2.f32 %v458_v2 }
 0x21b   :  { %v261_v4 = vpop.xlane.xlu2 %260  ;;  %v447_v9 = vpop.xlane.xlu1 %446 }
 0x21c   :  { %v265_v10 = vsub.f32 %v247_v44, %v261_v4  ;;  %v455_v11 = vsub.f32 %v400_v45, %v447_v9 }
 0x21e   :  { %v2432_v12 = vpop.eup %2431  ;;  %v272_v13 = vmul.f32 1.442695, %v265_v10  ;;  %v460_v15 = vmul.f32 1.442695, %v455_v11 }
 0x21f   :  { %v2748_v16 = vpop.eup %2433  ;;  %v280_v17 = vsel %vm177_vm1, %v2432_v12, 0.0 }
 0x220   :  { %2435 = vpow2.f32 %v272_v13  ;;  %v466_v18 = vsel %vm177_vm1, %v2748_v16, 0.0  ;;  %281 = vadd.xlane.f32.xlu2 %v280_v17  ;;  %v577_v17 = vld [vmem:[%s3558_s4 + $0x8] sm:$0xff] }
 0x221   :  { %2437 = vpow2.f32 %v460_v15  ;;  %467 = vadd.xlane.f32.xlu1 %v466_v18  ;;  %v579_v15 = vld [vmem:[%s3558_s4 + $0x18] sm:$0xff] }
 0x222   :  { %608 = vmatpush.msra.mxu1 %v579_v15 }
 0x226   :  { %v2436_v19 = vpop.eup %2435  ;;  %v450_v21 = vpop.xlane.xlu0 %449 }
 0x227   :  { %v2753_v22 = vpop.eup %2437  ;;  %v283_v23 = vsel %vm177_vm1, %v2436_v19, 0.0  ;;  %v456_v36 = vsub.f32 %v2731_v48, %v450_v21  ;;  %v576_v21 = vld [vmem:[%s3558_s4] sm:$0xff] }
 0x228   :  { %284 = vadd.xlane.f32.xlu2 %v283_v23  ;;  %v469_v24 = vsel %vm177_vm1, %v2753_v22, 0.0 }
 0x229   :  { %470 = vadd.xlane.f32.xlu0 %v469_v24  ;;  %v462_v37 = vmul.f32 1.442695, %v456_v36 }
 0x22e   :  { %v453_v25 = vpop.xlane.xlu0 %452 }
 0x22f   :  { %v457_v26 = vsub.f32 %v439_v50, %v453_v25 }
 0x231   :  { %v464_v27 = vmul.f32 1.442695, %v457_v26 }
 0x233   :  { %2439 = vpow2.f32 %v464_v27  ;;  %v2370_v28 = vpop.permute.xlu1 %2369 }
 0x234   :  { %v2371_v29 = vunpack.i.l.bf16 %v2370_v28  ;;  %v2372_v30 = vunpack.i.h.bf16 %v2370_v28  ;;  %2441 = vpow2.f32 %v462_v37 }
 0x236   :  { %320 = vmatpush.msra.mxu3 %v2371_v29 }
 0x238   :  { %321 = vmatpush.msra.mxu3 %v2372_v30  ;;  %v2410_v30 = vld [vmem:[%s3559_s5] ss:$0 sm:$0xff] }
 0x239   :  { %v2758_v31 = vpop.eup %2439 }
 0x23a   :  { %2384 = vrot.lane.b32.xlu1 %v2701_v20, %s2555_s30  ;;  %v475_v32 = vsel %vm177_vm1, %v2758_v31, 0.0  ;;  %v2442_v38 = vpop.eup %2441 }
 0x23b   :  { %476 = vadd.xlane.f32.xlu0 %v475_v32  ;;  %v472_v39 = vsel %vm177_vm1, %v2442_v38, 0.0 }
 0x240   :  { %2379 = vrot.lane.b32.xlu2 %v2695_v14, %s2555_s30 }
 0x241   :  { %v2375_v33 = vpop.permute.xlu0 %2374 }
 0x242   :  { %v2376_v34 = vunpack.i.l.bf16 %v2375_v33  ;;  %v2377_v35 = vunpack.i.h.bf16 %v2375_v33 }
 0x244   :  { %355 = vmatpush.msrb.mxu3 %v2376_v34 }
 0x246   :  { %356 = vmatpush.msrb.mxu3 %v2377_v35 }
 0x269   :  { %473 = vadd.xlane.f32.xlu2 %v472_v39 }
 0x283   :  { %v276_v20 = vpop.xlane.xlu2 %275 }
 0x284   :  { %2443 = vrcp.f32 %v276_v20 }
 0x28a   :  { %v2444_v40 = vpop.eup %2443 }
 0x28b   :  { %v279_v41 = vpop.xlane.xlu2 %278  ;;  %v290_v42 = vmul.f32 %v2444_v40, %v2740_v57 }
 0x28c   :  { %2445 = vrcp.f32 %v279_v41 }
 0x28d   :  { %2237 = vmatmul.msk.f32.vlgmr.msra.gmra.mxu3 %vm177_vm1, %v290_v42 }
 0x292   :  { %v2446_v14 = vpop.eup %2445 }
 0x293   :  { %v282_v43 = vpop.xlane.xlu2 %281  ;;  %v291_v44 = vmul.f32 %v2446_v14, %v2744_v0 }
 0x294   :  { %2447 = vrcp.f32 %v282_v43  ;;  %v468_v48 = vpop.xlane.xlu1 %467 }
 0x295   :  { %2238 = vmatmul.msk.f32.gmra.mxu3 %vm177_vm1, %v291_v44  ;;  %v2557_v44 = vmov 32.0  }
 0x29a   :  { %v2448_v45 = vpop.eup %2447 }
 0x29b   :  { %v285_v46 = vpop.xlane.xlu2 %284  ;;  %v292_v47 = vmul.f32 %v2448_v45, %v2432_v12 }
 0x29c   :  { %2449 = vrcp.f32 %v285_v46  ;;  %v471_v54 = vpop.xlane.xlu0 %470 }
 0x29d   :  { %2239 = vmatmul.msk.f32.vlgmr.msrb.gmra.mxu3 %vm177_vm1, %v292_v47  ;;  %2451 = vrcp.f32 %v468_v48 }
 0x29e   :  { %2453 = vrcp.f32 %v471_v54 }
 0x2a2   :  { %v2450_v49 = vpop.eup %2449 }
 0x2a3   :  { %v2380_v50 = vpop.permute.xlu2 %2379  ;;  %v293_v51 = vmul.f32 %v2450_v49, %v2436_v19  ;;  %v2452_v55 = vpop.eup %2451 }
 0x2a4   :  { %v2381_v52 = vunpack.i.l.bf16 %v2380_v50  ;;  %v2382_v53 = vunpack.i.h.bf16 %v2380_v50  ;;  %v482_v56 = vmul.f32 %v2452_v55, %v2748_v16  ;;  %v2454_v60 = vpop.eup %2453  ;;  %v578_v16 = vld [vmem:[%s3558_s4 + $0x10] sm:$0xff] }
 0x2a5   :  { %2240 = vmatmul.msk.f32.gmra.mxu3 %vm177_vm1, %v293_v51  ;;  %v483_v61 = vmul.f32 %v2454_v60, %v2753_v22  ;;  %609 = vmatpush.msra.mxu1 %v578_v16 }
 0x2a6   :  { %512 = vmatpush.msra.mxu3 %v2381_v52 }
 0x2a7   :  { %610 = vmatpush.msra.mxu1 %v577_v17 }
 0x2a8   :  { %513 = vmatpush.msra.mxu3 %v2382_v53 }
 0x2a9   :  { %611 = vmatpush.msra.mxu1 %v576_v21 }
 0x2ac   :  { %v2385_v57 = vpop.permute.xlu1 %2384 }
 0x2ad   :  { %v2386_v58 = vunpack.i.l.bf16 %v2385_v57  ;;  %2249 = vmatmul.msk.f32.vlgmr.msra.gmra.mxu3 %vm177_vm1, %v482_v56  ;;  %v2387_v59 = vunpack.i.h.bf16 %v2385_v57 }
 0x2ae   :  { %v477_v63 = vpop.xlane.xlu0 %476 }
 0x2af   :  { %547 = vmatpush.msra.mxu0 %v2386_v58 }
 0x2b1   :  { %548 = vmatpush.msra.mxu0 %v2387_v59 }
 0x2b5   :  { %2250 = vmatmul.msk.f32.gmra.mxu3 %vm177_vm1, %v483_v61 }
 0x2dc   :  { %v474_v62 = vpop.xlane.xlu2 %473 }
 0x2dd   :  { %2455 = vrcp.f32 %v474_v62 }
 0x2de   :  { %2457 = vrcp.f32 %v477_v63 }
 0x2df   :  { %2459 = vrcp.f32 %v2557_v44 }
 0x2e3   :  { %v2456_v0 = vpop.eup %2455 }
 0x2e4   :  { %v484_v1 = vmul.f32 %v2456_v0, %v2442_v38  ;;  %v2458_v2 = vpop.eup %2457 }
 0x2e5   :  { %v485_v3 = vmul.f32 %v2458_v2, %v2758_v31 }
 0x2e6   :  { %2251 = vmatmul.msk.f32.vlgmr.msra.gmra.mxu0 %vm177_vm1, %v484_v1 }
 0x2ee   :  { %2252 = vmatmul.msk.f32.gmra.mxu0 %vm177_vm1, %v485_v3 }
 0x310   :  { %v323_v4 = vpop.f32.mrf.mxu3 }
 0x318   :  { %v326_v9 = vpop.f32.mrf.mxu3 }
 0x320   :  { %v358_v10 = vpop.f32.mrf.mxu3 }
 0x328   :  { %v361_v11 = vpop.f32.mrf.mxu3 }
 0x330   :  { %v515_v12 = vpop.f32.mrf.mxu3 }
 0x331   :  { %560 = vrot.lane.b32.xlu0 %v515_v12, %s2556_s15 }
 0x338   :  { %v518_v13 = vpop.f32.mrf.mxu3 }
 0x339   :  { %562 = vrot.lane.b32.xlu1 %v518_v13, %s2556_s15  ;;  %v2558_v13 = vmov 0.0  }
 0x363   :  { %v550_v18 = vpop.f32.mrf.mxu0 }
 0x364   :  { %564 = vrot.lane.b32.xlu2 %v550_v18, %s2556_s15 }
 0x36b   :  { %v553_v19 = vpop.f32.mrf.mxu0 }
 0x36c   :  { %566 = vrot.lane.b32.xlu1 %v553_v19, %s2556_s15 }
 0x3a3   :  { %v561_v22 = vpop.permute.xlu0 %560 }
 0x3a4   :  { %v572_v23 = vsel %vm177_vm1, %v323_v4, %v561_v22  ;;  %v60_v4 = vlaneseq }
 0x3a5   :  { %2253 = vmatmul.msk.f32.vlgmr.msra.gmra.mxu1 %vm125_vm0, %v572_v23 }
 0x3ab   :  { %v563_v24 = vpop.permute.xlu1 %562 }
 0x3ac   :  { %v573_v25 = vsel %vm177_vm1, %v326_v9, %v563_v24  ;;  %v2839_v9 = vshrl.u32 %v60_v4, 7 }
 0x3ad   :  { %2254 = vmatmul.msk.f32.gmra.mxu1 %vm125_vm0, %v573_v25 }
 0x3be   :  { %v565_v26 = vpop.permute.xlu2 %564 }
 0x3bf   :  { %v574_v27 = vsel %vm177_vm1, %v358_v10, %v565_v26  ;;  %v65_v10 = vand.u32 15, %v2839_v9 }
 0x3c0   :  { %2255 = vmatmul.msk.f32.gmra.mxu1 %vm125_vm0, %v574_v27 }
 0x3de   :  { %v567_v28 = vpop.permute.xlu1 %566 }
 0x3df   :  { %v575_v29 = vsel %vm177_vm1, %v361_v11, %v567_v28  ;;  %v69_v11 = vadd.s32 4294967295, %v65_v10 }
 0x3e0   :  { %2256 = vmatmul.msk.f32.gmra.mxu1 %vm125_vm0, %v575_v29 }
 0x3e1   :  { %vm73_vm3 = vcmp.ge.s32.totalorder %v69_v11, 0 }
 0x3e2   :  { %v2843_v15 = vsel %vm73_vm3, 1.0, %v2558_v13 }
 0x422   :  { %v613_v31 = vpop.f32.mrf.mxu1 }
 0x423   :  { %v614_v32 = vadd.f32 %v2410_v30, %v613_v31  ;;  %v63_v31 = vadd.s32 16, %v2839_v9 }
 0x425   :  { %v625_v33 = vadd.f32 %v614_v32, %v2665_v5 }
 0x427   :  { %v631_v34 = vsel %vm125_vm0, %v625_v33, 0.0 }
 0x428   :  { %632 = vadd.xlane.f32.xlu0 %v631_v34 }
 0x42a   :  { %v616_v35 = vpop.f32.mrf.mxu1 }
 0x42b   :  { %v617_v36 = vadd.f32 %v2410_v30, %v616_v35  ;;  %v2856_v35 = vld [vmem:[%s3561_s7] ss:$0 sm:$0xff] }
 0x42d   :  { %v626_v37 = vadd.f32 %v617_v36, %v2672_v6  ;;  %v2460_v6 = vpop.eup %2459  ;;  %v67_v36 = vand.u32 15, %v63_v31 }
 0x42e   :  { %v644_v45 = vmul.f32 32.0, %v2460_v6  ;;  %vm648_vm2 = vweird.f32 %v2460_v6 }
 0x42f   :  { %v634_v38 = vsel %vm125_vm0, %v626_v37, 0.0 }
 0x430   :  { %635 = vadd.xlane.f32.xlu1 %v634_v38  ;;  %v645_v46 = vsub.f32 1.0, %v644_v45 }
 0x432   :  { %v646_v47 = vmul.f32 %v2460_v6, %v645_v46 }
 0x434   :  { %v647_v48 = vadd.f32 %v2460_v6, %v646_v47 }
 0x436   :  { %v2816_v49 = vsel %vm648_vm2, %v2460_v6, %v647_v48 }
 0x43d   :  { %v619_v39 = vpop.f32.mrf.mxu1 }
 0x43e   :  { %v620_v20 = vadd.f32 %v2410_v30, %v619_v39  ;;  %v71_v39 = vadd.s32 4294967295, %v67_v36  ;;  %v821_v36 = vld [vmem:[%s3564_s10 + $0x30] sm:$0xff] }
 0x440   :  { %v627_v40 = vadd.f32 %v620_v20, %v2679_v7  ;;  %vm75_vm8 = vcmp.ge.s32.totalorder %v71_v39, 0  ;;  %v818_v39 = vld [vmem:[%s3564_s10 + $0x18] sm:$0xff] }
 0x442   :  { %v637_v41 = vsel %vm125_vm0, %v627_v40, 0.0 }
 0x443   :  { %638 = vadd.xlane.f32.xlu2 %v637_v41 }
 0x45d   :  { %v622_v42 = vpop.f32.mrf.mxu1 }
 0x45e   :  { %v623_v14 = vadd.f32 %v2410_v30, %v622_v42  ;;  %v2850_v30 = vld [vmem:[%s3560_s6] ss:$0 sm:$0xff] }
 0x460   :  { %v628_v5 = vadd.f32 %v623_v14, %v2686_v8 }
 0x462   :  { %v640_v43 = vsel %vm125_vm0, %v628_v5, 0.0 }
 0x463   :  { %641 = vadd.xlane.f32.xlu0 %v640_v43 }
 0x49b   :  { %v633_v7 = vpop.xlane.xlu0 %632 }
 0x49c   :  { %v650_v50 = vmul.f32 %v2816_v49, %v633_v7 }
 0x49e   :  { %v654_v51 = vsub.f32 %v625_v33, %v650_v50 }
 0x4a0   :  { %v658_v52 = vmul.f32 %v654_v51, %v654_v51 }
 0x4a2   :  { %v662_v8 = vsel %vm125_vm0, %v658_v52, 0.0 }
 0x4a3   :  { %663 = vadd.xlane.f32.xlu1 %v662_v8  ;;  %v636_v53 = vpop.xlane.xlu1 %635  ;;  %v62_v8 = vadd.s32 8, %v2839_v9 }
 0x4a4   :  { %v651_v54 = vmul.f32 %v2816_v49, %v636_v53 }
 0x4a6   :  { %v2821_v55 = vsub.f32 %v626_v37, %v651_v54 }
 0x4a8   :  { %v659_v56 = vmul.f32 %v2821_v55, %v2821_v55 }
 0x4aa   :  { %v665_v57 = vsel %vm125_vm0, %v659_v56, 0.0 }
 0x4ab   :  { %666 = vadd.xlane.f32.xlu0 %v665_v57 }
 0x4b6   :  { %v639_v58 = vpop.xlane.xlu2 %638 }
 0x4b7   :  { %v652_v59 = vmul.f32 %v2816_v49, %v639_v58 }
 0x4b9   :  { %v2827_v60 = vsub.f32 %v627_v40, %v652_v59 }
 0x4bb   :  { %v660_v61 = vmul.f32 %v2827_v60, %v2827_v60 }
 0x4bd   :  { %v668_v62 = vsel %vm125_vm0, %v660_v61, 0.0 }
 0x4be   :  { %669 = vadd.xlane.f32.xlu1 %v668_v62 }
 0x4d6   :  { %v642_v63 = vpop.xlane.xlu0 %641 }
 0x4d7   :  { %v653_v0 = vmul.f32 %v2816_v49, %v642_v63 }
 0x4d9   :  { %v2833_v1 = vsub.f32 %v628_v5, %v653_v0  ;;  %v2864_v5 = vsel %vm75_vm8, 1.0, %v2558_v13  ;;  %vm831_vm8 = vcmask 785408  }
 0x4db   :  { %v661_v2 = vmul.f32 %v2833_v1, %v2833_v1 }
 0x4dd   :  { %v671_v3 = vsel %vm125_vm0, %v661_v2, 0.0 }
 0x4de   :  { %672 = vadd.xlane.f32.xlu2 %v671_v3 }
 0x516   :  { %v664_v12 = vpop.xlane.xlu1 %663 }
 0x517   :  { %v674_v16 = vmul.f32 %v664_v12, %v2816_v49 }
 0x519   :  { %v678_v17 = vadd.f32 1e-05, %v674_v16 }
 0x51b   :  { %2461 = vrsqrt.f32 %v678_v17  ;;  %vm688_vm5 = vweird.f32 %v678_v17 }
 0x51e   :  { %v667_v18 = vpop.xlane.xlu0 %666 }
 0x51f   :  { %v675_v19 = vmul.f32 %v667_v18, %v2816_v49  ;;  %v64_v18 = vadd.s32 24, %v2839_v9 }
 0x521   :  { %v2462_v21 = vpop.eup %2461  ;;  %v679_v22 = vadd.f32 1e-05, %v675_v19 }
 0x522   :  { %v683_v23 = vmul.f32 %v2462_v21, %v678_v17  ;;  %vm689_vm4 = vweird.f32 %v2462_v21 }
 0x523   :  { %2463 = vrsqrt.f32 %v679_v22  ;;  %vm690_vm6 = vmor %vm688_vm5, %vm689_vm4  ;;  %vm698_vm9 = vweird.f32 %v679_v22 }
 0x524   :  { %v684_v24 = vmul.f32 %v2462_v21, %v683_v23 }
 0x526   :  { %v685_v25 = vmul.f32 0.5, %v684_v24 }
 0x528   :  { %v686_v26 = vsub.f32 1.5, %v685_v25 }
 0x529   :  { %v2464_v27 = vpop.eup %2463 }
 0x52a   :  { %v687_v28 = vmul.f32 %v2462_v21, %v686_v26  ;;  %v693_v29 = vmul.f32 %v2464_v27, %v679_v22  ;;  %vm699_vm7 = vweird.f32 %v2464_v27  ;;  %v68_v22 = vand.u32 15, %v64_v18  ;;  %v949_v18 = vld [vmem:[%s3566_s12 + $0xa0] sm:$0xff] }
 0x52b   :  { %vm700_vm10 = vmor %vm698_vm9, %vm699_vm7  ;;  %vm810_vm7 = vcmask 523264  }
 0x52c   :  { %v691_v32 = vsel %vm690_vm6, %v2462_v21, %v687_v28  ;;  %v694_v33 = vmul.f32 %v2464_v27, %v693_v29  ;;  %v96_v25 = vadd.s32 1, %v68_v22  ;;  %vm744_vm6 = vcmask 1040384   ;;  %v946_v22 = vld [vmem:[%s3566_s12 + $0x88] sm:$0xff] }
 0x52d   :  { %v722_v34 = vmul.f32 %v691_v32, %v654_v51 }
 0x52e   :  { %v695_v37 = vmul.f32 0.5, %v694_v33  ;;  %vm104_vm5 = vcmp.le.s32.totalorder %v96_v25, 15  ;;  %v825_v33 = vld [vmem:[%s3564_s10 + $0x50] sm:$0xff] }
 0x52f   :  { %v729_v38 = vmul.f32 %v2850_v30, %v722_v34  ;;  %v2905_v29 = vsel %vm104_vm5, 1.0, %v2558_v13  ;;  %v823_v34 = vld [vmem:[%s3564_s10 + $0x40] sm:$0xff] }
 0x530   :  { %v696_v20 = vsub.f32 1.5, %v695_v37  ;;  %v820_v37 = vld [vmem:[%s3564_s10 + $0x28] sm:$0xff] }
 0x531   :  { %v670_v40 = vpop.xlane.xlu1 %669  ;;  %v2860_v41 = vadd.f32 %v2856_v35, %v729_v38  ;;  %v819_v38 = vld [vmem:[%s3564_s10 + $0x20] sm:$0xff] }
 0x532   :  { %v697_v42 = vmul.f32 %v2464_v27, %v696_v20  ;;  %v676_v14 = vmul.f32 %v670_v40, %v2816_v49  ;;  %v817_v20 = vld [vmem:[%s3564_s10 + $0x10] sm:$0xff]  ;;  %v816_v40 = vld [vmem:[%s3564_s10 + $0x8] sm:$0xff] }
 0x533   :  { %778 = vrot.lane.b32.xlu0 %v2860_v41, %s3572_s20  ;;  %v762_v47 = vrot.slane %v2860_v41, 1 }
 0x534   :  { %v701_v43 = vsel %vm700_vm10, %v2464_v27, %v697_v42  ;;  %v680_v44 = vadd.f32 1e-05, %v676_v14  ;;  %v815_v42 = vld [vmem:[%s3564_s10] sm:$0xff]  ;;  %v745_v14 = vrot.slane %v2860_v41, 7 }
 0x535   :  { %v723_v6 = vmul.f32 %v701_v43, %v2821_v55  ;;  %v66_v55 = vand.u32 15, %v62_v8 }
 0x536   :  { %2465 = vrsqrt.f32 %v680_v44  ;;  %vm708_vm13 = vweird.f32 %v680_v44  ;;  %v756_v43 = vsel %vm744_vm6, 0.0, %v745_v14 }
 0x537   :  { %v730_v45 = vmul.f32 %v2850_v30, %v723_v6  ;;  %v94_v58 = vadd.s32 1, %v66_v55  ;;  %v757_v6 = vmul.f32 %v2843_v15, %v756_v43 }
 0x539   :  { %v2871_v46 = vadd.f32 %v2856_v35, %v730_v45  ;;  %vm102_vm15 = vcmp.le.s32.totalorder %v94_v58, 15 }
 0x53a   :  { %v2888_v63 = vsel %vm102_vm15, 1.0, %v2558_v13  ;;  %v824_v13 = vld [vmem:[%s3564_s10 + $0x48] sm:$0xff] }
 0x53b   :  { %780 = vrot.lane.b32.xlu2 %v2871_v46, %s3572_s20  ;;  %v763_v48 = vrot.slane %v2871_v46, 1 }
 0x53c   :  { %v2466_v7 = vpop.eup %2465 }
 0x53d   :  { %v703_v50 = vmul.f32 %v2466_v7, %v680_v44  ;;  %v764_v51 = vsel %vm761_vm11, %v762_v47, %v763_v48  ;;  %vm709_vm12 = vweird.f32 %v2466_v7 }
 0x53e   :  { %794 = vrot.lane.b32.xlu1 %v764_v51, %s2554_s29  ;;  %vm710_vm14 = vmor %vm708_vm13, %vm709_vm12 }
 0x53f   :  { %v704_v52 = vmul.f32 %v2466_v7, %v703_v50 }
 0x541   :  { %v705_v53 = vmul.f32 0.5, %v704_v52 }
 0x543   :  { %v706_v54 = vsub.f32 1.5, %v705_v53 }
 0x545   :  { %v707_v56 = vmul.f32 %v2466_v7, %v706_v54 }
 0x547   :  { %v711_v57 = vsel %vm710_vm14, %v2466_v7, %v707_v56  ;;  %v746_v7 = vrot.slane %v2871_v46, 7 }
 0x548   :  { %v724_v59 = vmul.f32 %v711_v57, %v2827_v60 }
 0x549   :  { %v747_v51 = vsel %vm744_vm6, %v745_v14, %v746_v7  ;;  %v939_v14 = vld [vmem:[%s3566_s12 + $0x50] sm:$0xff] }
 0x54a   :  { %v731_v61 = vmul.f32 %v2850_v30, %v724_v59 }
 0x54c   :  { %v2883_v62 = vadd.f32 %v2856_v35, %v731_v61 }
 0x54e   :  { %782 = vrot.lane.b32.xlu1 %v2883_v62, %s3572_s20  ;;  %v765_v0 = vrot.slane %v2883_v62, 1  ;;  %v748_v54 = vrot.slane %v2883_v62, 7 }
 0x550   :  { %v766_v2 = vsel %vm761_vm11, %v763_v48, %v765_v0  ;;  %v749_v55 = vsel %vm744_vm6, %v746_v7, %v748_v54 }
 0x551   :  { %v673_v3 = vpop.xlane.xlu2 %672  ;;  %v775_v10 = vmul.f32 %v2888_v63, %v766_v2  ;;  %v759_v57 = vmul.f32 %v2864_v5, %v749_v55  ;;  %v934_v55 = vld [vmem:[%s3566_s12 + $0x28] sm:$0xff] }
 0x552   :  { %v677_v60 = vmul.f32 %v673_v3, %v2816_v49 }
 0x553   :  { %796 = vrot.lane.b32.xlu0 %v775_v10, %s2554_s29 }
 0x554   :  { %v681_v11 = vadd.f32 1e-05, %v677_v60 }
 0x556   :  { %2467 = vrsqrt.f32 %v681_v11  ;;  %vm718_vm3 = vweird.f32 %v681_v11 }
 0x55c   :  { %v2468_v12 = vpop.eup %2467 }
 0x55d   :  { %v713_v16 = vmul.f32 %v2468_v12, %v681_v11  ;;  %vm719_vm2 = vweird.f32 %v2468_v12 }
 0x55e   :  { %vm720_vm4 = vmor %vm718_vm3, %vm719_vm2 }
 0x55f   :  { %v714_v17 = vmul.f32 %v2468_v12, %v713_v16  ;;  %v951_v16 = vld [vmem:[%s3566_s12 + $0xb0] sm:$0xff] }
 0x561   :  { %v715_v19 = vmul.f32 0.5, %v714_v17  ;;  %v950_v17 = vld [vmem:[%s3566_s12 + $0xa8] sm:$0xff] }
 0x563   :  { %v716_v21 = vsub.f32 1.5, %v715_v19  ;;  %v948_v19 = vld [vmem:[%s3566_s12 + $0x98] sm:$0xff] }
 0x565   :  { %v717_v23 = vmul.f32 %v2468_v12, %v716_v21  ;;  %v947_v21 = vld [vmem:[%s3566_s12 + $0x90] sm:$0xff] }
 0x567   :  { %v721_v24 = vsel %vm720_vm4, %v2468_v12, %v717_v23  ;;  %v952_v12 = vld [vmem:[%s3566_s12 + $0xb8] sm:$0xff]  ;;  %v945_v23 = vld [vmem:[%s3566_s12 + $0x80] sm:$0xff] }
 0x568   :  { %v725_v26 = vmul.f32 %v721_v24, %v2833_v1  ;;  %1006 = vmatpush.msrb.mxu0 %v952_v12  ;;  %v2413_v24 = vld [vmem:[%s3565_s11] ss:$0 sm:$0xff] }
 0x56a   :  { %v732_v27 = vmul.f32 %v2850_v30, %v725_v26  ;;  %v826_v30 = vld [vmem:[%s3564_s10 + $0x58] sm:$0xff]  ;;  %1007 = vmatpush.msrb.mxu0 %v951_v16 }
 0x56b   :  { %848 = vmatpush.msrb.mxu2 %v826_v30 }
 0x56c   :  { %v2899_v28 = vadd.f32 %v2856_v35, %v732_v27  ;;  %v822_v35 = vld [vmem:[%s3564_s10 + $0x38] sm:$0xff]  ;;  %1008 = vmatpush.msrb.mxu0 %v950_v17 }
 0x56d   :  { %849 = vmatpush.msrb.mxu2 %v825_v33 }
 0x56e   :  { %784 = vrot.lane.b32.xlu2 %v2899_v28, %s3572_s20  ;;  %v767_v9 = vrot.slane %v2899_v28, 1  ;;  %1009 = vmatpush.msrb.mxu0 %v949_v18 }
 0x56f   :  { %850 = vmatpush.msrb.mxu2 %v824_v13 }
 0x570   :  { %v768_v31 = vsel %vm761_vm11, %v765_v0, %v767_v9  ;;  %v773_v32 = vsel %vm761_vm11, %v767_v9, 0.0  ;;  %v750_v0 = vrot.slane %v2899_v28, 7  ;;  %1010 = vmatpush.msrb.mxu0 %v948_v19 }
 0x571   :  { %798 = vrot.lane.b32.xlu0 %v768_v31, %s2554_s29  ;;  %v777_v1 = vmul.f32 %v2905_v29, %v773_v32  ;;  %851 = vmatpush.msrb.mxu2 %v823_v34 }
 0x572   :  { %v751_v10 = vsel %vm744_vm6, %v748_v54, %v750_v0  ;;  %1011 = vmatpush.msrb.mxu0 %v947_v21 }
 0x573   :  { %800 = vrot.lane.b32.xlu1 %v777_v1, %s2554_s29  ;;  %852 = vmatpush.msrb.mxu2 %v822_v35 }
 0x574   :  { %1012 = vmatpush.msrb.mxu0 %v946_v22 }
 0x575   :  { %853 = vmatpush.msrb.mxu2 %v821_v36  ;;  %v944_v36 = vld [vmem:[%s3566_s12 + $0x78] sm:$0xff] }
 0x576   :  { %1013 = vmatpush.msrb.mxu0 %v945_v23  ;;  %969 = vmatpush.msrb.mxu3 %v944_v36 }
 0x577   :  { %854 = vmatpush.msrb.mxu2 %v820_v37  ;;  %v943_v37 = vld [vmem:[%s3566_s12 + $0x70] sm:$0xff] }
 0x578   :  { %970 = vmatpush.msrb.mxu3 %v943_v37 }
 0x579   :  { %855 = vmatpush.msrb.mxu2 %v819_v38  ;;  %v942_v38 = vld [vmem:[%s3566_s12 + $0x68] sm:$0xff] }
 0x57a   :  { %971 = vmatpush.msrb.mxu3 %v942_v38 }
 0x57b   :  { %856 = vmatpush.msrb.mxu2 %v818_v39  ;;  %v941_v39 = vld [vmem:[%s3566_s12 + $0x60] sm:$0xff] }
 0x57c   :  { %972 = vmatpush.msrb.mxu3 %v941_v39 }
 0x57d   :  { %857 = vmatpush.msrb.mxu2 %v817_v20 }
 0x57f   :  { %858 = vmatpush.msrb.mxu2 %v816_v40  ;;  %v940_v40 = vld [vmem:[%s3566_s12 + $0x58] sm:$0xff] }
 0x580   :  { %973 = vmatpush.msrb.mxu3 %v940_v40 }
 0x581   :  { %859 = vmatpush.msrb.mxu2 %v815_v42 }
 0x582   :  { %974 = vmatpush.msrb.mxu3 %v939_v14 }
 0x595   :  { %v781_v50 = vpop.permute.xlu2 %780 }
 0x596   :  { %v807_v52 = vsel %vm125_vm0, %v747_v51, %v781_v50 }
 0x5a5   :  { %v779_v44 = vpop.permute.xlu0 %778 }
 0x5a6   :  { %v806_v45 = vsel %vm125_vm0, %v757_v6, %v779_v44  ;;  %v938_v44 = vld [vmem:[%s3566_s12 + $0x48] sm:$0xff] }
 0x5a7   :  { %975 = vmatpush.msrb.mxu3 %v938_v44 }
 0x5b0   :  { %v795_v47 = vpop.permute.xlu1 %794 }
 0x5b1   :  { %v811_v48 = vsel %vm810_vm7, %v806_v45, %v795_v47  ;;  %v937_v47 = vld [vmem:[%s3566_s12 + $0x40] sm:$0xff] }
 0x5b2   :  { %2257 = vmatmul.msk.f32.vlgmr.msrb.gmra.mxu2 %vm831_vm8, %v811_v48  ;;  %976 = vmatpush.msrb.mxu3 %v937_v47 }
 0x5c0   :  { %v783_v56 = vpop.permute.xlu1 %782 }
 0x5c1   :  { %v808_v58 = vsel %vm125_vm0, %v759_v57, %v783_v56 }
 0x5c5   :  { %v797_v8 = vpop.permute.xlu0 %796 }
 0x5c6   :  { %v812_v53 = vsel %vm810_vm7, %v807_v52, %v797_v8  ;;  %v936_v52 = vld [vmem:[%s3566_s12 + $0x38] sm:$0xff] }
 0x5c7   :  { %2258 = vmatmul.msk.f32.gmra.mxu2 %vm831_vm8, %v812_v53  ;;  %v935_v53 = vld [vmem:[%s3566_s12 + $0x30] sm:$0xff]  ;;  %977 = vmatpush.msrb.mxu3 %v936_v52 }
 0x5c8   :  { %v785_v2 = vpop.permute.xlu2 %784 }
 0x5c9   :  { %v809_v60 = vsel %vm125_vm0, %v751_v10, %v785_v2  ;;  %978 = vmatpush.msrb.mxu3 %v935_v53  ;;  %v931_v2 = vld [vmem:[%s3566_s12 + $0x10] sm:$0xff] }
 0x5cb   :  { %979 = vmatpush.msrb.mxu3 %v934_v55 }
 0x5e3   :  { %v799_v59 = vpop.permute.xlu0 %798 }
 0x5e4   :  { %v813_v61 = vsel %vm810_vm7, %v808_v58, %v799_v59  ;;  %v933_v58 = vld [vmem:[%s3566_s12 + $0x20] sm:$0xff] }
 0x5e5   :  { %2259 = vmatmul.msk.f32.gmra.mxu2 %vm831_vm8, %v813_v61  ;;  %v801_v3 = vpop.permute.xlu1 %800  ;;  %v932_v61 = vld [vmem:[%s3566_s12 + $0x18] sm:$0xff]  ;;  %980 = vmatpush.msrb.mxu3 %v933_v58 }
 0x5e6   :  { %v814_v11 = vsel %vm810_vm7, %v809_v60, %v801_v3  ;;  %v930_v60 = vld [vmem:[%s3566_s12 + $0x8] sm:$0xff] }
 0x5e7   :  { %981 = vmatpush.msrb.mxu3 %v932_v61 }
 0x5e9   :  { %982 = vmatpush.msrb.mxu3 %v931_v2 }
 0x5eb   :  { %983 = vmatpush.msrb.mxu3 %v930_v60  ;;  %v2268_v60 = vld [vmem:[%s3556_s2 + $0x38] sm:$0xff] }
 0x5ec   :  { %1169 = vmatpush.msrb.mxu1 %v2268_v60 }
 0x5ed   :  { %2260 = vmatmul.msk.f32.gmra.mxu2 %vm831_vm8, %v814_v11  ;;  %v929_v11 = vld [vmem:[%s3566_s12] sm:$0xff] }
 0x5ee   :  { %984 = vmatpush.msrb.mxu3 %v929_v11  ;;  %v2267_v11 = vld [vmem:[%s3556_s2 + $0x30] sm:$0xff] }
 0x5ef   :  { %1170 = vmatpush.msrb.mxu1 %v2267_v11 }
 0x635   :  { %v861_v25 = vpop.f32.mrf.mxu2 }
 0x636   :  { %v862_v26 = vadd.f32 %v2413_v24, %v861_v25 }
 0x638   :  { %v2997_v27 = vmax.f32 %v862_v26, 0.0 }
 0x63a   :  { %913 = vrot.lane.b32.xlu0 %v2997_v27, %s2554_s29  ;;  %v881_v1 = vrot.slane %v2997_v27, 7  ;;  %v897_v30 = vrot.slane %v2997_v27, 1  ;;  %v2414_v27 = vld [vmem:[%s3567_s13] ss:$0 sm:$0xff] }
 0x63c   :  { %v892_v12 = vsel %vm744_vm6, 0.0, %v881_v1 }
 0x63d   :  { %v893_v16 = vmul.f32 %v2843_v15, %v892_v12  ;;  %v2266_v12 = vld [vmem:[%s3556_s2 + $0x28] sm:$0xff] }
 0x63e   :  { %1171 = vmatpush.msrb.mxu1 %v2266_v12 }
 0x64a   :  { %v864_v9 = vpop.f32.mrf.mxu2 }
 0x64b   :  { %v865_v31 = vadd.f32 %v2413_v24, %v864_v9 }
 0x64d   :  { %v874_v32 = vmax.f32 %v865_v31, 0.0 }
 0x64f   :  { %v882_v33 = vrot.slane %v874_v32, 7  ;;  %v898_v13 = vrot.slane %v874_v32, 1  ;;  %915 = vrot.lane.b32.xlu2 %v874_v32, %s2554_s29 }
 0x651   :  { %v899_v34 = vsel %vm761_vm11, %v897_v30, %v898_v13  ;;  %v3006_v35 = vsel %vm744_vm6, %v881_v1, %v882_v33 }
 0x652   :  { %2261 = vmatmul.msk.f32.vlgmr.msrb.gmra.mxu0 %vm810_vm7, %v899_v34 }
 0x668   :  { %v867_v20 = vpop.f32.mrf.mxu2 }
 0x669   :  { %v868_v42 = vadd.f32 %v2413_v24, %v867_v20 }
 0x66b   :  { %v875_v43 = vmax.f32 %v868_v42, 0.0 }
 0x66d   :  { %v884_v6 = vrot.slane %v875_v43, 7  ;;  %v900_v45 = vrot.slane %v875_v43, 1  ;;  %917 = vrot.lane.b32.xlu1 %v875_v43, %s2554_s29 }
 0x66f   :  { %v901_v48 = vsel %vm761_vm11, %v898_v13, %v900_v45  ;;  %v885_v7 = vsel %vm744_vm6, %v882_v33, %v884_v6 }
 0x670   :  { %v870_v50 = vpop.f32.mrf.mxu2  ;;  %v910_v51 = vmul.f32 %v2888_v63, %v901_v48  ;;  %v895_v22 = vmul.f32 %v2864_v5, %v885_v7 }
 0x671   :  { %v871_v8 = vadd.f32 %v2413_v24, %v870_v50 }
 0x672   :  { %2262 = vmatmul.msk.f32.gmra.mxu0 %vm810_vm7, %v910_v51 }
 0x673   :  { %v876_v54 = vmax.f32 %v871_v8, 0.0 }
 0x675   :  { %v886_v56 = vrot.slane %v876_v54, 7  ;;  %v902_v57 = vrot.slane %v876_v54, 1  ;;  %919 = vrot.lane.b32.xlu0 %v876_v54, %s2554_s29 }
 0x677   :  { %v887_v59 = vsel %vm744_vm6, %v884_v6, %v886_v56  ;;  %v903_v0 = vsel %vm761_vm11, %v900_v45, %v902_v57  ;;  %v908_v3 = vsel %vm761_vm11, %v902_v57, 0.0 }
 0x678   :  { %v912_v10 = vmul.f32 %v2905_v29, %v908_v3 }
 0x67a   :  { %2263 = vmatmul.msk.f32.gmra.mxu0 %vm810_vm7, %v903_v0 }
 0x682   :  { %2264 = vmatmul.msk.f32.gmra.mxu0 %vm810_vm7, %v912_v10 }
 0x6a9   :  { %v916_v19 = vpop.permute.xlu2 %915 }
 0x6aa   :  { %v926_v21 = vsel %vm810_vm7, %v3006_v35, %v916_v19 }
 0x6ac   :  { %v914_v17 = vpop.permute.xlu0 %913 }
 0x6ad   :  { %v925_v18 = vsel %vm810_vm7, %v893_v16, %v914_v17  ;;  %v2265_v16 = vld [vmem:[%s3556_s2 + $0x20] sm:$0xff] }
 0x6ae   :  { %985 = vmatmul.f32.vlgmr.msrb.gmra.mxu3 %v925_v18  ;;  %1172 = vmatpush.msrb.mxu1 %v2265_v16 }
 0x6b6   :  { %988 = vmatmul.f32.gmra.mxu3 %v926_v21 }
 0x6cf   :  { %v1015_v32 = vpop.f32.mrf.mxu0 }
 0x6df   :  { %v918_v23 = vpop.permute.xlu1 %917 }
 0x6e0   :  { %v927_v24 = vsel %vm810_vm7, %v895_v22, %v918_v23 }
 0x6e1   :  { %991 = vmatmul.f32.gmra.mxu3 %v927_v24 }
 0x6e7   :  { %v920_v25 = vpop.permute.xlu0 %919 }
 0x6e8   :  { %v928_v26 = vsel %vm810_vm7, %v887_v59, %v920_v25 }
 0x6e9   :  { %994 = vmatmul.f32.gmra.mxu3 %v928_v26 }
 0x6ef   :  { %v1018_v35 = vpop.f32.mrf.mxu0 }
 0x6f7   :  { %v1021_v39 = vpop.f32.mrf.mxu0 }
 0x6ff   :  { %v1024_v6 = vpop.f32.mrf.mxu0 }
 0x731   :  { %v986_v9 = vpop.f32.mrf.mxu3 }
 0x732   :  { %v987_v31 = vadd.f32 %v2414_v27, %v986_v9 }
 0x734   :  { %v1016_v1 = vadd.f32 %v1015_v32, %v987_v31 }
 0x736   :  { %v1027_v30 = vadd.f32 %v1016_v1, %v2860_v41 }
 0x738   :  { %v1033_v33 = vsel %vm125_vm0, %v1027_v30, 0.0 }
 0x739   :  { %1034 = vadd.xlane.f32.xlu2 %v1033_v33  ;;  %v989_v13 = vpop.f32.mrf.mxu3 }
 0x73a   :  { %v990_v34 = vadd.f32 %v2414_v27, %v989_v13 }
 0x73c   :  { %v1019_v36 = vadd.f32 %v1018_v35, %v990_v34  ;;  %v2416_v35 = vld [vmem:[%s3563_s9] ss:$0 sm:$0xff] }
 0x73e   :  { %v1028_v37 = vadd.f32 %v1019_v36, %v2871_v46 }
 0x740   :  { %v1036_v38 = vsel %vm125_vm0, %v1028_v37, 0.0 }
 0x741   :  { %1037 = vadd.xlane.f32.xlu1 %v1036_v38 }
 0x764   :  { %v992_v20 = vpop.f32.mrf.mxu3 }
 0x765   :  { %v993_v40 = vadd.f32 %v2414_v27, %v992_v20 }
 0x767   :  { %v1022_v42 = vadd.f32 %v1021_v39, %v993_v40 }
 0x769   :  { %v1029_v14 = vadd.f32 %v1022_v42, %v2883_v62 }
 0x76b   :  { %v1039_v41 = vsel %vm125_vm0, %v1029_v14, 0.0 }
 0x76c   :  { %v995_v43 = vpop.f32.mrf.mxu3  ;;  %1040 = vadd.xlane.f32.xlu0 %v1039_v41 }
 0x76d   :  { %v996_v44 = vadd.f32 %v2414_v27, %v995_v43 }
 0x76f   :  { %v1025_v45 = vadd.f32 %v1024_v6, %v996_v44 }
 0x771   :  { %v1030_v47 = vadd.f32 %v1025_v45, %v2899_v28 }
 0x773   :  { %v1042_v46 = vsel %vm125_vm0, %v1030_v47, 0.0 }
 0x774   :  { %1043 = vadd.xlane.f32.xlu2 %v1042_v46 }
 0x7ac   :  { %v1035_v48 = vpop.xlane.xlu2 %1034 }
 0x7ad   :  { %v1045_v7 = vmul.f32 %v1035_v48, %v2816_v49 }
 0x7af   :  { %v1049_v50 = vsub.f32 %v1027_v30, %v1045_v7  ;;  %v2415_v30 = vld [vmem:[%s3562_s8] ss:$0 sm:$0xff] }
 0x7b1   :  { %v1053_v51 = vmul.f32 %v1049_v50, %v1049_v50 }
 0x7b3   :  { %v1057_v52 = vsel %vm125_vm0, %v1053_v51, 0.0 }
 0x7b4   :  { %1058 = vadd.xlane.f32.xlu1 %v1057_v52  ;;  %v1038_v62 = vpop.xlane.xlu1 %1037 }
 0x7b5   :  { %v1046_v8 = vmul.f32 %v1038_v62, %v2816_v49 }
 0x7b7   :  { %v1050_v53 = vsub.f32 %v1028_v37, %v1046_v8 }
 0x7b9   :  { %v1054_v54 = vmul.f32 %v1050_v53, %v1050_v53 }
 0x7bb   :  { %v1060_v55 = vsel %vm125_vm0, %v1054_v54, 0.0 }
 0x7bc   :  { %1061 = vadd.xlane.f32.xlu0 %v1060_v55 }
 0x7df   :  { %v1041_v28 = vpop.xlane.xlu0 %1040 }
 0x7e0   :  { %v1047_v56 = vmul.f32 %v1041_v28, %v2816_v49 }
 0x7e2   :  { %v3093_v57 = vsub.f32 %v1029_v14, %v1047_v56 }
 0x7e4   :  { %v1055_v58 = vmul.f32 %v3093_v57, %v3093_v57 }
 0x7e6   :  { %v1063_v59 = vsel %vm125_vm0, %v1055_v58, 0.0 }
 0x7e7   :  { %v1044_v61 = vpop.xlane.xlu2 %1043  ;;  %1064 = vadd.xlane.f32.xlu2 %v1063_v59 }
 0x7e8   :  { %v1048_v0 = vmul.f32 %v1044_v61, %v2816_v49 }
 0x7ea   :  { %v3099_v2 = vsub.f32 %v1030_v47, %v1048_v0 }
 0x7ec   :  { %v1056_v3 = vmul.f32 %v3099_v2, %v3099_v2 }
 0x7ee   :  { %v1066_v10 = vsel %vm125_vm0, %v1056_v3, 0.0 }
 0x7ef   :  { %1067 = vadd.xlane.f32.xlu1 %v1066_v10 }
 0x827   :  { %v1059_v17 = vpop.xlane.xlu1 %1058 }
 0x828   :  { %v1069_v18 = vmul.f32 %v1059_v17, %v2816_v49 }
 0x82a   :  { %v1073_v19 = vadd.f32 1e-05, %v1069_v18 }
 0x82c   :  { %2469 = vrsqrt.f32 %v1073_v19  ;;  %vm1083_vm10 = vweird.f32 %v1073_v19 }
 0x82f   :  { %v1062_v21 = vpop.xlane.xlu0 %1061 }
 0x830   :  { %v1070_v22 = vmul.f32 %v1062_v21, %v2816_v49 }
 0x832   :  { %v2470_v23 = vpop.eup %2469  ;;  %v1074_v24 = vadd.f32 1e-05, %v1070_v22 }
 0x833   :  { %v1078_v25 = vmul.f32 %v2470_v23, %v1073_v19  ;;  %vm1084_vm9 = vweird.f32 %v2470_v23 }
 0x834   :  { %2471 = vrsqrt.f32 %v1074_v24  ;;  %vm1085_vm12 = vmor %vm1083_vm10, %vm1084_vm9  ;;  %vm1093_vm14 = vweird.f32 %v1074_v24 }
 0x835   :  { %v1079_v26 = vmul.f32 %v2470_v23, %v1078_v25 }
 0x837   :  { %v1080_v27 = vmul.f32 0.5, %v1079_v26 }
 0x839   :  { %v1081_v9 = vsub.f32 1.5, %v1080_v27 }
 0x83a   :  { %v2472_v31 = vpop.eup %2471 }
 0x83b   :  { %v1082_v32 = vmul.f32 %v2470_v23, %v1081_v9  ;;  %v1088_v1 = vmul.f32 %v2472_v31, %v1074_v24  ;;  %vm1094_vm13 = vweird.f32 %v2472_v31 }
 0x83c   :  { %vm1095_vm15 = vmor %vm1093_vm14, %vm1094_vm13 }
 0x83d   :  { %v1086_v33 = vsel %vm1085_vm12, %v2470_v23, %v1082_v32  ;;  %v1089_v13 = vmul.f32 %v2472_v31, %v1088_v1 }
 0x83e   :  { %v1117_v34 = vmul.f32 %v1086_v33, %v1049_v50 }
 0x83f   :  { %v1090_v36 = vmul.f32 0.5, %v1089_v13 }
 0x840   :  { %v1124_v37 = vmul.f32 %v2415_v30, %v1117_v34 }
 0x841   :  { %v1091_v38 = vsub.f32 1.5, %v1090_v36 }
 0x842   :  { %v3124_v39 = vadd.f32 %v2416_v35, %v1124_v37 }
 0x843   :  { %v1092_v20 = vmul.f32 %v2472_v31, %v1091_v38 }
 0x844   :  { %2270 = vmatmul.msk.f32.vlgmr.msrb.gmra.mxu1 %vm125_vm0, %v3124_v39 }
 0x845   :  { %v1096_v40 = vsel %vm1095_vm15, %v2472_v31, %v1092_v20 }
 0x846   :  { %v1118_v42 = vmul.f32 %v1096_v40, %v1050_v53 }
 0x848   :  { %v1125_v14 = vmul.f32 %v2415_v30, %v1118_v42 }
 0x84a   :  { %v3128_v41 = vadd.f32 %v2416_v35, %v1125_v14 }
 0x84c   :  { %2271 = vmatmul.msk.f32.gmra.mxu1 %vm125_vm0, %v3128_v41 }
 0x85a   :  { %v1065_v43 = vpop.xlane.xlu2 %1064 }
 0x85b   :  { %v1071_v44 = vmul.f32 %v1065_v43, %v2816_v49 }
 0x85d   :  { %v1075_v6 = vadd.f32 1e-05, %v1071_v44 }
 0x85f   :  { %2473 = vrsqrt.f32 %v1075_v6  ;;  %vm1103_vm3 = vweird.f32 %v1075_v6 }
 0x862   :  { %v1068_v45 = vpop.xlane.xlu1 %1067 }
 0x863   :  { %v1072_v47 = vmul.f32 %v1068_v45, %v2816_v49 }
 0x865   :  { %v2474_v46 = vpop.eup %2473  ;;  %v1076_v48 = vadd.f32 1e-05, %v1072_v47 }
 0x866   :  { %v1098_v7 = vmul.f32 %v2474_v46, %v1075_v6  ;;  %vm1104_vm2 = vweird.f32 %v2474_v46 }
 0x867   :  { %2475 = vrsqrt.f32 %v1076_v48  ;;  %vm1105_vm4 = vmor %vm1103_vm3, %vm1104_vm2  ;;  %vm1113_vm9 = vweird.f32 %v1076_v48 }
 0x868   :  { %v1099_v50 = vmul.f32 %v2474_v46, %v1098_v7 }
 0x86a   :  { %v1100_v51 = vmul.f32 0.5, %v1099_v50 }
 0x86c   :  { %v1101_v52 = vsub.f32 1.5, %v1100_v51 }
 0x86d   :  { %v2476_v62 = vpop.eup %2475 }
 0x86e   :  { %v1102_v8 = vmul.f32 %v2474_v46, %v1101_v52  ;;  %v1108_v53 = vmul.f32 %v2476_v62, %v1076_v48  ;;  %vm1114_vm5 = vweird.f32 %v2476_v62 }
 0x86f   :  { %vm1115_vm10 = vmor %vm1113_vm9, %vm1114_vm5 }
 0x870   :  { %v1106_v54 = vsel %vm1105_vm4, %v2474_v46, %v1102_v8  ;;  %v1109_v55 = vmul.f32 %v2476_v62, %v1108_v53 }
 0x871   :  { %v1119_v28 = vmul.f32 %v1106_v54, %v3093_v57  ;;  %v2417_v57 = vld [vmem:[%s3557_s3 + $0x1] ss:$0 sm:$0xff] }
 0x872   :  { %v1110_v56 = vmul.f32 0.5, %v1109_v55 }
 0x873   :  { %v1126_v58 = vmul.f32 %v2415_v30, %v1119_v28 }
 0x874   :  { %v1111_v59 = vsub.f32 1.5, %v1110_v56 }
 0x875   :  { %v3135_v61 = vadd.f32 %v2416_v35, %v1126_v58 }
 0x876   :  { %v1112_v0 = vmul.f32 %v2476_v62, %v1111_v59 }
 0x877   :  { %2272 = vmatmul.msk.f32.gmra.mxu1 %vm125_vm0, %v3135_v61 }
 0x878   :  { %v1116_v3 = vsel %vm1115_vm10, %v2476_v62, %v1112_v0 }
 0x879   :  { %v1120_v10 = vmul.f32 %v1116_v3, %v3099_v2 }
 0x87b   :  { %v1127_v60 = vmul.f32 %v2415_v30, %v1120_v10 }
 0x87d   :  { %v3140_v11 = vadd.f32 %v2416_v35, %v1127_v60 }
 0x87f   :  { %2273 = vmatmul.msk.f32.gmra.mxu1 %vm125_vm0, %v3140_v11 }
 0x8c1   :  { %v1174_v12 = vpop.f32.mrf.mxu1 }
 0x8c2   :  { %v1175_v16 = vadd.f32 %v2417_v57, %v1174_v12 }
 0x8c4   :  { %1192 = vrot.lane.b32.xlu2 %v1175_v16, %s2552_s27  ;;  %v1186_v27 = vmul.f32 0.25, %v1175_v16 }
 0x8c9   :  { %v1177_v17 = vpop.f32.mrf.mxu1 }
 0x8ca   :  { %v1178_v18 = vadd.f32 %v2417_v57, %v1177_v17 }
 0x8cc   :  { %1194 = vrot.lane.b32.xlu0 %v1178_v18, %s2552_s27  ;;  %1388 = vrot.lane.b32.xlu2 %v1178_v18, %s2551_s26  ;;  %v3150_v2 = vpack.i.bf16 %v1175_v16, %v1178_v18  ;;  %v1187_v19 = vmul.f32 0.25, %v1178_v18 }
 0x8d4   :  { %1384 = vrot.lane.b32.xlu2 %v1187_v19, %s2553_s28 }
 0x8f4   :  { %v1180_v21 = vpop.f32.mrf.mxu1 }
 0x8f5   :  { %v1181_v22 = vadd.f32 %v2417_v57, %v1180_v21 }
 0x8f7   :  { %1231 = vrot.lane.b32.xlu0 %v1181_v22, %s2552_s27  ;;  %v1188_v23 = vmul.f32 0.25, %v1181_v22 }
 0x8f9   :  { %1421 = vrot.lane.b32.xlu2 %v1188_v23, %s2553_s28 }
 0x8fc   :  { %v1183_v24 = vpop.f32.mrf.mxu1 }
 0x8fd   :  { %v1184_v25 = vadd.f32 %v2417_v57, %v1183_v24 }
 0x8ff   :  { %1386 = vrot.lane.b32.xlu0 %v1175_v16, %s2551_s26  ;;  %1233 = vrot.lane.b32.xlu1 %v1184_v25, %s2552_s27  ;;  %v3157_v26 = vpack.i.bf16 %v1181_v22, %v1184_v25  ;;  %v1189_v9 = vmul.f32 0.25, %v1184_v25 }
 0x907   :  { %1427 = vrot.lane.b32.xlu0 %v1184_v25, %s2551_s26  ;;  %1382 = vrot.lane.b32.xlu1 %v1186_v27, %s2553_s28 }
 0x90f   :  { %1425 = vrot.lane.b32.xlu1 %v1181_v22, %s2551_s26  ;;  %1423 = vrot.lane.b32.xlu0 %v1189_v9, %s2553_s28 }
 0x91e   :  { %v1193_v32 = vpop.permute.xlu2 %1192 }
 0x926   :  { %v1389_v13 = vpop.permute.xlu2 %1388 }
 0x92e   :  { %v1385_v36 = vpop.permute.xlu2 %1384 }
 0x93e   :  { %v1195_v31 = vpop.permute.xlu0 %1194 }
 0x93f   :  { %2274 = vmatpush.xpose.msk.msra.mxu2 %vm177_vm1, %v1195_v31 }
 0x943   :  { %2275 = vmatpush.xpose.msk.msra.mxu2 %vm177_vm1, %v1193_v32 }
 0x946   :  { %2276 = vmatmul.msk.f32.vlgmr.msra.gmra.mxu2 %vm177_vm1, %v1186_v27 }
 0x94e   :  { %2277 = vmatmul.msk.f32.gmra.mxu2 %vm177_vm1, %v1187_v19 }
 0x953   :  { %v1422_v38 = vpop.permute.xlu2 %1421 }
 0x969   :  { %v1232_v1 = vpop.permute.xlu0 %1231 }
 0x971   :  { %v1387_v30 = vpop.permute.xlu0 %1386  ;;  %v1234_v33 = vpop.permute.xlu1 %1233 }
 0x972   :  { %2278 = vmatpush.xpose.msk.msra.mxu0 %vm177_vm1, %v1234_v33 }
 0x976   :  { %2279 = vmatpush.xpose.msk.msra.mxu0 %vm177_vm1, %v1232_v1 }
 0x979   :  { %v1428_v34 = vpop.permute.xlu0 %1427  ;;  %2280 = vmatmul.msk.f32.vlgmr.msra.gmra.mxu0 %vm177_vm1, %v1188_v23  ;;  %v1383_v35 = vpop.permute.xlu1 %1382 }
 0x97a   :  { %2286 = vmatpush.xpose.msk.msrb.mxu0 %vm177_vm1, %v1389_v13  ;;  %2290 = vmatpush.xpose.msk.msra.mxu1 %vm177_vm1, %v1428_v34 }
 0x97e   :  { %2287 = vmatpush.xpose.msk.msrb.mxu0 %vm177_vm1, %v1387_v30 }
 0x981   :  { %v1426_v37 = vpop.permute.xlu1 %1425  ;;  %2281 = vmatmul.msk.f32.gmra.mxu0 %vm177_vm1, %v1189_v9  ;;  %v1424_v20 = vpop.permute.xlu0 %1423 }
 0x982   :  { %2291 = vmatpush.xpose.msk.msra.mxu1 %vm177_vm1, %v1426_v37 }
 0x985   :  { %2292 = vmatmul.msk.f32.vlgmr.msra.gmra.mxu1 %vm177_vm1, %v1422_v38 }
 0x989   :  { %2288 = vmatmul.msk.f32.vlgmr.msrb.gmra.mxu0 %vm177_vm1, %v1383_v35 }
 0x98d   :  { %2293 = vmatmul.msk.f32.gmra.mxu1 %vm177_vm1, %v1424_v20 }
 0x991   :  { %2289 = vmatmul.msk.f32.gmra.mxu0 %vm177_vm1, %v1385_v36 }
 0x9c9   :  { %v1223_v40 = vpop.f32.mrf.mxu2 }
 0x9ca   :  { %v1268_v42 = vsel %vm177_vm1, %v1223_v40, -inf }
 0x9cb   :  { %1269 = vmax.xlane.f32.xlu1 %v1268_v42 }
 0x9d1   :  { %v1226_v14 = vpop.f32.mrf.mxu2 }
 0x9d2   :  { %v1271_v43 = vsel %vm177_vm1, %v1226_v14, -inf }
 0x9d3   :  { %1272 = vmax.xlane.f32.xlu2 %v1271_v43 }
 0x9f6   :  { %v1262_v44 = vpop.f32.mrf.mxu0 }
 0x9f7   :  { %v1274_v6 = vsel %vm177_vm1, %v1262_v44, -inf }
 0x9f8   :  { %1275 = vmax.xlane.f32.xlu0 %v1274_v6 }
 0x9fe   :  { %v1265_v45 = vpop.f32.mrf.mxu0 }
 0x9ff   :  { %v1277_v47 = vsel %vm177_vm1, %v1265_v45, -inf }
 0xa00   :  { %1278 = vmax.xlane.f32.xlu1 %v1277_v47 }
 0xa02   :  { %v3183_v46 = vpop.f32.mrf.mxu1 }
 0xa03   :  { %v1466_v48 = vsel %vm177_vm1, %v3183_v46, -inf }
 0xa04   :  { %1467 = vmax.xlane.f32.xlu2 %v1466_v48 }
 0xa06   :  { %v1415_v7 = vpop.f32.mrf.mxu0 }
 0xa07   :  { %v1460_v51 = vsel %vm177_vm1, %v1415_v7, -inf }
 0xa0a   :  { %v1457_v50 = vpop.f32.mrf.mxu1 }
 0xa0b   :  { %v1469_v52 = vsel %vm177_vm1, %v1457_v50, -inf }
 0xa0c   :  { %1461 = vmax.xlane.f32.xlu2 %v1460_v51  ;;  %1470 = vmax.xlane.f32.xlu1 %v1469_v52 }
 0xa0e   :  { %v1418_v62 = vpop.f32.mrf.mxu0 }
 0xa0f   :  { %v1463_v8 = vsel %vm177_vm1, %v1418_v62, -inf }
 0xa10   :  { %1464 = vmax.xlane.f32.xlu0 %v1463_v8 }
 0xa24   :  { %2389 = vrot.lane.b32.xlu2 %v3150_v2, %s2554_s29 }
 0xa3e   :  { %v1270_v53 = vpop.xlane.xlu1 %1269 }
 0xa3f   :  { %v1280_v54 = vsub.f32 %v1223_v40, %v1270_v53 }
 0xa41   :  { %v1284_v55 = vmul.f32 1.442695, %v1280_v54 }
 0xa43   :  { %2477 = vpow2.f32 %v1284_v55 }
 0xa46   :  { %v1273_v28 = vpop.xlane.xlu2 %1272 }
 0xa47   :  { %v1281_v56 = vsub.f32 %v1226_v14, %v1273_v28 }
 0xa49   :  { %v2478_v58 = vpop.eup %2477  ;;  %v1286_v59 = vmul.f32 1.442695, %v1281_v56 }
 0xa4a   :  { %v1292_v0 = vsel %vm177_vm1, %v2478_v58, 0.0 }
 0xa4b   :  { %2479 = vpow2.f32 %v1286_v59  ;;  %1293 = vadd.xlane.f32.xlu0 %v1292_v0 }
 0xa51   :  { %v2480_v3 = vpop.eup %2479 }
 0xa52   :  { %v1295_v10 = vsel %vm177_vm1, %v2480_v3, 0.0 }
 0xa53   :  { %1296 = vadd.xlane.f32.xlu1 %v1295_v10 }
 0xa5f   :  { %2394 = vrot.lane.b32.xlu0 %v3157_v26, %s2554_s29 }
 0xa6b   :  { %v1276_v57 = vpop.xlane.xlu0 %1275 }
 0xa6c   :  { %v1282_v17 = vsub.f32 %v1262_v44, %v1276_v57 }
 0xa6e   :  { %v1288_v19 = vmul.f32 1.442695, %v1282_v17 }
 0xa73   :  { %v1279_v60 = vpop.xlane.xlu1 %1278 }
 0xa74   :  { %v1283_v12 = vsub.f32 %v1265_v45, %v1279_v60 }
 0xa76   :  { %v1290_v16 = vmul.f32 1.442695, %v1283_v12 }
 0xa77   :  { %v1468_v18 = vpop.xlane.xlu2 %1467 }
 0xa78   :  { %2481 = vpow2.f32 %v1290_v16  ;;  %v1474_v43 = vsub.f32 %v3183_v46, %v1468_v18 }
 0xa79   :  { %2483 = vpow2.f32 %v1288_v19 }
 0xa7a   :  { %v1480_v6 = vmul.f32 1.442695, %v1474_v43 }
 0xa7e   :  { %v3196_v21 = vpop.eup %2481 }
 0xa7f   :  { %v1462_v22 = vpop.xlane.xlu2 %1461  ;;  %v1301_v23 = vsel %vm177_vm1, %v3196_v21, 0.0  ;;  %v1471_v9 = vpop.xlane.xlu1 %1470 }
 0xa80   :  { %v1472_v24 = vsub.f32 %v1415_v7, %v1462_v22  ;;  %1302 = vadd.xlane.f32.xlu2 %v1301_v23  ;;  %v2484_v32 = vpop.eup %2483  ;;  %v1475_v30 = vsub.f32 %v1457_v50, %v1471_v9 }
 0xa81   :  { %v1298_v34 = vsel %vm177_vm1, %v2484_v32, 0.0 }
 0xa82   :  { %v1476_v25 = vmul.f32 1.442695, %v1472_v24  ;;  %v1482_v37 = vmul.f32 1.442695, %v1475_v30  ;;  %v2300_v30 = vld [vmem:[%s3558_s4 + $0x30] sm:$0xff] }
 0xa83   :  { %v1465_v27 = vpop.xlane.xlu0 %1464 }
 0xa84   :  { %2485 = vpow2.f32 %v1476_v25  ;;  %v1473_v31 = vsub.f32 %v1418_v62, %v1465_v27 }
 0xa86   :  { %v1478_v1 = vmul.f32 1.442695, %v1473_v31 }
 0xa87   :  { %v2390_v33 = vpop.permute.xlu2 %2389 }
 0xa88   :  { %2487 = vpow2.f32 %v1478_v1  ;;  %v2391_v13 = vunpack.i.l.bf16 %v2390_v33  ;;  %v2392_v36 = vunpack.i.h.bf16 %v2390_v33  ;;  %v2301_v1 = vld [vmem:[%s3558_s4 + $0x38] sm:$0xff]  ;;  %v2299_v33 = vld [vmem:[%s3558_s4 + $0x28] sm:$0xff] }
 0xa89   :  { %1299 = vadd.xlane.f32.xlu0 %v1298_v34  ;;  %2489 = vpow2.f32 %v1482_v37  ;;  %1628 = vmatpush.msra.mxu0 %v2301_v1  ;;  %v2298_v37 = vld [vmem:[%s3558_s4 + $0x20] sm:$0xff]  ;;  %s2212_s4 = sshll.u32 %s3570_s16, 4  ;;  %s2213_s4 = int_to_ptr.hbm [resolvable:$true] %s2212_s4 }
 0xa8a   :  { %v2486_v35 = vpop.eup %2485  ;;  %1338 = vmatpush.msrb.mxu2 %v2391_v13 }
 0xa8b   :  { %v1484_v38 = vsel %vm177_vm1, %v2486_v35, 0.0  ;;  %1629 = vmatpush.msra.mxu0 %v2300_v30 }
 0xa8c   :  { %1339 = vmatpush.msrb.mxu2 %v2392_v36  ;;  %1485 = vadd.xlane.f32.xlu1 %v1484_v38 }
 0xa8d   :  { %1630 = vmatpush.msra.mxu0 %v2299_v33 }
 0xa8e   :  { %v2488_v20 = vpop.eup %2487 }
 0xa8f   :  { %v1487_v40 = vsel %vm177_vm1, %v2488_v20, 0.0  ;;  %v3203_v42 = vpop.eup %2489  ;;  %1631 = vmatpush.msra.mxu0 %v2298_v37 }
 0xa90   :  { %v1493_v14 = vsel %vm177_vm1, %v3203_v42, 0.0 }
 0xa91   :  { %1488 = vadd.xlane.f32.xlu0 %v1487_v40 }
 0xa98   :  { %2404 = vrot.lane.b32.xlu2 %v3157_v26, %s2555_s30 }
 0xa99   :  { %1494 = vadd.xlane.f32.xlu0 %v1493_v14 }
 0xaa5   :  { %2399 = vrot.lane.b32.xlu1 %v3150_v2, %s2555_s30 }
 0xabe   :  { %v1294_v44 = vpop.xlane.xlu0 %1293 }
 0xabf   :  { %2491 = vrcp.f32 %v1294_v44 }
 0xac0   :  { %2493 = vpow2.f32 %v1480_v6 }
 0xac5   :  { %v2492_v45 = vpop.eup %2491 }
 0xac6   :  { %v1308_v47 = vmul.f32 %v2492_v45, %v2478_v58  ;;  %v1297_v48 = vpop.xlane.xlu1 %1296  ;;  %v2494_v26 = vpop.eup %2493  ;;  %v2418_v45 = vld [vmem:[%s3559_s5 + $0x1] ss:$0 sm:$0xff] }
 0xac7   :  { %2495 = vrcp.f32 %v1297_v48  ;;  %v1490_v50 = vsel %vm177_vm1, %v2494_v26, 0.0 }
 0xac8   :  { %2282 = vmatmul.msk.f32.vlgmr.msrb.gmra.mxu2 %vm177_vm1, %v1308_v47 }
 0xacd   :  { %v2496_v7 = vpop.eup %2495 }
 0xace   :  { %v1309_v51 = vmul.f32 %v2496_v7, %v2480_v3 }
 0xacf   :  { %1491 = vadd.xlane.f32.xlu1 %v1490_v50 }
 0xad0   :  { %2283 = vmatmul.msk.f32.gmra.mxu2 %vm177_vm1, %v1309_v51 }
 0xad1   :  { %v2395_v2 = vpop.permute.xlu0 %2394 }
 0xad2   :  { %v2396_v46 = vunpack.i.l.bf16 %v2395_v2  ;;  %v2397_v52 = vunpack.i.h.bf16 %v2395_v2 }
 0xad4   :  { %1373 = vmatpush.msra.mxu3 %v2396_v46 }
 0xad6   :  { %1374 = vmatpush.msra.mxu3 %v2397_v52 }
 0xaf3   :  { %v1303_v62 = vpop.xlane.xlu2 %1302 }
 0xafb   :  { %v2405_v8 = vpop.permute.xlu2 %2404 }
 0xafc   :  { %v2406_v53 = vunpack.i.l.bf16 %v2405_v8  ;;  %v1300_v54 = vpop.xlane.xlu0 %1299  ;;  %v2407_v55 = vunpack.i.h.bf16 %v2405_v8 }
 0xafd   :  { %2497 = vrcp.f32 %v1300_v54 }
 0xafe   :  { %1565 = vmatpush.msrb.mxu3 %v2406_v53  ;;  %2499 = vrcp.f32 %v1303_v62 }
 0xaff   :  { %v1486_v0 = vpop.xlane.xlu1 %1485 }
 0xb00   :  { %1566 = vmatpush.msrb.mxu3 %v2407_v55  ;;  %2501 = vrcp.f32 %v1486_v0 }
 0xb03   :  { %v2498_v28 = vpop.eup %2497 }
 0xb04   :  { %v1310_v56 = vmul.f32 %v2498_v28, %v2484_v32  ;;  %v2500_v58 = vpop.eup %2499  ;;  %v1489_v3 = vpop.xlane.xlu0 %1488 }
 0xb05   :  { %v1311_v59 = vmul.f32 %v2500_v58, %v3196_v21  ;;  %2503 = vrcp.f32 %v1489_v3 }
 0xb06   :  { %2284 = vmatmul.msk.f32.vlgmr.msra.gmra.mxu3 %vm177_vm1, %v1310_v56  ;;  %v2502_v60 = vpop.eup %2501 }
 0xb07   :  { %v1500_v16 = vmul.f32 %v2502_v60, %v2486_v35 }
 0xb0b   :  { %v2504_v17 = vpop.eup %2503 }
 0xb0c   :  { %v1501_v18 = vmul.f32 %v2504_v17, %v2488_v20  ;;  %v1495_v21 = vpop.xlane.xlu0 %1494 }
 0xb0e   :  { %2285 = vmatmul.msk.f32.gmra.mxu3 %vm177_vm1, %v1311_v59 }
 0xb17   :  { %v2400_v10 = vpop.permute.xlu1 %2399 }
 0xb18   :  { %v2401_v57 = vunpack.i.l.bf16 %v2400_v10  ;;  %v2402_v12 = vunpack.i.h.bf16 %v2400_v10 }
 0xb1a   :  { %1530 = vmatpush.msra.mxu2 %v2401_v57 }
 0xb1c   :  { %1531 = vmatpush.msra.mxu2 %v2402_v12 }
 0xb1d   :  { %2294 = vmatmul.msk.f32.vlgmr.msra.gmra.mxu2 %vm177_vm1, %v1500_v16 }
 0xb25   :  { %2295 = vmatmul.msk.f32.gmra.mxu2 %vm177_vm1, %v1501_v18 }
 0xb42   :  { %v1492_v19 = vpop.xlane.xlu1 %1491 }
 0xb43   :  { %2505 = vrcp.f32 %v1492_v19 }
 0xb44   :  { %2507 = vrcp.f32 %v1495_v21 }
 0xb49   :  { %v2506_v22 = vpop.eup %2505 }
 0xb4a   :  { %v1502_v23 = vmul.f32 %v2506_v22, %v2494_v26  ;;  %v2508_v24 = vpop.eup %2507 }
 0xb4b   :  { %v1503_v25 = vmul.f32 %v2508_v24, %v3203_v42  ;;  %v1341_v27 = vpop.f32.mrf.mxu2 }
 0xb4c   :  { %2296 = vmatmul.msk.f32.vlgmr.msrb.gmra.mxu3 %vm177_vm1, %v1502_v23 }
 0xb53   :  { %v1344_v9 = vpop.f32.mrf.mxu2 }
 0xb54   :  { %2297 = vmatmul.msk.f32.gmra.mxu3 %vm177_vm1, %v1503_v25 }
 0xb89   :  { %v1376_v13 = vpop.f32.mrf.mxu3 }
 0xb91   :  { %v1379_v34 = vpop.f32.mrf.mxu3 }
 0xba0   :  { %v1533_v31 = vpop.f32.mrf.mxu2 }
 0xba1   :  { %1578 = vrot.lane.b32.xlu0 %v1533_v31, %s2556_s15 }
 0xba8   :  { %v1536_v32 = vpop.f32.mrf.mxu2 }
 0xba9   :  { %1580 = vrot.lane.b32.xlu1 %v1536_v32, %s2556_s15 }
 0xbcf   :  { %v1568_v35 = vpop.f32.mrf.mxu3 }
 0xbd0   :  { %1582 = vrot.lane.b32.xlu2 %v1568_v35, %s2556_s15 }
 0xbd7   :  { %v1571_v36 = vpop.f32.mrf.mxu3 }
 0xbd8   :  { %1584 = vrot.lane.b32.xlu2 %v1571_v36, %s2556_s15 }
 0xc13   :  { %v1579_v38 = vpop.permute.xlu0 %1578 }
 0xc14   :  { %v1590_v20 = vsel %vm177_vm1, %v1341_v27, %v1579_v38 }
 0xc15   :  { %2303 = vmatmul.msk.f32.vlgmr.msra.gmra.mxu0 %vm125_vm0, %v1590_v20  ;;  %v2419_v20 = vld [vmem:[%s3560_s6 + $0x1] ss:$0 sm:$0xff]  ;;  %s3576_s6 = smov 32  }
 0xc1b   :  { %v1581_v40 = vpop.permute.xlu1 %1580 }
 0xc1c   :  { %v1591_v42 = vsel %vm177_vm1, %v1344_v9, %v1581_v40 }
 0xc1d   :  { %2304 = vmatmul.msk.f32.gmra.mxu0 %vm125_vm0, %v1591_v42 }
 0xc2a   :  { %v1583_v14 = vpop.permute.xlu2 %1582 }
 0xc2b   :  { %v1592_v43 = vsel %vm177_vm1, %v1376_v13, %v1583_v14 }
 0xc2c   :  { %2305 = vmatmul.msk.f32.gmra.mxu0 %vm125_vm0, %v1592_v43 }
 0xc32   :  { %v1585_v44 = vpop.permute.xlu2 %1584 }
 0xc33   :  { %v1593_v6 = vsel %vm177_vm1, %v1379_v34, %v1585_v44  ;;  %v2420_v44 = vld [vmem:[%s3561_s7 + $0x1] ss:$0 sm:$0xff] }
 0xc34   :  { %2306 = vmatmul.msk.f32.gmra.mxu0 %vm125_vm0, %v1593_v6 }
 0xc92   :  { %v1633_v47 = vpop.f32.mrf.mxu0 }
 0xc93   :  { %v1634_v48 = vadd.f32 %v2418_v45, %v1633_v47 }
 0xc95   :  { %v1645_v26 = vadd.f32 %v1634_v48, %v3124_v39 }
 0xc97   :  { %v1653_v7 = vsel %vm125_vm0, %v1645_v26, 0.0 }
 0xc98   :  { %1654 = vadd.xlane.f32.xlu0 %v1653_v7 }
 0xc9a   :  { %v1636_v50 = vpop.f32.mrf.mxu0 }
 0xc9b   :  { %v1637_v51 = vadd.f32 %v2418_v45, %v1636_v50 }
 0xc9d   :  { %v1646_v2 = vadd.f32 %v1637_v51, %v3128_v41 }
 0xc9f   :  { %v1656_v46 = vsel %vm125_vm0, %v1646_v2, 0.0 }
 0xca0   :  { %1657 = vadd.xlane.f32.xlu2 %v1656_v46 }
 0xca9   :  { %v1639_v52 = vpop.f32.mrf.mxu0 }
 0xcaa   :  { %v1640_v62 = vadd.f32 %v2418_v45, %v1639_v52 }
 0xcac   :  { %v1647_v8 = vadd.f32 %v1640_v62, %v3135_v61 }
 0xcae   :  { %v1659_v53 = vsel %vm125_vm0, %v1647_v8, 0.0 }
 0xcaf   :  { %1660 = vadd.xlane.f32.xlu1 %v1659_v53 }
 0xcb1   :  { %v1642_v54 = vpop.f32.mrf.mxu0 }
 0xcb2   :  { %v1643_v55 = vadd.f32 %v2418_v45, %v1642_v54 }
 0xcb4   :  { %v1648_v39 = vadd.f32 %v1643_v55, %v3140_v11 }
 0xcb6   :  { %v1662_v28 = vsel %vm125_vm0, %v1648_v39, 0.0 }
 0xcb7   :  { %1663 = vadd.xlane.f32.xlu0 %v1662_v28 }
 0xd0b   :  { %v1655_v56 = vpop.xlane.xlu0 %1654 }
 0xd0c   :  { %v1665_v41 = vmul.f32 %v1655_v56, %v2816_v49 }
 0xd0e   :  { %v1669_v58 = vsub.f32 %v1645_v26, %v1665_v41 }
 0xd10   :  { %v1673_v59 = vmul.f32 %v1669_v58, %v1669_v58 }
 0xd12   :  { %v1677_v0 = vsel %vm125_vm0, %v1673_v59, 0.0 }
 0xd13   :  { %1678 = vadd.xlane.f32.xlu2 %v1677_v0  ;;  %v1658_v3 = vpop.xlane.xlu2 %1657 }
 0xd14   :  { %v1666_v61 = vmul.f32 %v1658_v3, %v2816_v49 }
 0xd16   :  { %v1670_v10 = vsub.f32 %v1646_v2, %v1666_v61 }
 0xd18   :  { %v1674_v60 = vmul.f32 %v1670_v10, %v1670_v10 }
 0xd1a   :  { %v1680_v57 = vsel %vm125_vm0, %v1674_v60, 0.0 }
 0xd1b   :  { %1681 = vadd.xlane.f32.xlu1 %v1680_v57 }
 0xd22   :  { %v1661_v11 = vpop.xlane.xlu1 %1660 }
 0xd23   :  { %v1667_v12 = vmul.f32 %v1661_v11, %v2816_v49 }
 0xd25   :  { %v3263_v16 = vsub.f32 %v1647_v8, %v1667_v12 }
 0xd27   :  { %v1675_v17 = vmul.f32 %v3263_v16, %v3263_v16 }
 0xd29   :  { %v1683_v18 = vsel %vm125_vm0, %v1675_v17, 0.0 }
 0xd2a   :  { %v1664_v19 = vpop.xlane.xlu0 %1663  ;;  %1684 = vadd.xlane.f32.xlu0 %v1683_v18 }
 0xd2b   :  { %v1668_v21 = vmul.f32 %v1664_v19, %v2816_v49 }
 0xd2d   :  { %v3269_v22 = vsub.f32 %v1648_v39, %v1668_v21 }
 0xd2f   :  { %v1676_v23 = vmul.f32 %v3269_v22, %v3269_v22 }
 0xd31   :  { %v1686_v24 = vsel %vm125_vm0, %v1676_v23, 0.0 }
 0xd32   :  { %1687 = vadd.xlane.f32.xlu2 %v1686_v24 }
 0xd86   :  { %v1679_v25 = vpop.xlane.xlu2 %1678 }
 0xd87   :  { %v1689_v27 = vmul.f32 %v1679_v25, %v2816_v49 }
 0xd89   :  { %v1693_v9 = vadd.f32 1e-05, %v1689_v27 }
 0xd8b   :  { %2509 = vrsqrt.f32 %v1693_v9  ;;  %vm1703_vm12 = vweird.f32 %v1693_v9 }
 0xd8e   :  { %v1682_v31 = vpop.xlane.xlu1 %1681 }
 0xd8f   :  { %v1690_v32 = vmul.f32 %v1682_v31, %v2816_v49 }
 0xd91   :  { %v2510_v1 = vpop.eup %2509  ;;  %v1694_v30 = vadd.f32 1e-05, %v1690_v32 }
 0xd92   :  { %v1698_v33 = vmul.f32 %v2510_v1, %v1693_v9  ;;  %vm1704_vm1 = vweird.f32 %v2510_v1 }
 0xd93   :  { %2511 = vrsqrt.f32 %v1694_v30  ;;  %vm1705_vm13 = vmor %vm1703_vm12, %vm1704_vm1  ;;  %vm1713_vm15 = vweird.f32 %v1694_v30 }
 0xd94   :  { %v1699_v13 = vmul.f32 %v2510_v1, %v1698_v33  ;;  %v2319_v33 = vld [vmem:[%s3564_s10 + $0xb0] sm:$0xff] }
 0xd96   :  { %v1700_v34 = vmul.f32 0.5, %v1699_v13  ;;  %v2318_v13 = vld [vmem:[%s3564_s10 + $0xa8] sm:$0xff] }
 0xd98   :  { %v1701_v35 = vsub.f32 1.5, %v1700_v34  ;;  %v2317_v34 = vld [vmem:[%s3564_s10 + $0xa0] sm:$0xff] }
 0xd99   :  { %v2512_v36 = vpop.eup %2511 }
 0xd9a   :  { %v1702_v37 = vmul.f32 %v2510_v1, %v1701_v35  ;;  %v1708_v38 = vmul.f32 %v2512_v36, %v1694_v30  ;;  %vm1714_vm14 = vweird.f32 %v2512_v36  ;;  %v2316_v35 = vld [vmem:[%s3564_s10 + $0x98] sm:$0xff] }
 0xd9b   :  { %vm1715_vm2 = vmor %vm1713_vm15, %vm1714_vm14 }
 0xd9c   :  { %v1706_v40 = vsel %vm1705_vm13, %v2510_v1, %v1702_v37  ;;  %v1709_v42 = vmul.f32 %v2512_v36, %v1708_v38  ;;  %v2314_v37 = vld [vmem:[%s3564_s10 + $0x88] sm:$0xff]  ;;  %v2313_v38 = vld [vmem:[%s3564_s10 + $0x80] sm:$0xff] }
 0xd9d   :  { %v1737_v14 = vmul.f32 %v1706_v40, %v1669_v58  ;;  %v1685_v43 = vpop.xlane.xlu0 %1684  ;;  %v2311_v40 = vld [vmem:[%s3564_s10 + $0x70] sm:$0xff] }
 0xd9e   :  { %v1710_v6 = vmul.f32 0.5, %v1709_v42  ;;  %v1691_v45 = vmul.f32 %v1685_v43, %v2816_v49  ;;  %v2310_v42 = vld [vmem:[%s3564_s10 + $0x68] sm:$0xff] }
 0xd9f   :  { %v1744_v47 = vmul.f32 %v2419_v20, %v1737_v14  ;;  %v2309_v14 = vld [vmem:[%s3564_s10 + $0x60] sm:$0xff] }
 0xda0   :  { %v1711_v48 = vsub.f32 1.5, %v1710_v6  ;;  %v1695_v26 = vadd.f32 1e-05, %v1691_v45 }
 0xda1   :  { %v3283_v7 = vadd.f32 %v2420_v44, %v1744_v47 }
 0xda2   :  { %v1712_v50 = vmul.f32 %v2512_v36, %v1711_v48  ;;  %2513 = vrsqrt.f32 %v1695_v26  ;;  %vm1723_vm4 = vweird.f32 %v1695_v26 }
 0xda3   :  { %1791 = vrot.lane.b32.xlu1 %v3283_v7, %s3576_s6  ;;  %v1775_v28 = vrot.slane %v3283_v7, 1  ;;  %v1759_v43 = vrot.slane %v3283_v7, 7 }
 0xda4   :  { %v1716_v51 = vsel %vm1715_vm2, %v2512_v36, %v1712_v50  ;;  %v2315_v36 = vld [vmem:[%s3564_s10 + $0x90] sm:$0xff] }
 0xda5   :  { %v1738_v2 = vmul.f32 %v1716_v51, %v1670_v10  ;;  %v1688_v46 = vpop.xlane.xlu2 %1687 }
 0xda6   :  { %v1692_v52 = vmul.f32 %v1688_v46, %v2816_v49 }
 0xda7   :  { %v1745_v62 = vmul.f32 %v2419_v20, %v1738_v2 }
 0xda8   :  { %v2514_v8 = vpop.eup %2513  ;;  %v1696_v53 = vadd.f32 1e-05, %v1692_v52 }
 0xda9   :  { %v1718_v54 = vmul.f32 %v2514_v8, %v1695_v26  ;;  %v3288_v55 = vadd.f32 %v2420_v44, %v1745_v62  ;;  %vm1724_vm3 = vweird.f32 %v2514_v8 }
 0xdaa   :  { %2515 = vrsqrt.f32 %v1696_v53  ;;  %vm1725_vm5 = vmor %vm1723_vm4, %vm1724_vm3  ;;  %vm1733_vm10 = vweird.f32 %v1696_v53 }
 0xdab   :  { %v1719_v39 = vmul.f32 %v2514_v8, %v1718_v54  ;;  %1793 = vrot.lane.b32.xlu2 %v3288_v55, %s3576_s6  ;;  %v1776_v56 = vrot.slane %v3288_v55, 1  ;;  %v1760_v50 = vrot.slane %v3288_v55, 7 }
 0xdad   :  { %v1720_v41 = vmul.f32 0.5, %v1719_v39  ;;  %v1777_v58 = vsel %vm761_vm11, %v1775_v28, %v1776_v56  ;;  %v1761_v46 = vsel %vm744_vm6, %v1759_v43, %v1760_v50 }
 0xdae   :  { %1807 = vrot.lane.b32.xlu0 %v1777_v58, %s2554_s29 }
 0xdaf   :  { %v1721_v59 = vsub.f32 1.5, %v1720_v41 }
 0xdb0   :  { %v2516_v0 = vpop.eup %2515 }
 0xdb1   :  { %v1722_v3 = vmul.f32 %v2514_v8, %v1721_v59  ;;  %v1728_v61 = vmul.f32 %v2516_v0, %v1696_v53  ;;  %vm1734_vm9 = vweird.f32 %v2516_v0 }
 0xdb2   :  { %vm1735_vm1 = vmor %vm1733_vm10, %vm1734_vm9  ;;  %vm2199_vm9 = vcmask 1041409  }
 0xdb3   :  { %v1726_v10 = vsel %vm1725_vm5, %v2514_v8, %v1722_v3  ;;  %v1729_v60 = vmul.f32 %v2516_v0, %v1728_v61 }
 0xdb4   :  { %v1739_v57 = vmul.f32 %v1726_v10, %v3263_v16 }
 0xdb5   :  { %v1730_v11 = vmul.f32 0.5, %v1729_v60  ;;  %v2349_v60 = vld [vmem:[%s3566_s12 + $0x178] sm:$0xff] }
 0xdb6   :  { %v1746_v12 = vmul.f32 %v2419_v20, %v1739_v57  ;;  %v2348_v57 = vld [vmem:[%s3566_s12 + $0x170] sm:$0xff]  ;;  %2021 = vmatpush.msra.mxu3 %v2349_v60 }
 0xdb7   :  { %v1731_v17 = vsub.f32 1.5, %v1730_v11  ;;  %v2347_v11 = vld [vmem:[%s3566_s12 + $0x168] sm:$0xff] }
 0xdb8   :  { %v3297_v18 = vadd.f32 %v2420_v44, %v1746_v12  ;;  %2022 = vmatpush.msra.mxu3 %v2348_v57  ;;  %v2346_v12 = vld [vmem:[%s3566_s12 + $0x160] sm:$0xff] }
 0xdb9   :  { %v1732_v19 = vmul.f32 %v2516_v0, %v1731_v17  ;;  %v2345_v17 = vld [vmem:[%s3566_s12 + $0x158] sm:$0xff] }
 0xdba   :  { %1795 = vrot.lane.b32.xlu1 %v3297_v18, %s3576_s6  ;;  %v1778_v21 = vrot.slane %v3297_v18, 1  ;;  %v1762_v2 = vrot.slane %v3297_v18, 7  ;;  %2023 = vmatpush.msra.mxu3 %v2347_v11 }
 0xdbb   :  { %v1736_v23 = vsel %vm1735_vm1, %v2516_v0, %v1732_v19  ;;  %v2344_v19 = vld [vmem:[%s3566_s12 + $0x150] sm:$0xff]  ;;  %vm2203_vm1 = vcmask 123904  }
 0xdbc   :  { %v1740_v24 = vmul.f32 %v1736_v23, %v3269_v22  ;;  %v1779_v25 = vsel %vm761_vm11, %v1776_v56, %v1778_v21  ;;  %v2320_v22 = vld [vmem:[%s3564_s10 + $0xb8] sm:$0xff]  ;;  %v1763_v8 = vsel %vm744_vm6, %v1760_v50, %v1762_v2  ;;  %2024 = vmatpush.msra.mxu3 %v2346_v12  ;;  %v2342_v23 = vld [vmem:[%s3566_s12 + $0x140] sm:$0xff] }
 0xdbd   :  { %v1788_v16 = vmul.f32 %v2888_v63, %v1779_v25  ;;  %1861 = vmatpush.msrb.mxu1 %v2320_v22  ;;  %v1773_v39 = vmul.f32 %v2864_v5, %v1763_v8 }
 0xdbe   :  { %v1747_v27 = vmul.f32 %v2419_v20, %v1740_v24  ;;  %v2312_v20 = vld [vmem:[%s3564_s10 + $0x78] sm:$0xff]  ;;  %2025 = vmatpush.msra.mxu3 %v2345_v17  ;;  %v2421_v24 = vld [vmem:[%s3565_s11 + $0x1] ss:$0 sm:$0xff] }
 0xdbf   :  { %1809 = vrot.lane.b32.xlu0 %v1788_v16, %s2554_s29  ;;  %1862 = vmatpush.msrb.mxu1 %v2319_v33  ;;  %v2339_v33 = vld [vmem:[%s3566_s12 + $0x128] sm:$0xff] }
 0xdc0   :  { %v3306_v9 = vadd.f32 %v2420_v44, %v1747_v27  ;;  %v1770_v44 = vsel %vm744_vm6, 0.0, %v1759_v43  ;;  %2026 = vmatpush.msra.mxu3 %v2344_v19  ;;  %v2336_v43 = vld [vmem:[%s3566_s12 + $0x110] sm:$0xff] }
 0xdc1   :  { %1863 = vmatpush.msrb.mxu1 %v2318_v13  ;;  %v1771_v45 = vmul.f32 %v2843_v15, %v1770_v44 }
 0xdc2   :  { %v1780_v31 = vrot.slane %v3306_v9, 1  ;;  %v1764_v41 = vrot.slane %v3306_v9, 7 }
 0xdc3   :  { %1864 = vmatpush.msrb.mxu1 %v2317_v34 }
 0xdc4   :  { %v1781_v32 = vsel %vm761_vm11, %v1778_v21, %v1780_v31  ;;  %v1786_v1 = vsel %vm761_vm11, %v1780_v31, 0.0  ;;  %v1765_v0 = vsel %vm744_vm6, %v1762_v2, %v1764_v41  ;;  %v2343_v21 = vld [vmem:[%s3566_s12 + $0x148] sm:$0xff] }
 0xdc5   :  { %1811 = vrot.lane.b32.xlu2 %v1781_v32, %s2554_s29  ;;  %v1790_v30 = vmul.f32 %v2905_v29, %v1786_v1  ;;  %1865 = vmatpush.msrb.mxu1 %v2316_v35  ;;  %v2341_v1 = vld [vmem:[%s3566_s12 + $0x138] sm:$0xff] }
 0xdc6   :  { %2027 = vmatpush.msra.mxu3 %v2343_v21  ;;  %1984 = vmatpush.msrb.mxu2 %v2341_v1 }
 0xdc7   :  { %1797 = vrot.lane.b32.xlu0 %v3306_v9, %s3576_s6  ;;  %1813 = vrot.lane.b32.xlu1 %v1790_v30, %s2554_s29  ;;  %v2340_v30 = vld [vmem:[%s3566_s12 + $0x130] sm:$0xff] }
 0xdc8   :  { %1866 = vmatpush.msrb.mxu1 %v2315_v36  ;;  %2028 = vmatpush.msra.mxu3 %v2342_v23 }
 0xdc9   :  { %1985 = vmatpush.msrb.mxu2 %v2340_v30 }
 0xdca   :  { %1867 = vmatpush.msrb.mxu1 %v2314_v37  ;;  %v2338_v37 = vld [vmem:[%s3566_s12 + $0x120] sm:$0xff] }
 0xdcb   :  { %1986 = vmatpush.msrb.mxu2 %v2339_v33 }
 0xdcc   :  { %1868 = vmatpush.msrb.mxu1 %v2313_v38 }
 0xdcd   :  { %1987 = vmatpush.msrb.mxu2 %v2338_v37 }
 0xdce   :  { %1869 = vmatpush.msrb.mxu1 %v2312_v20 }
 0xdd0   :  { %1870 = vmatpush.msrb.mxu1 %v2311_v40 }
 0xdd2   :  { %1871 = vmatpush.msrb.mxu1 %v2310_v42  ;;  %v2337_v42 = vld [vmem:[%s3566_s12 + $0x118] sm:$0xff] }
 0xdd3   :  { %1988 = vmatpush.msrb.mxu2 %v2337_v42 }
 0xdd4   :  { %1872 = vmatpush.msrb.mxu1 %v2309_v14 }
 0xdd5   :  { %1989 = vmatpush.msrb.mxu2 %v2336_v43 }
 0xe05   :  { %v1794_v51 = vpop.permute.xlu2 %1793 }
 0xe06   :  { %v1820_v52 = vsel %vm125_vm0, %v1761_v46, %v1794_v51  ;;  %v2333_v46 = vld [vmem:[%s3566_s12 + $0xf8] sm:$0xff] }
 0xe15   :  { %v1792_v6 = vpop.permute.xlu1 %1791 }
 0xe16   :  { %v1819_v47 = vsel %vm125_vm0, %v1771_v45, %v1792_v6  ;;  %v2335_v6 = vld [vmem:[%s3566_s12 + $0x108] sm:$0xff] }
 0xe17   :  { %1990 = vmatpush.msrb.mxu2 %v2335_v6 }
 0xe1f   :  { %v1812_v56 = vpop.permute.xlu2 %1811 }
 0xe20   :  { %v1808_v48 = vpop.permute.xlu0 %1807 }
 0xe21   :  { %v1823_v26 = vsel %vm810_vm7, %v1819_v47, %v1808_v48  ;;  %v2334_v48 = vld [vmem:[%s3566_s12 + $0x100] sm:$0xff] }
 0xe22   :  { %2322 = vmatmul.msk.f32.vlgmr.msrb.gmra.mxu1 %vm831_vm8, %v1823_v26  ;;  %1991 = vmatpush.msrb.mxu2 %v2334_v48 }
 0xe24   :  { %1992 = vmatpush.msrb.mxu2 %v2333_v46 }
 0xe2c   :  { %v1796_v54 = vpop.permute.xlu1 %1795 }
 0xe2d   :  { %v1821_v28 = vsel %vm125_vm0, %v1773_v39, %v1796_v54  ;;  %v2330_v39 = vld [vmem:[%s3566_s12 + $0xe0] sm:$0xff] }
 0xe2e   :  { %v1825_v58 = vsel %vm810_vm7, %v1821_v28, %v1812_v56  ;;  %v2329_v56 = vld [vmem:[%s3566_s12 + $0xd8] sm:$0xff] }
 0xe31   :  { %v1810_v62 = vpop.permute.xlu0 %1809 }
 0xe32   :  { %v1824_v53 = vsel %vm810_vm7, %v1820_v52, %v1810_v62  ;;  %v2332_v62 = vld [vmem:[%s3566_s12 + $0xf0] sm:$0xff] }
 0xe33   :  { %2323 = vmatmul.msk.f32.gmra.mxu1 %vm831_vm8, %v1824_v53  ;;  %v2331_v53 = vld [vmem:[%s3566_s12 + $0xe8] sm:$0xff]  ;;  %1993 = vmatpush.msrb.mxu2 %v2332_v62 }
 0xe35   :  { %1994 = vmatpush.msrb.mxu2 %v2331_v53 }
 0xe37   :  { %1995 = vmatpush.msrb.mxu2 %v2330_v39 }
 0xe39   :  { %v1798_v59 = vpop.permute.xlu0 %1797  ;;  %v1814_v61 = vpop.permute.xlu1 %1813  ;;  %1996 = vmatpush.msrb.mxu2 %v2329_v56 }
 0xe3a   :  { %v1822_v3 = vsel %vm125_vm0, %v1765_v0, %v1798_v59  ;;  %v2327_v59 = vld [vmem:[%s3566_s12 + $0xc8] sm:$0xff] }
 0xe3b   :  { %2324 = vmatmul.msk.f32.gmra.mxu1 %vm831_vm8, %v1825_v58  ;;  %v1826_v10 = vsel %vm810_vm7, %v1822_v3, %v1814_v61  ;;  %v2328_v58 = vld [vmem:[%s3566_s12 + $0xd0] sm:$0xff]  ;;  %v2326_v61 = vld [vmem:[%s3566_s12 + $0xc0] sm:$0xff] }
 0xe3c   :  { %1997 = vmatpush.msrb.mxu2 %v2328_v58 }
 0xe3e   :  { %1998 = vmatpush.msrb.mxu2 %v2327_v59 }
 0xe40   :  { %1999 = vmatpush.msrb.mxu2 %v2326_v61 }
 0xe43   :  { %2325 = vmatmul.msk.f32.gmra.mxu1 %vm831_vm8, %v1826_v10 }
 0xe9f   :  { %v1874_v25 = vpop.f32.mrf.mxu1 }
 0xea0   :  { %v1875_v16 = vadd.f32 %v2421_v24, %v1874_v25 }
 0xea2   :  { %v3401_v27 = vmax.f32 %v1875_v16, 0.0 }
 0xea4   :  { %1926 = vrot.lane.b32.xlu2 %v3401_v27, %s2554_s29  ;;  %v1894_v13 = vrot.slane %v3401_v27, 7  ;;  %v1910_v34 = vrot.slane %v3401_v27, 1 }
 0xea6   :  { %v1905_v10 = vsel %vm744_vm6, 0.0, %v1894_v13 }
 0xea7   :  { %v1906_v60 = vmul.f32 %v2843_v15, %v1905_v10  ;;  %v2422_v15 = vld [vmem:[%s3567_s13 + $0x1] ss:$0 sm:$0xff] }
 0xeb0   :  { %v1877_v31 = vpop.f32.mrf.mxu1 }
 0xeb1   :  { %v1878_v32 = vadd.f32 %v2421_v24, %v1877_v31 }
 0xeb3   :  { %v1887_v22 = vmax.f32 %v1878_v32, 0.0 }
 0xeb5   :  { %v1895_v35 = vrot.slane %v1887_v22, 7  ;;  %v1911_v36 = vrot.slane %v1887_v22, 1  ;;  %1928 = vrot.lane.b32.xlu0 %v1887_v22, %s2554_s29 }
 0xeb7   :  { %v1912_v38 = vsel %vm761_vm11, %v1910_v34, %v1911_v36  ;;  %v1896_v20 = vsel %vm744_vm6, %v1894_v13, %v1895_v35 }
 0xeb8   :  { %v1880_v40 = vpop.f32.mrf.mxu1  ;;  %2351 = vmatmul.msk.f32.vlgmr.msra.gmra.mxu3 %vm810_vm7, %v1912_v38 }
 0xeb9   :  { %v1881_v14 = vadd.f32 %v2421_v24, %v1880_v40 }
 0xebb   :  { %v1888_v44 = vmax.f32 %v1881_v14, 0.0 }
 0xebd   :  { %v1897_v45 = vrot.slane %v1888_v44, 7  ;;  %v1913_v47 = vrot.slane %v1888_v44, 1  ;;  %1930 = vrot.lane.b32.xlu1 %v1888_v44, %s2554_s29 }
 0xebf   :  { %v1914_v26 = vsel %vm761_vm11, %v1911_v36, %v1913_v47  ;;  %v1898_v50 = vsel %vm744_vm6, %v1895_v35, %v1897_v45 }
 0xec0   :  { %v1883_v51 = vpop.f32.mrf.mxu1  ;;  %v1923_v2 = vmul.f32 %v2888_v63, %v1914_v26 }
 0xec1   :  { %v1884_v52 = vadd.f32 %v2421_v24, %v1883_v51 }
 0xec2   :  { %2352 = vmatmul.msk.f32.gmra.mxu3 %vm810_vm7, %v1923_v2 }
 0xec3   :  { %v1889_v8 = vmax.f32 %v1884_v52, 0.0 }
 0xec5   :  { %v1899_v54 = vrot.slane %v1889_v8, 7  ;;  %v1915_v63 = vrot.slane %v1889_v8, 1  ;;  %1932 = vrot.lane.b32.xlu2 %v1889_v8, %s2554_s29 }
 0xec7   :  { %v1900_v28 = vsel %vm744_vm6, %v1897_v45, %v1899_v54  ;;  %v1916_v41 = vsel %vm761_vm11, %v1913_v47, %v1915_v63  ;;  %v1921_v0 = vsel %vm761_vm11, %v1915_v63, 0.0 }
 0xec8   :  { %v1925_v3 = vmul.f32 %v2905_v29, %v1921_v0  ;;  %v1908_v29 = vmul.f32 %v2864_v5, %v1898_v50 }
 0xeca   :  { %2353 = vmatmul.msk.f32.gmra.mxu3 %vm810_vm7, %v1916_v41 }
 0xed2   :  { %2354 = vmatmul.msk.f32.gmra.mxu3 %vm810_vm7, %v1925_v3 }
 0xefe   :  { %v1927_v57 = vpop.permute.xlu2 %1926 }
 0xeff   :  { %v1938_v11 = vsel %vm810_vm7, %v1906_v60, %v1927_v57 }
 0xf00   :  { %2000 = vmatmul.f32.vlgmr.msrb.gmra.mxu2 %v1938_v11  ;;  %v3513_v11 = vld [vmem:[%s3562_s8 + $0x1] ss:$0 sm:$0xff] }
 0xf1f   :  { %v1933_v23 = vpop.permute.xlu2 %1932 }
 0xf20   :  { %v1941_v24 = vsel %vm810_vm7, %v1900_v28, %v1933_v23 }
 0xf27   :  { %v1929_v12 = vpop.permute.xlu0 %1928 }
 0xf28   :  { %v1939_v17 = vsel %vm810_vm7, %v1896_v20, %v1929_v12 }
 0xf29   :  { %2003 = vmatmul.f32.gmra.mxu2 %v1939_v17 }
 0xf2f   :  { %v1931_v19 = vpop.permute.xlu1 %1930 }
 0xf30   :  { %v1940_v21 = vsel %vm810_vm7, %v1908_v29, %v1931_v19  ;;  %v3518_v29 = vld [vmem:[%s3563_s9 + $0x1] ss:$0 sm:$0xff] }
 0xf31   :  { %2006 = vmatmul.f32.gmra.mxu2 %v1940_v21  ;;  %v3524_v21 = vld [vmem:[%s3568_s14] ss:$0 sm:$0xff]  ;;  %s2561_s14 = smov [#allocation3]  }
 0xf32   :  { %s2210_s19 = sshll.u32 %s2561_s14, 4  ;;  %s2211_s19 = int_to_ptr.vmem [resolvable:$true] %s2210_s19 }
 0xf39   :  { %2009 = vmatmul.f32.gmra.mxu2 %v1941_v24 }
 0xf3b   :  { %v2030_v27 = vpop.f32.mrf.mxu3 }
 0xf45   :  { %v2033_v1 = vpop.f32.mrf.mxu3 }
 0xf4d   :  { %v2036_v35 = vpop.f32.mrf.mxu3 }
 0xf55   :  { %v2039_v14 = vpop.f32.mrf.mxu3 }
 0xf83   :  { %v2001_v25 = vpop.f32.mrf.mxu2 }
 0xf84   :  { %v2002_v16 = vadd.f32 %v2422_v15, %v2001_v25 }
 0xf86   :  { %v2031_v31 = vadd.f32 %v2030_v27, %v2002_v16 }
 0xf88   :  { %v2042_v32 = vadd.f32 %v2031_v31, %v3283_v7 }
 0xf8a   :  { %v2050_v5 = vsel %vm125_vm0, %v2042_v32, 0.0 }
 0xf8b   :  { %2051 = vadd.xlane.f32.xlu0 %v2050_v5 }
 0xfac   :  { %v2004_v30 = vpop.f32.mrf.mxu2 }
 0xfad   :  { %v2005_v22 = vadd.f32 %v2422_v15, %v2004_v30 }
 0xfaf   :  { %v2034_v33 = vadd.f32 %v2033_v1, %v2005_v22 }
 0xfb1   :  { %v2043_v13 = vadd.f32 %v2034_v33, %v3288_v55 }
 0xfb3   :  { %v2053_v34 = vsel %vm125_vm0, %v2043_v13, 0.0 }
 0xfb4   :  { %v2007_v36 = vpop.f32.mrf.mxu2  ;;  %2054 = vadd.xlane.f32.xlu1 %v2053_v34 }
 0xfb5   :  { %v2008_v37 = vadd.f32 %v2422_v15, %v2007_v36 }
 0xfb7   :  { %v2037_v38 = vadd.f32 %v2036_v35, %v2008_v37  ;;  %v2560_v35 = vmov 0  }
 0xfb8   :  { %2408 = vset.pattern.permute.xlu0 %v2560_v35 }
 0xfb9   :  { %v2044_v20 = vadd.f32 %v2037_v38, %v3297_v18 }
 0xfbb   :  { %v2056_v7 = vsel %vm125_vm0, %v2044_v20, 0.0 }
 0xfbc   :  { %2057 = vadd.xlane.f32.xlu2 %v2056_v7  ;;  %v2010_v40 = vpop.f32.mrf.mxu2 }
 0xfbd   :  { %v2011_v42 = vadd.f32 %v2422_v15, %v2010_v40 }
 0xfbf   :  { %v2040_v43 = vadd.f32 %v2039_v14, %v2011_v42 }
 0xfc1   :  { %v2045_v44 = vadd.f32 %v2040_v43, %v3306_v9 }
 0xfc3   :  { %v2059_v55 = vsel %vm125_vm0, %v2045_v44, 0.0 }
 0xfc4   :  { %2060 = vadd.xlane.f32.xlu0 %v2059_v55 }
 0xffe   :  { %v2052_v6 = vpop.xlane.xlu0 %2051 }
 0xfff   :  { %v2062_v45 = vmul.f32 %v2052_v6, %v2816_v49 }
0x1001   :  { %v2066_v47 = vsub.f32 %v2042_v32, %v2062_v45 }
0x1003   :  { %v2070_v48 = vmul.f32 %v2066_v47, %v2066_v47 }
0x1005   :  { %v2074_v26 = vsel %vm125_vm0, %v2070_v48, 0.0 }
0x1006   :  { %2075 = vadd.xlane.f32.xlu1 %v2074_v26 }
0x1027   :  { %v2055_v18 = vpop.xlane.xlu1 %2054 }
0x1028   :  { %v2063_v50 = vmul.f32 %v2055_v18, %v2816_v49 }
0x102a   :  { %v3492_v51 = vsub.f32 %v2043_v13, %v2063_v50 }
0x102c   :  { %v2071_v2 = vmul.f32 %v3492_v51, %v3492_v51 }
0x102e   :  { %v2077_v9 = vsel %vm125_vm0, %v2071_v2, 0.0 }
0x102f   :  { %2078 = vadd.xlane.f32.xlu2 %v2077_v9  ;;  %v2058_v46 = vpop.xlane.xlu2 %2057 }
0x1030   :  { %v2064_v52 = vmul.f32 %v2058_v46, %v2816_v49 }
0x1032   :  { %v3498_v62 = vsub.f32 %v2044_v20, %v2064_v52 }
0x1034   :  { %v2072_v8 = vmul.f32 %v3498_v62, %v3498_v62 }
0x1036   :  { %v2080_v53 = vsel %vm125_vm0, %v2072_v8, 0.0 }
0x1037   :  { %v2061_v54 = vpop.xlane.xlu0 %2060  ;;  %2081 = vadd.xlane.f32.xlu0 %v2080_v53 }
0x1038   :  { %v2065_v63 = vmul.f32 %v2061_v54, %v2816_v49 }
0x103a   :  { %v3504_v39 = vsub.f32 %v2045_v44, %v2065_v63 }
0x103c   :  { %v2073_v28 = vmul.f32 %v3504_v39, %v3504_v39 }
0x103e   :  { %v2083_v56 = vsel %vm125_vm0, %v2073_v28, 0.0 }
0x103f   :  { %2084 = vadd.xlane.f32.xlu1 %v2083_v56 }
0x1079   :  { %v2076_v41 = vpop.xlane.xlu1 %2075 }
0x107a   :  { %v2086_v58 = vmul.f32 %v2076_v41, %v2816_v49 }
0x107c   :  { %v2090_v59 = vadd.f32 1e-05, %v2086_v58 }
0x107e   :  { %2517 = vrsqrt.f32 %v2090_v59  ;;  %vm2100_vm6 = vweird.f32 %v2090_v59 }
0x1084   :  { %v2518_v0 = vpop.eup %2517 }
0x1085   :  { %v2095_v3 = vmul.f32 %v2518_v0, %v2090_v59  ;;  %vm2101_vm11 = vweird.f32 %v2518_v0  ;;  %v2426_v59 = vld [vmem:[#allocation2] ss:$0 sm:$0xff] }
0x1086   :  { %vm2102_vm7 = vmor %vm2100_vm6, %vm2101_vm11 }
0x1087   :  { %v2096_v61 = vmul.f32 %v2518_v0, %v2095_v3 }
0x1089   :  { %v2097_v10 = vmul.f32 0.5, %v2096_v61  ;;  %v2190_v61 = vand.u32 127, %v60_v4 }
0x108b   :  { %v2098_v60 = vsub.f32 1.5, %v2097_v10 }
0x108d   :  { %v2099_v57 = vmul.f32 %v2518_v0, %v2098_v60  ;;  %v2192_v60 = vadd.s32 4294967288, %v2190_v61 }
0x108f   :  { %v2103_v12 = vsel %vm2102_vm7, %v2518_v0, %v2099_v57 }
0x1090   :  { %v2134_v17 = vmul.f32 %v2103_v12, %v2066_v47 }
0x1092   :  { %v2141_v19 = vmul.f32 %v3513_v11, %v2134_v17 }
0x1094   :  { %v2148_v23 = vadd.f32 %v3518_v29, %v2141_v19 }
0x1096   :  { %v2156_v24 = vmul.f32 %v3524_v21, %v2148_v23 }
0x1098   :  { %v2160_v15 = vsel %vm125_vm0, %v2156_v24, 0.0 }
0x1099   :  { %2161 = vadd.xlane.f32.xlu2 %v2160_v15 }
0x10a2   :  { %v2079_v25 = vpop.xlane.xlu2 %2078 }
0x10a3   :  { %v2087_v16 = vmul.f32 %v2079_v25, %v2816_v49 }
0x10a5   :  { %v2091_v27 = vadd.f32 1e-05, %v2087_v16 }
0x10a7   :  { %2519 = vrsqrt.f32 %v2091_v27  ;;  %vm2110_vm12 = vweird.f32 %v2091_v27 }
0x10aa   :  { %v2082_v31 = vpop.xlane.xlu0 %2081 }
0x10ab   :  { %v2088_v32 = vmul.f32 %v2082_v31, %v2816_v49 }
0x10ad   :  { %v2520_v5 = vpop.eup %2519  ;;  %v2092_v1 = vadd.f32 1e-05, %v2088_v32 }
0x10ae   :  { %v2105_v30 = vmul.f32 %v2520_v5, %v2091_v27  ;;  %vm2111_vm8 = vweird.f32 %v2520_v5 }
0x10af   :  { %2521 = vrsqrt.f32 %v2092_v1  ;;  %vm2112_vm13 = vmor %vm2110_vm12, %vm2111_vm8  ;;  %vm2120_vm15 = vweird.f32 %v2092_v1 }
0x10b0   :  { %v2106_v22 = vmul.f32 %v2520_v5, %v2105_v30 }
0x10b2   :  { %v2107_v33 = vmul.f32 0.5, %v2106_v22  ;;  %v2085_v13 = vpop.xlane.xlu1 %2084 }
0x10b3   :  { %v2089_v34 = vmul.f32 %v2085_v13, %v2816_v49 }
0x10b4   :  { %v2108_v36 = vsub.f32 1.5, %v2107_v33 }
0x10b5   :  { %v2522_v37 = vpop.eup %2521  ;;  %v2093_v38 = vadd.f32 1e-05, %v2089_v34 }
0x10b6   :  { %v2109_v20 = vmul.f32 %v2520_v5, %v2108_v36  ;;  %v2115_v7 = vmul.f32 %v2522_v37, %v2092_v1  ;;  %vm2121_vm14 = vweird.f32 %v2522_v37 }
0x10b7   :  { %2523 = vrsqrt.f32 %v2093_v38  ;;  %vm2122_vm2 = vmor %vm2120_vm15, %vm2121_vm14  ;;  %vm2130_vm4 = vweird.f32 %v2093_v38 }
0x10b8   :  { %v2113_v40 = vsel %vm2112_vm13, %v2520_v5, %v2109_v20  ;;  %v2116_v42 = vmul.f32 %v2522_v37, %v2115_v7 }
0x10b9   :  { %v2135_v14 = vmul.f32 %v2113_v40, %v3492_v51 }
0x10ba   :  { %v2117_v43 = vmul.f32 0.5, %v2116_v42 }
0x10bb   :  { %v2142_v44 = vmul.f32 %v3513_v11, %v2135_v14 }
0x10bc   :  { %v2118_v55 = vsub.f32 1.5, %v2117_v43 }
0x10bd   :  { %v2524_v49 = vpop.eup %2523  ;;  %v2149_v6 = vadd.f32 %v3518_v29, %v2142_v44 }
0x10be   :  { %v2119_v45 = vmul.f32 %v2522_v37, %v2118_v55  ;;  %v2125_v47 = vmul.f32 %v2524_v49, %v2093_v38  ;;  %vm2131_vm3 = vweird.f32 %v2524_v49 }
0x10bf   :  { %v2157_v48 = vmul.f32 %v3524_v21, %v2149_v6  ;;  %vm2132_vm5 = vmor %vm2130_vm4, %vm2131_vm3 }
0x10c0   :  { %v2123_v26 = vsel %vm2122_vm2, %v2522_v37, %v2119_v45  ;;  %v2126_v18 = vmul.f32 %v2524_v49, %v2125_v47 }
0x10c1   :  { %v2163_v50 = vsel %vm125_vm0, %v2157_v48, 0.0  ;;  %v2136_v51 = vmul.f32 %v2123_v26, %v3498_v62 }
0x10c2   :  { %v2127_v2 = vmul.f32 0.5, %v2126_v18  ;;  %2164 = vadd.xlane.f32.xlu0 %v2163_v50 }
0x10c3   :  { %v2143_v9 = vmul.f32 %v3513_v11, %v2136_v51 }
0x10c4   :  { %v2128_v46 = vsub.f32 1.5, %v2127_v2 }
0x10c5   :  { %v2150_v52 = vadd.f32 %v3518_v29, %v2143_v9 }
0x10c6   :  { %v2129_v8 = vmul.f32 %v2524_v49, %v2128_v46 }
0x10c7   :  { %v2158_v53 = vmul.f32 %v3524_v21, %v2150_v52 }
0x10c8   :  { %v2133_v54 = vsel %vm2132_vm5, %v2524_v49, %v2129_v8 }
0x10c9   :  { %v2166_v63 = vsel %vm125_vm0, %v2158_v53, 0.0  ;;  %v2137_v28 = vmul.f32 %v2133_v54, %v3504_v39 }
0x10ca   :  { %2167 = vadd.xlane.f32.xlu1 %v2166_v63 }
0x10cb   :  { %v2144_v62 = vmul.f32 %v3513_v11, %v2137_v28 }
0x10cd   :  { %v2151_v56 = vadd.f32 %v3518_v29, %v2144_v62  ;;  %v2183_v29 = vld [vmem:[%s3555_s1] sm:$0x3] }
0x10ce   :  { %vm2184_vm10 = vcmp.gt.f32.partialorder %v2183_v29, 0.5 }
0x10cf   :  { %v2159_v41 = vmul.f32 %v3524_v21, %v2151_v56 }
0x10d1   :  { %v2169_v58 = vsel %vm125_vm0, %v2159_v41, 0.0  ;;  %vm2194_vm0 = vcmask 130112  }
0x10d2   :  { %2170 = vadd.xlane.f32.xlu2 %v2169_v58 }
0x10d6   :  { %2176 = vperm.xlu0 %2408, %v2426_v59  }
0x110c   :  { %v2162_v0 = vpop.xlane.xlu2 %2161 }
0x1135   :  { %v2165_v3 = vpop.xlane.xlu0 %2164 }
0x113d   :  { %v2168_v10 = vpop.xlane.xlu1 %2167 }
0x1145   :  { %v2171_v57 = vpop.xlane.xlu2 %2170 }
0x1148   :  { %v2177_v39 = vpop.permute.xlu0 %2176 }
0x1149   :  { %v2179_v12 = vadd.f32 %v2177_v39, %v2162_v0  ;;  %v2180_v17 = vadd.f32 %v2177_v39, %v2165_v3  ;;  %v2181_v11 = vadd.f32 %v2177_v39, %v2168_v10  ;;  %v2182_v19 = vadd.f32 %v2177_v39, %v2171_v57 }
0x114b   :  { %v2191_v21 = vperm.slane %v2179_v12, %v2190_v61  ;;  %v2193_v23 = vperm.slane %v2180_v17, %v2192_v60  ;;  %v2196_v24 = vperm.slane %v2181_v11, %v2190_v61  ;;  %v2197_v15 = vperm.slane %v2182_v19, %v2192_v60 }
0x114d   :  { %v2195_v4 = vsel %vm2194_vm0, %v2193_v23, %v2191_v21  ;;  %v2198_v25 = vsel %vm2194_vm0, %v2197_v15, %v2196_v24 }
0x114e   :  { %v2200_v16 = vsel %vm2199_vm9, %v2198_v25, %v2195_v4 }
0x114f   :  { %v2202_v27 = vsel %vm2184_vm10, 0.0, %v2200_v16 }
0x1150   :  { %2204 = vst.msk [vmem:[#allocation3] sm:$0x3] %vm2203_vm1, %v2202_v27 }
0x1151   :  { %2215 = dma.vmem_to_hbm [thread:$0]  %s2211_s19, 32, %s2213_s4, [#allocation4]  }
0x1152   :  { %2549 = dma.done.wait [#allocation4], 32  }
0x1153   :  { %2550 = vsyncadd [#allocation4], 4294967264 }
0x1154   :  { %2220 = vsyncpa [#allocation4], 1 }

</bundles_post_ra>
